<compile_context>
chip_gen: v5e
topology: v5e:2x2
jax: 0.10.0
libtpu: 0.0.40
codegen_flags: <defaults>
</compile_context>

<pallas_src>
import jax
import jax.numpy as jnp
from jax.experimental import pallas as pl
from jax.experimental.pallas import tpu as pltpu


# ----------------------------- Pallas kernel --------------------------------
def _banded_conv_kernel(x_ref, w_ref, b_ref, o_ref, acc_ref):
    """x_ref  : (Hp, Wp*Cin)       whole padded image, (W,Cin) flattened minor dim
       w_ref  : (K, Wp*Cin, W*Cp)  banded (Toeplitz-along-W) fused weights
       b_ref  : (1, W*Cp)          fused bias tiled along W
       o_ref  : (TH, W*Cp)         one H-tile of the output (lane-dense)
       acc_ref: (TH, W*Cp) f32     VMEM accumulator
    """
    TH = o_ref.shape[0]
    K = w_ref.shape[0]
    row0 = pl.multiple_of(pl.program_id(1) * TH, TH)

    # Bias folded into the accumulator init (single VPU pass, no extra epilogue).
    acc_ref[...] = jnp.broadcast_to(b_ref[...], acc_ref.shape)

    # 7 kernel rows, unrolled: each iteration is one contiguous row-shifted
    # slice feeding one wide-contraction MXU matmul
    # (M=TH, contraction=Wp*Cin, N=W*Cout_pad).
    for kh in range(K):
        x_rows = x_ref[pl.ds(row0 + kh, TH), :]
        acc_ref[...] += jnp.dot(x_rows, w_ref[kh],
                                preferred_element_type=jnp.float32)

    o_ref[...] = acc_ref[...].astype(o_ref.dtype)


def conv2d_7x7_pallas(x_nchw, w_oihw, bias, *, th=8, lane=128):
    """7x7, stride 1, padding 3, groups 1 conv with bias. NCHW in / NCHW out."""
    N, Cin, H, W = x_nchw.shape
    Cout, _, K, _ = w_oihw.shape
    pad = K // 2
    Hp, Wp = H + 2 * pad, W + 2 * pad
    cp = ((Cout + lane - 1) // lane) * lane      # Cout padded to lane width
    th = min(th, H)
    assert H % th == 0, "H must be divisible by the H-tile"

    # ---- layout prep (fused XLA copies each way) ----
    x_nhwc = jnp.transpose(x_nchw, (0, 2, 3, 1))
    x_pad = jnp.pad(x_nhwc, ((0, 0), (pad, pad), (pad, pad), (0, 0)))
    x2d = x_pad.reshape(N, Hp, Wp * Cin)          # minor dim = Wp*Cin (dense-ish)

    # Banded weight: wb[kh, (w+kw)*Cin+ci, w*cp+co] = w[co, ci, kh, kw]
    w_hwio = jnp.transpose(w_oihw, (2, 3, 1, 0))                    # (K,K,Cin,Cout)
    w_hwio = jnp.pad(w_hwio, ((0, 0), (0, 0), (0, 0), (0, cp - Cout)))
    w_blk = w_hwio.reshape(K, K * Cin, cp)
    wb = jnp.zeros((K, Wp * Cin, W * cp), x_nchw.dtype)
    for w in range(W):                            # trace-time loop, disjoint regions
        wb = wb.at[:, w * Cin:w * Cin + K * Cin, w * cp:(w + 1) * cp].set(w_blk)
    b_row = jnp.tile(jnp.pad(bias, (0, cp - Cout)), (W,)).reshape(1, W * cp)

    wcp = W * cp
    grid = (N, H // th)
    flops = 2 * N * K * H * (Wp * Cin) * wcp
    bytes_accessed = 4 * (N * Hp * Wp * Cin + K * Wp * Cin * wcp
                          + wcp + N * H * wcp)

    out2d = pl.pallas_call(
        _banded_conv_kernel,
        out_shape=jax.ShapeDtypeStruct((N, H, wcp), x_nchw.dtype),
        grid_spec=pltpu.PrefetchScalarGridSpec(
            num_scalar_prefetch=0,
            grid=grid,
            in_specs=[
                # whole padded image for batch element n (re-DMA'd only when n changes)
                pl.BlockSpec((pl.Squeezed(), Hp, Wp * Cin),
                             lambda n, h: (n, 0, 0)),
                # banded weights + bias: constant blocks
                pl.BlockSpec((K, Wp * Cin, wcp), lambda n, h: (0, 0, 0)),
                pl.BlockSpec((1, wcp), lambda n, h: (0, 0)),
            ],
            out_specs=pl.BlockSpec((pl.Squeezed(), th, wcp),
                                   lambda n, h: (n, h, 0)),
            scratch_shapes=[pltpu.VMEM((th, wcp), jnp.float32)],
        ),
        compiler_params=pltpu.CompilerParams(
            dimension_semantics=("parallel", "parallel"),
            vmem_limit_bytes=32 * 1024 * 1024),
        cost_estimate=pl.CostEstimate(flops=flops, transcendentals=0,
                                      bytes_accessed=bytes_accessed),
    )(x2d, wb, b_row)

    out = out2d.reshape(N, H, W, cp)[..., :Cout]
    return jnp.transpose(out, (0, 3, 1, 2))


# --------------------------- parameter setup (glue) --------------------------
def init_params(key, in_ch, out_ch):
    """Deterministic synthetic params for the three conv_bn branches."""
    params = {}
    for name, k in [("small_conv3", 7), ("small_conv1", 5), ("small_conv2", 3)]:
        key, k1, k2, k3, k4, k5 = jax.random.split(key, 6)
        params[name] = dict(
            w=0.1 * jax.random.normal(k1, (out_ch, in_ch, k, k), jnp.float32),
            gamma=1.0 + 0.1 * jax.random.normal(k2, (out_ch,), jnp.float32),
            beta=0.1 * jax.random.normal(k3, (out_ch,), jnp.float32),
            rmean=0.1 * jax.random.normal(k4, (out_ch,), jnp.float32),
            rvar=0.5 + jnp.abs(jax.random.normal(k5, (out_ch,), jnp.float32)),
            eps=1e-5,
            ksize=k,
        )
    return params


def fuse_bn(p):
    std = jnp.sqrt(p["rvar"] + p["eps"])
    t = p["gamma"] / std
    return p["w"] * t[:, None, None, None], p["beta"] - p["rmean"] * t


def get_equivalent_kernel_bias(params, kernel_size=7):
    eq_k, eq_b = fuse_bn(params["small_conv3"])
    for name in ("small_conv1", "small_conv2"):
        sk_w, sk_b = fuse_bn(params[name])
        pad = (kernel_size - params[name]["ksize"]) // 2
        eq_k = eq_k + jnp.pad(sk_w, ((0, 0), (0, 0), (pad, pad), (pad, pad)))
        eq_b = eq_b + sk_b
    return eq_k, eq_b


def reparam_large_kernel_conv_forward(x_nchw, params):
    """Equivalent of ReparamLargeKernelConv.forward (un-merged path)."""
    eq_k, eq_b = get_equivalent_kernel_bias(params)
    return conv2d_7x7_pallas(x_nchw, eq_k, eq_b)


# ------------------------------- reference -----------------------------------
def ref_forward(x, params):
    """Eager reference: three separate conv + BN(eval) branches, summed."""
    out = None
    for name in ("small_conv3", "small_conv1", "small_conv2"):
        p = params[name]
        k = p["ksize"]
        y = jax.lax.conv_general_dilated(
            x, p["w"], window_strides=(1, 1),
            padding=[(k // 2, k // 2)] * 2,
            dimension_numbers=("NCHW", "OIHW", "NCHW"))
        std = jnp.sqrt(p["rvar"] + p["eps"])
        y = ((y - p["rmean"][None, :, None, None])
             / std[None, :, None, None]
             * p["gamma"][None, :, None, None]
             + p["beta"][None, :, None, None])
        out = y if out is None else out + y
    return out


# ---------------------------------- main --------------------------------------
if __name__ == "__main__":
    key = jax.random.PRNGKey(0)
    key, xkey = jax.random.split(key)

    N, Cin, H, W = 2, 4, 16, 16
    Cout = 8

    x = jax.random.normal(xkey, (N, Cin, H, W), jnp.float32)
    params = init_params(key, Cin, Cout)

    out = reparam_large_kernel_conv_forward(x, params)
    out = jax.block_until_ready(out)

    ref = jax.block_until_ready(ref_forward(x, params))
    assert out.shape == (N, Cout, H, W), out.shape
    assert jnp.allclose(out, ref, rtol=1e-4, atol=1e-4), (
        float(jnp.max(jnp.abs(out - ref))))

    print("KERNEL_OK")
</pallas_src>

<mosaic_0001>
module attributes {stable_mosaic.version = 11 : i64} {
  func.func @_banded_conv_kernel(%arg0: i32, %arg1: i32, %arg2: memref<1x22x88xf32, #tpu.memory_space<vmem>>, %arg3: memref<7x88x2048xf32, #tpu.memory_space<vmem>>, %arg4: memref<1x2048xf32, #tpu.memory_space<vmem>>, %arg5: memref<1x8x2048xf32, #tpu.memory_space<vmem>>, %arg6: memref<8x2048xf32, #tpu.memory_space<vmem>>) attributes {dimension_semantics = [#tpu.dimension_semantics<parallel>, #tpu.dimension_semantics<parallel>], iteration_bounds = array<i64: 2, 2>, scalar_prefetch = 0 : i64, scratch_operands = 1 : i64, tpu.core_type = #tpu.core_type<tc>, window_params = [{transform_indices = @transform_0, window_bounds = array<i64: 1, 22, 88>}, {pipeline_mode = #tpu.pipeline_mode<synchronous>, transform_indices = @transform_1, window_bounds = array<i64: 7, 88, 2048>}, {pipeline_mode = #tpu.pipeline_mode<synchronous>, transform_indices = @transform_2, window_bounds = array<i64: 1, 2048>}, {transform_indices = @transform_3, window_bounds = array<i64: 1, 8, 2048>}]} {
    %c8_i32 = arith.constant 8 : i32
    %0 = arith.muli %arg1, %c8_i32 : i32
    %1 = tpu.assume_multiple %0, 8 : i32
    %c0 = arith.constant 0 : index
    %c0_0 = arith.constant 0 : index
    %2 = vector.load %arg4[%c0, %c0_0] : memref<1x2048xf32, #tpu.memory_space<vmem>>, vector<1x2048xf32>
    %3 = vector.shape_cast %2 : vector<1x2048xf32> to vector<1x2048xf32>
    %4 = vector.broadcast %3 : vector<1x2048xf32> to vector<8x2048xf32>
    %c0_1 = arith.constant 0 : index
    %c0_2 = arith.constant 0 : index
    %5 = vector.load %arg6[%c0_1, %c0_2] : memref<8x2048xf32, #tpu.memory_space<vmem>>, vector<8x2048xf32>
    tpu.vector_store %arg6[%c0_1, %c0_2], %4 {strides = array<i32>} : memref<8x2048xf32, #tpu.memory_space<vmem>>, vector<8x2048xf32>,
    %c0_i32 = arith.constant 0 : i32
    %6 = arith.addi %1, %c0_i32 : i32
    %c0_3 = arith.constant 0 : index
    %7 = arith.index_cast %6 : i32 to index
    %c0_4 = arith.constant 0 : index
    %8 = vector.load %arg2[%c0_3, %7, %c0_4] : memref<1x22x88xf32, #tpu.memory_space<vmem>>, vector<1x8x88xf32>
    %9 = vector.shape_cast %8 : vector<1x8x88xf32> to vector<8x88xf32>
    %c0_5 = arith.constant 0 : index
    %c0_6 = arith.constant 0 : index
    %10 = vector.load %arg6[%c0_5, %c0_6] : memref<8x2048xf32, #tpu.memory_space<vmem>>, vector<8x2048xf32>
    %c0_7 = arith.constant 0 : index
    %c0_8 = arith.constant 0 : index
    %c0_9 = arith.constant 0 : index
    %11 = vector.load %arg3[%c0_7, %c0_8, %c0_9] : memref<7x88x2048xf32, #tpu.memory_space<vmem>>, vector<1x88x2048xf32>
    %12 = vector.shape_cast %11 : vector<1x88x2048xf32> to vector<88x2048xf32>
    %cst = arith.constant dense<0.000000e+00> : vector<8x2048xf32>
    %13 = tpu.matmul %9, %12, %cst {dimension_numbers = #tpu.dot_dimension_numbers<[1], [0], [0], [1], [0, 0, 1, 1], [], []>} : vector<8x88xf32>, vector<88x2048xf32>, vector<8x2048xf32> -> vector<8x2048xf32>
    %14 = arith.addf %10, %13 : vector<8x2048xf32>
    %c0_10 = arith.constant 0 : index
    %c0_11 = arith.constant 0 : index
    %15 = vector.load %arg6[%c0_10, %c0_11] : memref<8x2048xf32, #tpu.memory_space<vmem>>, vector<8x2048xf32>
    tpu.vector_store %arg6[%c0_10, %c0_11], %14 {strides = array<i32>} : memref<8x2048xf32, #tpu.memory_space<vmem>>, vector<8x2048xf32>,
    %c1_i32 = arith.constant 1 : i32
    %16 = arith.addi %1, %c1_i32 : i32
    %c0_12 = arith.constant 0 : index
    %17 = arith.index_cast %16 : i32 to index
    %c0_13 = arith.constant 0 : index
    %18 = vector.load %arg2[%c0_12, %17, %c0_13] : memref<1x22x88xf32, #tpu.memory_space<vmem>>, vector<1x8x88xf32>
    %19 = vector.shape_cast %18 : vector<1x8x88xf32> to vector<8x88xf32>
    %c0_14 = arith.constant 0 : index
    %c0_15 = arith.constant 0 : index
    %20 = vector.load %arg6[%c0_14, %c0_15] : memref<8x2048xf32, #tpu.memory_space<vmem>>, vector<8x2048xf32>
    %c1 = arith.constant 1 : index
    %c0_16 = arith.constant 0 : index
    %c0_17 = arith.constant 0 : index
    %21 = vector.load %arg3[%c1, %c0_16, %c0_17] : memref<7x88x2048xf32, #tpu.memory_space<vmem>>, vector<1x88x2048xf32>
    %22 = vector.shape_cast %21 : vector<1x88x2048xf32> to vector<88x2048xf32>
    %cst_18 = arith.constant dense<0.000000e+00> : vector<8x2048xf32>
    %23 = tpu.matmul %19, %22, %cst_18 {dimension_numbers = #tpu.dot_dimension_numbers<[1], [0], [0], [1], [0, 0, 1, 1], [], []>} : vector<8x88xf32>, vector<88x2048xf32>, vector<8x2048xf32> -> vector<8x2048xf32>
    %24 = arith.addf %20, %23 : vector<8x2048xf32>
    %c0_19 = arith.constant 0 : index
    %c0_20 = arith.constant 0 : index
    %25 = vector.load %arg6[%c0_19, %c0_20] : memref<8x2048xf32, #tpu.memory_space<vmem>>, vector<8x2048xf32>
    tpu.vector_store %arg6[%c0_19, %c0_20], %24 {strides = array<i32>} : memref<8x2048xf32, #tpu.memory_space<vmem>>, vector<8x2048xf32>,
    %c2_i32 = arith.constant 2 : i32
    %26 = arith.addi %1, %c2_i32 : i32
    %c0_21 = arith.constant 0 : index
    %27 = arith.index_cast %26 : i32 to index
    %c0_22 = arith.constant 0 : index
    %28 = vector.load %arg2[%c0_21, %27, %c0_22] : memref<1x22x88xf32, #tpu.memory_space<vmem>>, vector<1x8x88xf32>
    %29 = vector.shape_cast %28 : vector<1x8x88xf32> to vector<8x88xf32>
    %c0_23 = arith.constant 0 : index
    %c0_24 = arith.constant 0 : index
    %30 = vector.load %arg6[%c0_23, %c0_24] : memref<8x2048xf32, #tpu.memory_space<vmem>>, vector<8x2048xf32>
    %c2 = arith.constant 2 : index
    %c0_25 = arith.constant 0 : index
    %c0_26 = arith.constant 0 : index
    %31 = vector.load %arg3[%c2, %c0_25, %c0_26] : memref<7x88x2048xf32, #tpu.memory_space<vmem>>, vector<1x88x2048xf32>
    %32 = vector.shape_cast %31 : vector<1x88x2048xf32> to vector<88x2048xf32>
    %cst_27 = arith.constant dense<0.000000e+00> : vector<8x2048xf32>
    %33 = tpu.matmul %29, %32, %cst_27 {dimension_numbers = #tpu.dot_dimension_numbers<[1], [0], [0], [1], [0, 0, 1, 1], [], []>} : vector<8x88xf32>, vector<88x2048xf32>, vector<8x2048xf32> -> vector<8x2048xf32>
    %34 = arith.addf %30, %33 : vector<8x2048xf32>
    %c0_28 = arith.constant 0 : index
    %c0_29 = arith.constant 0 : index
    %35 = vector.load %arg6[%c0_28, %c0_29] : memref<8x2048xf32, #tpu.memory_space<vmem>>, vector<8x2048xf32>
    tpu.vector_store %arg6[%c0_28, %c0_29], %34 {strides = array<i32>} : memref<8x2048xf32, #tpu.memory_space<vmem>>, vector<8x2048xf32>,
    %c3_i32 = arith.constant 3 : i32
    %36 = arith.addi %1, %c3_i32 : i32
    %c0_30 = arith.constant 0 : index
    %37 = arith.index_cast %36 : i32 to index
    %c0_31 = arith.constant 0 : index
    %38 = vector.load %arg2[%c0_30, %37, %c0_31] : memref<1x22x88xf32, #tpu.memory_space<vmem>>, vector<1x8x88xf32>
    %39 = vector.shape_cast %38 : vector<1x8x88xf32> to vector<8x88xf32>
    %c0_32 = arith.constant 0 : index
    %c0_33 = arith.constant 0 : index
    %40 = vector.load %arg6[%c0_32, %c0_33] : memref<8x2048xf32, #tpu.memory_space<vmem>>, vector<8x2048xf32>
    %c3 = arith.constant 3 : index
    %c0_34 = arith.constant 0 : index
    %c0_35 = arith.constant 0 : index
    %41 = vector.load %arg3[%c3, %c0_34, %c0_35] : memref<7x88x2048xf32, #tpu.memory_space<vmem>>, vector<1x88x2048xf32>
    %42 = vector.shape_cast %41 : vector<1x88x2048xf32> to vector<88x2048xf32>
    %cst_36 = arith.constant dense<0.000000e+00> : vector<8x2048xf32>
    %43 = tpu.matmul %39, %42, %cst_36 {dimension_numbers = #tpu.dot_dimension_numbers<[1], [0], [0], [1], [0, 0, 1, 1], [], []>} : vector<8x88xf32>, vector<88x2048xf32>, vector<8x2048xf32> -> vector<8x2048xf32>
    %44 = arith.addf %40, %43 : vector<8x2048xf32>
    %c0_37 = arith.constant 0 : index
    %c0_38 = arith.constant 0 : index
    %45 = vector.load %arg6[%c0_37, %c0_38] : memref<8x2048xf32, #tpu.memory_space<vmem>>, vector<8x2048xf32>
    tpu.vector_store %arg6[%c0_37, %c0_38], %44 {strides = array<i32>} : memref<8x2048xf32, #tpu.memory_space<vmem>>, vector<8x2048xf32>,
    %c4_i32 = arith.constant 4 : i32
    %46 = arith.addi %1, %c4_i32 : i32
    %c0_39 = arith.constant 0 : index
    %47 = arith.index_cast %46 : i32 to index
    %c0_40 = arith.constant 0 : index
    %48 = vector.load %arg2[%c0_39, %47, %c0_40] : memref<1x22x88xf32, #tpu.memory_space<vmem>>, vector<1x8x88xf32>
    %49 = vector.shape_cast %48 : vector<1x8x88xf32> to vector<8x88xf32>
    %c0_41 = arith.constant 0 : index
    %c0_42 = arith.constant 0 : index
    %50 = vector.load %arg6[%c0_41, %c0_42] : memref<8x2048xf32, #tpu.memory_space<vmem>>, vector<8x2048xf32>
    %c4 = arith.constant 4 : index
    %c0_43 = arith.constant 0 : index
    %c0_44 = arith.constant 0 : index
    %51 = vector.load %arg3[%c4, %c0_43, %c0_44] : memref<7x88x2048xf32, #tpu.memory_space<vmem>>, vector<1x88x2048xf32>
    %52 = vector.shape_cast %51 : vector<1x88x2048xf32> to vector<88x2048xf32>
    %cst_45 = arith.constant dense<0.000000e+00> : vector<8x2048xf32>
    %53 = tpu.matmul %49, %52, %cst_45 {dimension_numbers = #tpu.dot_dimension_numbers<[1], [0], [0], [1], [0, 0, 1, 1], [], []>} : vector<8x88xf32>, vector<88x2048xf32>, vector<8x2048xf32> -> vector<8x2048xf32>
    %54 = arith.addf %50, %53 : vector<8x2048xf32>
    %c0_46 = arith.constant 0 : index
    %c0_47 = arith.constant 0 : index
    %55 = vector.load %arg6[%c0_46, %c0_47] : memref<8x2048xf32, #tpu.memory_space<vmem>>, vector<8x2048xf32>
    tpu.vector_store %arg6[%c0_46, %c0_47], %54 {strides = array<i32>} : memref<8x2048xf32, #tpu.memory_space<vmem>>, vector<8x2048xf32>,
    %c5_i32 = arith.constant 5 : i32
    %56 = arith.addi %1, %c5_i32 : i32
    %c0_48 = arith.constant 0 : index
    %57 = arith.index_cast %56 : i32 to index
    %c0_49 = arith.constant 0 : index
    %58 = vector.load %arg2[%c0_48, %57, %c0_49] : memref<1x22x88xf32, #tpu.memory_space<vmem>>, vector<1x8x88xf32>
    %59 = vector.shape_cast %58 : vector<1x8x88xf32> to vector<8x88xf32>
    %c0_50 = arith.constant 0 : index
    %c0_51 = arith.constant 0 : index
    %60 = vector.load %arg6[%c0_50, %c0_51] : memref<8x2048xf32, #tpu.memory_space<vmem>>, vector<8x2048xf32>
    %c5 = arith.constant 5 : index
    %c0_52 = arith.constant 0 : index
    %c0_53 = arith.constant 0 : index
    %61 = vector.load %arg3[%c5, %c0_52, %c0_53] : memref<7x88x2048xf32, #tpu.memory_space<vmem>>, vector<1x88x2048xf32>
    %62 = vector.shape_cast %61 : vector<1x88x2048xf32> to vector<88x2048xf32>
    %cst_54 = arith.constant dense<0.000000e+00> : vector<8x2048xf32>
    %63 = tpu.matmul %59, %62, %cst_54 {dimension_numbers = #tpu.dot_dimension_numbers<[1], [0], [0], [1], [0, 0, 1, 1], [], []>} : vector<8x88xf32>, vector<88x2048xf32>, vector<8x2048xf32> -> vector<8x2048xf32>
    %64 = arith.addf %60, %63 : vector<8x2048xf32>
    %c0_55 = arith.constant 0 : index
    %c0_56 = arith.constant 0 : index
    %65 = vector.load %arg6[%c0_55, %c0_56] : memref<8x2048xf32, #tpu.memory_space<vmem>>, vector<8x2048xf32>
    tpu.vector_store %arg6[%c0_55, %c0_56], %64 {strides = array<i32>} : memref<8x2048xf32, #tpu.memory_space<vmem>>, vector<8x2048xf32>,
    %c6_i32 = arith.constant 6 : i32
    %66 = arith.addi %1, %c6_i32 : i32
    %c0_57 = arith.constant 0 : index
    %67 = arith.index_cast %66 : i32 to index
    %c0_58 = arith.constant 0 : index
    %68 = vector.load %arg2[%c0_57, %67, %c0_58] : memref<1x22x88xf32, #tpu.memory_space<vmem>>, vector<1x8x88xf32>
    %69 = vector.shape_cast %68 : vector<1x8x88xf32> to vector<8x88xf32>
    %c0_59 = arith.constant 0 : index
    %c0_60 = arith.constant 0 : index
    %70 = vector.load %arg6[%c0_59, %c0_60] : memref<8x2048xf32, #tpu.memory_space<vmem>>, vector<8x2048xf32>
    %c6 = arith.constant 6 : index
    %c0_61 = arith.constant 0 : index
    %c0_62 = arith.constant 0 : index
    %71 = vector.load %arg3[%c6, %c0_61, %c0_62] : memref<7x88x2048xf32, #tpu.memory_space<vmem>>, vector<1x88x2048xf32>
    %72 = vector.shape_cast %71 : vector<1x88x2048xf32> to vector<88x2048xf32>
    %cst_63 = arith.constant dense<0.000000e+00> : vector<8x2048xf32>
    %73 = tpu.matmul %69, %72, %cst_63 {dimension_numbers = #tpu.dot_dimension_numbers<[1], [0], [0], [1], [0, 0, 1, 1], [], []>} : vector<8x88xf32>, vector<88x2048xf32>, vector<8x2048xf32> -> vector<8x2048xf32>
    %74 = arith.addf %70, %73 : vector<8x2048xf32>
    %c0_64 = arith.constant 0 : index
    %c0_65 = arith.constant 0 : index
    %75 = vector.load %arg6[%c0_64, %c0_65] : memref<8x2048xf32, #tpu.memory_space<vmem>>, vector<8x2048xf32>
    tpu.vector_store %arg6[%c0_64, %c0_65], %74 {strides = array<i32>} : memref<8x2048xf32, #tpu.memory_space<vmem>>, vector<8x2048xf32>,
    %c0_66 = arith.constant 0 : index
    %c0_67 = arith.constant 0 : index
    %76 = vector.load %arg6[%c0_66, %c0_67] : memref<8x2048xf32, #tpu.memory_space<vmem>>, vector<8x2048xf32>
    %c0_68 = arith.constant 0 : index
    %c0_69 = arith.constant 0 : index
    %c0_70 = arith.constant 0 : index
    %77 = vector.load %arg5[%c0_68, %c0_69, %c0_70] : memref<1x8x2048xf32, #tpu.memory_space<vmem>>, vector<1x8x2048xf32>
    %78 = vector.shape_cast %77 : vector<1x8x2048xf32> to vector<8x2048xf32>
    %79 = vector.shape_cast %76 : vector<8x2048xf32> to vector<1x8x2048xf32>
    tpu.vector_store %arg5[%c0_68, %c0_69, %c0_70], %79 {strides = array<i32>} : memref<1x8x2048xf32, #tpu.memory_space<vmem>>, vector<1x8x2048xf32>,
    return
  }
  func.func @transform_0(%arg0: i32, %arg1: i32) -> (i32, i32, i32) {
    %c0_i32 = arith.constant 0 : i32
    %c0_i32_0 = arith.constant 0 : i32
    %c0_i32_1 = arith.constant 0 : i32
    return %arg0, %c0_i32, %c0_i32_0 : i32, i32, i32
  }
  func.func @transform_1(%arg0: i32, %arg1: i32) -> (i32, i32, i32) {
    %c0_i32 = arith.constant 0 : i32
    %c0_i32_0 = arith.constant 0 : i32
    %c0_i32_1 = arith.constant 0 : i32
    %c0_i32_2 = arith.constant 0 : i32
    return %c0_i32, %c0_i32_0, %c0_i32_1 : i32, i32, i32
  }
  func.func @transform_2(%arg0: i32, %arg1: i32) -> (i32, i32) {
    %c0_i32 = arith.constant 0 : i32
    %c0_i32_0 = arith.constant 0 : i32
    %c0_i32_1 = arith.constant 0 : i32
    return %c0_i32, %c0_i32_0 : i32, i32
  }
  func.func @transform_3(%arg0: i32, %arg1: i32) -> (i32, i32, i32) {
    %c0_i32 = arith.constant 0 : i32
    %c0_i32_0 = arith.constant 0 : i32
    return %arg0, %arg1, %c0_i32 : i32, i32, i32
  }
}

</mosaic_0001>

<bundles_post_ra>
// kernel: tpu_custom_call.1
= control target key start
LH: loop header
LB: loop body
LE: loop exit
PB: predicated region body
PF: predicated region fallthrough
CT: control target
= control target key end

     0   :  { %8 = vsyncpa [#allocation4], 0  ;;  %s5411_s0 = inlined_call_operand.vmem [shape: f32[2,22,88], index: 0, kind: input, shape index: {}]   ;;  %s5412_s1 = inlined_call_operand.hbm [shape: f32[7,88,2048], index: 1, kind: input, shape index: {}]   ;;  %s5413_s2 = inlined_call_operand.hbm [shape: f32[1,2048], index: 2, kind: input, shape index: {}]   ;;  %s5414_s3 = inlined_call_operand.hbm [shape: f32[2,16,2048], index: 3, kind: output, shape index: {}]  }
   0x1   :  { %9 = vsyncpa [#allocation7], 0 }
   0x2   :  { %10 = vsyncpa [#allocation5], 0 }
   0x3   :  { %12 = vsyncpa [#allocation5 + $0x1], 0  ;;  %s4715_s12 = smov 0   ;;  %s4717_s13 = smov 0  }
   0x4   :  { %s4719_s14 = smov 0   ;;  %s4721_s15 = smov 0  }
   0x5   :  { %s4723_s16 = smov 0   ;;  %s4725_s17 = smov 0  }
   0x6   :  { %s4727_s18 = smov 0   ;;  %s4729_s19 = smov 0  }
   0x7 LB: > { %s4290_s20 = sadd.s32 4294967295, %s4689_s19   ;;  %s4291_s21 = sadd.s32 4294967294, %s4689_s19   ;;  %s4689_s19 = sphi %s4729_s19, %s18_s19   ;;  %s4685_s18 = sphi %s4727_s18, %s5428_s18   ;;  %s4681_s17 = sphi %s4725_s17, %s5427_s17   ;;  %s4677_s16 = sphi %s4723_s16, %s5426_s16   ;;  %s4673_s15 = sphi %s4721_s15, %s5425_s15   ;;  %s4669_s14 = sphi %s4719_s14, %s5424_s14   ;;  %s4665_s13 = sphi %s4717_s13, %s5423_s13   ;;  %s4661_s12 = sphi %s4715_s12, %s5422_s12  }
   0x8   : > { %s27_s22 = sadd.s32 1, %s4681_s17  ;;  %s30_s23 = sadd.s32 1, %s4685_s18 }
   0x9   : > { %p28_p0 = scmp.ge.s32.totalorder %s27_s22, 2  ;;  %s107_s24 = sadd.s32 1, %s4669_s14 }
   0xa   : > { %p117_p1 = scmp.ne.s32.totalorder %s4669_s14, %s4665_s13  ;;  %p118_p2 = scmp.eq.s32.totalorder %s4290_s20, 3 }
   0xb   : > { %s5430_s22 = smov (%p28_p0, %s27_s22), 0  ;;  %s5432_s23 = smov (!%p28_p0, %s30_s23), %s4685_s18 }
   0xc   : > { %s103_s25 = ssub.s32 %s4681_s17, %s5430_s22  ;;  %p4767_p3 = por %p118_p2, %p117_p1 }
   0xd   : > { %p32_p4 = scmp.ge.s32.totalorder %s5432_s23, 2  ;;  %p123_p5 = scmp.ne.s32.totalorder %s4665_s13, %s4661_s12 }
   0xe   : > { %p124_p6 = scmp.eq.s32.totalorder %s4291_s21, 3  ;;  %p4292_p7 = scmp.ge.s32.totalorder %s4689_s19, 1 }
   0xf   : > { %s5434_s23 = smov (%p32_p4, %s5432_s23), 0  ;;  %p131_p9 = scmp.lt.s32.totalorder %s4689_s19, 5 }
  0x10   : > { %5417 = sst [smem:[#allocation12_spill]] %s5434_s23  ;;  %p4776_p8 = por %p124_p6, %p123_p5 }
  0x11   : > { %s102_s28 = ssub.s32 %s4685_s18, %s5434_s23  ;;  %p4783_p10 = pnand %p4292_p7, %p131_p9 }
  0x12   : > { %s104_s29 = sor.u32 %s103_s25, %s102_s28  ;;  %p4787_p12 = scmp.eq.s32.totalorder %s4290_s20, 0 }
  0x13   : > { %p105_p11 = scmp.eq.s32.totalorder %s104_s29, 0  ;;  %p4443_p13 = pneg %p4783_p10 }
  0x14   : > { %s142_s7 = sshll.u32 %s5412_s1, 4  ;;  %s4691_s9 = smov [#allocation3]   ;;  %s143_s7 = int_to_ptr.hbm [resolvable:$true] %s142_s7 }
  0x15   : > { %s4797_s8 = scalar_select %p105_p11, %s4669_s14, %s107_s24  }
  0x16   : > { %s144_s10 = sshll.u32 %s4691_s9, 4  ;;  %p4444_p0 = pnand %p4787_p12, %p4443_p13  ;;  %s145_s10 = int_to_ptr.vmem [resolvable:$true] %s144_s10 }
  0x17   : > { %s4692_s11 = smov 2048   ;;  %s4693_s20 = smov 128  }
  0x18   : > { %4446 = dma.hbm_to_vmem [thread:$0]  (!%p4444_p0), %s143_s7, 157696, %s145_s10, [#allocation4], %s4692_s11, %s4692_s11, %s4693_s20  }
  0x19   : > { %s157_s28 = sshll.u32 %s5413_s2, 4  ;;  %s4694_s29 = smov [#allocation6]   ;;  %s158_s28 = int_to_ptr.hbm [resolvable:$true] %s157_s28 }
  0x1a   : > { %s159_s23 = sshll.u32 %s4694_s29, 4  ;;  %180 = sbr.rel (%p4783_p10) target bundleno = 844 (0x34c), region = 32  ;;  %s160_s23 = int_to_ptr.vmem [resolvable:$true] %s159_s23 }
  0x1b   : > { %4449 = dma.hbm_to_vmem [thread:$0]  (!%p4444_p0), %s158_s28, 256, %s160_s23, [#allocation7]  }
  0x1f   : > { %4648 = dma.done.wait (%p4787_p12), [#allocation4], 157696  }
  0x20   : > { %4650 = vsyncadd (%p4787_p12), [#allocation4], 4294809600 }
  0x21   : > { %4652 = dma.done.wait (%p4787_p12), [#allocation7], 256  }
  0x22   : > { %4654 = vsyncadd (%p4787_p12), [#allocation7], 4294967040  ;;  %v446_v0 = vld [vmem:[#allocation3 + $0x500] sm:$0xff]  ;;  %v447_v1 = vld [vmem:[#allocation3 + $0x508] sm:$0xff]  ;;  %p210_p1 = scmp.lt.s32.totalorder %s4677_s16, 1  ;;  %s4301_s6 = sshll.u32 %s4673_s15, 3 }
  0x23   : > { %v448_v2 = vld [vmem:[#allocation3 + $0x510] sm:$0xff]  ;;  %471 = vmatpush.msra.mxu0 %v446_v0  ;;  %491 = vmatpush.msra.mxu1 %v447_v1  ;;  %v449_v3 = vld [vmem:[#allocation3 + $0x518] sm:$0xff]  ;;  %v430_v4 = vld [vmem:[#allocation3 + $0x480] sm:$0xff]  ;;  %vm462_vm0 = vcmask 719872   ;;  %s207_s9 = sand.u32 1, %s4665_s13   ;;  %s4427_s20 = sshll.u32 %s4673_s15, 4 }
  0x24   : > { %v431_v5 = vld [vmem:[#allocation3 + $0x488] sm:$0xff]  ;;  %511 = vmatpush.msra.mxu2 %v448_v2  ;;  %531 = vmatpush.msra.mxu3 %v449_v3  ;;  %v432_v6 = vld [vmem:[#allocation3 + $0x490] sm:$0xff]  ;;  %v433_v7 = vld [vmem:[#allocation3 + $0x498] sm:$0xff]  ;;  %s4818_s23 = scalar_select %p210_p1, %s4677_s16, 1 }
  0x25   : > { %v414_v8 = vld [vmem:[#allocation3 + $0x400] sm:$0xff]  ;;  %472 = vmatpush.msra.mxu0 %v430_v4  ;;  %492 = vmatpush.msra.mxu1 %v431_v5  ;;  %v415_v9 = vld [vmem:[#allocation3 + $0x408] sm:$0xff]  ;;  %v416_v10 = vld [vmem:[#allocation3 + $0x410] sm:$0xff]  ;;  %s4299_s10 = sshll.u32 %s207_s9, 7  ;;  %s4428_s21 = sshll.u32 %s4677_s16, 5 }
  0x26   : > { %v417_v11 = vld [vmem:[#allocation3 + $0x418] sm:$0xff]  ;;  %512 = vmatpush.msra.mxu2 %v432_v6  ;;  %532 = vmatpush.msra.mxu3 %v433_v7  ;;  %v398_v12 = vld [vmem:[#allocation3 + $0x380] sm:$0xff]  ;;  %v399_v13 = vld [vmem:[#allocation3 + $0x388] sm:$0xff]  ;;  %s4432_s24 = smul.u32 24, %s4818_s23  ;;  %s5331_s11 = scalar_lea.vmem [#allocation8], %s4299_s10 }
  0x27   : > { %473 = vmatpush.msra.mxu0 %v414_v8  ;;  %493 = vmatpush.msra.mxu1 %v415_v9  ;;  %v400_v14 = vld [vmem:[#allocation3 + $0x390] sm:$0xff]  ;;  %v401_v15 = vld [vmem:[#allocation3 + $0x398] sm:$0xff]  ;;  %v382_v16 = vld [vmem:[#allocation3 + $0x300] sm:$0xff]  ;;  %s4168_s25 = sadd.s32 %s4428_s21, %s4427_s20  ;;  %s4172_s15 = sshll.u32 %s5331_s11, 4  ;;  %s4173_s15 = int_to_ptr.vmem [resolvable:$true] %s4172_s15 }
  0x28   : > { %513 = vmatpush.msra.mxu2 %v416_v10  ;;  %533 = vmatpush.msra.mxu3 %v417_v11  ;;  %v383_v17 = vld [vmem:[#allocation3 + $0x308] sm:$0xff]  ;;  %v384_v18 = vld [vmem:[#allocation3 + $0x310] sm:$0xff]  ;;  %v385_v19 = vld [vmem:[#allocation3 + $0x318] sm:$0xff]  ;;  %s214_s5 = scalar_lea.vmem %s5411_s0, %s4432_s24  ;;  %s4429_s28 = sshll.u32 %s4168_s25, 3 }
  0x29   : > { %474 = vmatpush.msra.mxu0 %v398_v12  ;;  %494 = vmatpush.msra.mxu1 %v399_v13  ;;  %v366_v20 = vld [vmem:[#allocation3 + $0x280] sm:$0xff]  ;;  %v367_v21 = vld [vmem:[#allocation3 + $0x288] sm:$0xff]  ;;  %v368_v22 = vld [vmem:[#allocation3 + $0x290] sm:$0xff]  ;;  %s4825_s7 = scalar_lea.vmem %s214_s5, %s4301_s6  ;;  %s4170_s24 = scalar_lea.hbm %s5414_s3, %s4429_s28 }
  0x2a   : > { %514 = vmatpush.msra.mxu2 %v400_v14  ;;  %534 = vmatpush.msra.mxu3 %v401_v15  ;;  %v369_v23 = vld [vmem:[#allocation3 + $0x298] sm:$0xff]  ;;  %v350_v24 = vld [vmem:[#allocation3 + $0x200] sm:$0xff]  ;;  %v351_v25 = vld [vmem:[#allocation3 + $0x208] sm:$0xff]  ;;  %s4174_s16 = sshll.u32 %s4170_s24, 4  ;;  %s4157_s30 = scalar_lea.sflag [#allocation5], %s207_s9  ;;  %s4175_s16 = int_to_ptr.hbm [resolvable:$true] %s4174_s16 }
  0x2b   : > { %475 = vmatpush.msra.mxu0 %v382_v16  ;;  %495 = vmatpush.msra.mxu1 %v383_v17  ;;  %v352_v26 = vld [vmem:[#allocation3 + $0x210] sm:$0xff]  ;;  %v353_v27 = vld [vmem:[#allocation3 + $0x218] sm:$0xff]  ;;  %v334_v28 = vld [vmem:[#allocation3 + $0x180] sm:$0xff]  ;;  %s4601_s4 = sshra.s32 %s4175_s16, 4  ;;  %s4607_s10 = scalar_lea.hbm %s5414_s3, 512  ;;  %s4602_s4 = int_to_ptr.hbm [resolvable:$true] %s4601_s4 }
  0x2c   : > { %515 = vmatpush.msra.mxu2 %v384_v18  ;;  %535 = vmatpush.msra.mxu3 %v385_v19  ;;  %v335_v29 = vld [vmem:[#allocation3 + $0x188] sm:$0xff]  ;;  %v336_v30 = vld [vmem:[#allocation3 + $0x190] sm:$0xff]  ;;  %v337_v31 = vld [vmem:[#allocation3 + $0x198] sm:$0xff]  ;;  %s4603_s5 = scalar_lea.hbm %s4602_s4, 128  ;;  %p4608_p6 = scmp.lt.s32.totalorder %s4602_s4, %s5414_s3 }
  0x2d   : > { %476 = vmatpush.msra.mxu0 %v366_v20  ;;  %496 = vmatpush.msra.mxu1 %v367_v21  ;;  %v318_v32 = vld [vmem:[#allocation3 + $0x100] sm:$0xff]  ;;  %v319_v33 = vld [vmem:[#allocation3 + $0x108] sm:$0xff]  ;;  %v320_v34 = vld [vmem:[#allocation3 + $0x110] sm:$0xff]  ;;  %p4604_p2 = scmp.ne.s32.totalorder %s4602_s4, %s4603_s5  ;;  %p4609_p7 = scmp.lt.s32.totalorder %s4607_s10, %s4603_s5 }
  0x2e   : > { %516 = vmatpush.msra.mxu2 %v368_v22  ;;  %536 = vmatpush.msra.mxu3 %v369_v23  ;;  %v321_v35 = vld [vmem:[#allocation3 + $0x118] sm:$0xff]  ;;  %v302_v36 = vld [vmem:[#allocation3 + $0x80] sm:$0xff]  ;;  %v303_v37 = vld [vmem:[#allocation3 + $0x88] sm:$0xff] }
  0x2f   : > { %477 = vmatpush.msra.mxu0 %v350_v24  ;;  %497 = vmatpush.msra.mxu1 %v351_v25  ;;  %v304_v38 = vld [vmem:[#allocation3 + $0x90] sm:$0xff]  ;;  %v305_v39 = vld [vmem:[#allocation3 + $0x98] sm:$0xff]  ;;  %v286_v40 = vld [vmem:[#allocation3] sm:$0xff]  ;;  %p4605_p4 = pnand %p4604_p2, %p4767_p3  ;;  %p4610_p9 = por %p4609_p7, %p4608_p6 }
  0x30   : > { %517 = vmatpush.msra.mxu2 %v352_v26  ;;  %537 = vmatpush.msra.mxu3 %v353_v27  ;;  %v287_v41 = vld [vmem:[#allocation3 + $0x8] sm:$0xff]  ;;  %v288_v42 = vld [vmem:[#allocation3 + $0x10] sm:$0xff]  ;;  %v289_v43 = vld [vmem:[#allocation3 + $0x18] sm:$0xff] }
  0x31   : > { %478 = vmatpush.msra.mxu0 %v334_v28  ;;  %498 = vmatpush.msra.mxu1 %v335_v29  ;;  %v450_v44 = vld [vmem:[#allocation3 + $0x520] sm:$0xff]  ;;  %v451_v45 = vld [vmem:[#allocation3 + $0x528] sm:$0xff]  ;;  %v452_v46 = vld [vmem:[#allocation3 + $0x530] sm:$0xff]  ;;  %p4606_p5 = pneg %p4605_p4 }
  0x32   : > { %518 = vmatpush.msra.mxu2 %v336_v30  ;;  %538 = vmatpush.msra.mxu3 %v337_v31  ;;  %v453_v47 = vld [vmem:[#allocation3 + $0x538] sm:$0xff]  ;;  %v434_v48 = vld [vmem:[#allocation3 + $0x4a0] sm:$0xff]  ;;  %v435_v49 = vld [vmem:[#allocation3 + $0x4a8] sm:$0xff] }
  0x33   : > { %479 = vmatpush.msra.mxu0 %v318_v32  ;;  %499 = vmatpush.msra.mxu1 %v319_v33  ;;  %v436_v50 = vld [vmem:[#allocation3 + $0x4b0] sm:$0xff]  ;;  %v437_v51 = vld [vmem:[#allocation3 + $0x4b8] sm:$0xff]  ;;  %v418_v52 = vld [vmem:[#allocation3 + $0x420] sm:$0xff]  ;;  %p4611_p10 = pnand %p4610_p9, %p4606_p5 }
  0x34   : > { %519 = vmatpush.msra.mxu2 %v320_v34  ;;  %539 = vmatpush.msra.mxu3 %v321_v35  ;;  %v419_v53 = vld [vmem:[#allocation3 + $0x428] sm:$0xff]  ;;  %v420_v54 = vld [vmem:[#allocation3 + $0x430] sm:$0xff]  ;;  %v421_v55 = vld [vmem:[#allocation3 + $0x438] sm:$0xff] }
  0x35   : > { %480 = vmatpush.msra.mxu0 %v302_v36  ;;  %500 = vmatpush.msra.mxu1 %v303_v37  ;;  %v402_v56 = vld [vmem:[#allocation3 + $0x3a0] sm:$0xff]  ;;  %v403_v57 = vld [vmem:[#allocation3 + $0x3a8] sm:$0xff]  ;;  %v404_v58 = vld [vmem:[#allocation3 + $0x3b0] sm:$0xff] }
  0x36   : > { %520 = vmatpush.msra.mxu2 %v304_v38  ;;  %540 = vmatpush.msra.mxu3 %v305_v39  ;;  %v405_v59 = vld [vmem:[#allocation3 + $0x3b8] sm:$0xff]  ;;  %v386_v60 = vld [vmem:[#allocation3 + $0x320] sm:$0xff]  ;;  %v387_v61 = vld [vmem:[#allocation3 + $0x328] sm:$0xff] }
  0x37   : > { %481 = vmatpush.msra.mxu0 %v286_v40  ;;  %501 = vmatpush.msra.mxu1 %v287_v41  ;;  %v388_v62 = vld [vmem:[#allocation3 + $0x330] sm:$0xff]  ;;  %v389_v63 = vld [vmem:[#allocation3 + $0x338] sm:$0xff]  ;;  %v370_v0 = vld [vmem:[#allocation3 + $0x2a0] sm:$0xff] }
  0x38   : > { %521 = vmatpush.msra.mxu2 %v288_v42  ;;  %541 = vmatpush.msra.mxu3 %v289_v43  ;;  %v371_v1 = vld [vmem:[#allocation3 + $0x2a8] sm:$0xff]  ;;  %v372_v2 = vld [vmem:[#allocation3 + $0x2b0] sm:$0xff]  ;;  %v373_v3 = vld [vmem:[#allocation3 + $0x2b8] sm:$0xff] }
  0x39   : > { %551 = vmatpush.msrb.mxu0 %v450_v44  ;;  %571 = vmatpush.msrb.mxu1 %v451_v45  ;;  %v354_v4 = vld [vmem:[#allocation3 + $0x220] sm:$0xff]  ;;  %v355_v5 = vld [vmem:[#allocation3 + $0x228] sm:$0xff]  ;;  %v356_v6 = vld [vmem:[#allocation3 + $0x230] sm:$0xff] }
  0x3a   : > { %591 = vmatpush.msrb.mxu2 %v452_v46  ;;  %611 = vmatpush.msrb.mxu3 %v453_v47  ;;  %v357_v7 = vld [vmem:[#allocation3 + $0x238] sm:$0xff]  ;;  %v338_v8 = vld [vmem:[#allocation3 + $0x1a0] sm:$0xff]  ;;  %v339_v9 = vld [vmem:[#allocation3 + $0x1a8] sm:$0xff] }
  0x3b   : > { %552 = vmatpush.msrb.mxu0 %v434_v48  ;;  %572 = vmatpush.msrb.mxu1 %v435_v49  ;;  %v340_v10 = vld [vmem:[#allocation3 + $0x1b0] sm:$0xff]  ;;  %v341_v11 = vld [vmem:[#allocation3 + $0x1b8] sm:$0xff]  ;;  %v322_v12 = vld [vmem:[#allocation3 + $0x120] sm:$0xff] }
  0x3c   : > { %592 = vmatpush.msrb.mxu2 %v436_v50  ;;  %612 = vmatpush.msrb.mxu3 %v437_v51  ;;  %v323_v13 = vld [vmem:[#allocation3 + $0x128] sm:$0xff]  ;;  %v324_v14 = vld [vmem:[#allocation3 + $0x130] sm:$0xff]  ;;  %v325_v15 = vld [vmem:[#allocation3 + $0x138] sm:$0xff] }
  0x3d   : > { %553 = vmatpush.msrb.mxu0 %v418_v52  ;;  %573 = vmatpush.msrb.mxu1 %v419_v53  ;;  %v306_v16 = vld [vmem:[#allocation3 + $0xa0] sm:$0xff]  ;;  %v307_v17 = vld [vmem:[#allocation3 + $0xa8] sm:$0xff]  ;;  %v308_v18 = vld [vmem:[#allocation3 + $0xb0] sm:$0xff] }
  0x3e   : > { %593 = vmatpush.msrb.mxu2 %v420_v54  ;;  %613 = vmatpush.msrb.mxu3 %v421_v55  ;;  %v309_v19 = vld [vmem:[#allocation3 + $0xb8] sm:$0xff]  ;;  %v290_v20 = vld [vmem:[#allocation3 + $0x20] sm:$0xff]  ;;  %v291_v21 = vld [vmem:[#allocation3 + $0x28] sm:$0xff] }
  0x3f   : > { %554 = vmatpush.msrb.mxu0 %v402_v56  ;;  %574 = vmatpush.msrb.mxu1 %v403_v57  ;;  %v292_v22 = vld [vmem:[#allocation3 + $0x30] sm:$0xff]  ;;  %v293_v23 = vld [vmem:[#allocation3 + $0x38] sm:$0xff]  ;;  %v4828_v24 = vld [vmem:[%s4825_s7] sm:$0xff] }
  0x40   : > { %594 = vmatpush.msrb.mxu2 %v404_v58  ;;  %614 = vmatpush.msrb.mxu3 %v405_v59  ;;  %v454_v25 = vld [vmem:[#allocation3 + $0x540] sm:$0xff]  ;;  %v455_v26 = vld [vmem:[#allocation3 + $0x548] sm:$0xff]  ;;  %v456_v27 = vld [vmem:[#allocation3 + $0x550] sm:$0xff] }
  0x41   : > { %555 = vmatpush.msrb.mxu0 %v386_v60  ;;  %575 = vmatpush.msrb.mxu1 %v387_v61  ;;  %v457_v28 = vld [vmem:[#allocation3 + $0x558] sm:$0xff]  ;;  %v438_v29 = vld [vmem:[#allocation3 + $0x4c0] sm:$0xff]  ;;  %v439_v30 = vld [vmem:[#allocation3 + $0x4c8] sm:$0xff] }
  0x42   : > { %595 = vmatpush.msrb.mxu2 %v388_v62  ;;  %615 = vmatpush.msrb.mxu3 %v389_v63  ;;  %v440_v31 = vld [vmem:[#allocation3 + $0x4d0] sm:$0xff]  ;;  %v441_v32 = vld [vmem:[#allocation3 + $0x4d8] sm:$0xff]  ;;  %v422_v33 = vld [vmem:[#allocation3 + $0x440] sm:$0xff] }
  0x43   : > { %556 = vmatpush.msrb.mxu0 %v370_v0  ;;  %576 = vmatpush.msrb.mxu1 %v371_v1  ;;  %v423_v34 = vld [vmem:[#allocation3 + $0x448] sm:$0xff]  ;;  %v424_v35 = vld [vmem:[#allocation3 + $0x450] sm:$0xff]  ;;  %v425_v36 = vld [vmem:[#allocation3 + $0x458] sm:$0xff] }
  0x44   : > { %596 = vmatpush.msrb.mxu2 %v372_v2  ;;  %616 = vmatpush.msrb.mxu3 %v373_v3  ;;  %v406_v37 = vld [vmem:[#allocation3 + $0x3c0] sm:$0xff]  ;;  %v407_v38 = vld [vmem:[#allocation3 + $0x3c8] sm:$0xff]  ;;  %v408_v39 = vld [vmem:[#allocation3 + $0x3d0] sm:$0xff] }
  0x45   : > { %557 = vmatpush.msrb.mxu0 %v354_v4  ;;  %577 = vmatpush.msrb.mxu1 %v355_v5  ;;  %v409_v40 = vld [vmem:[#allocation3 + $0x3d8] sm:$0xff]  ;;  %v390_v41 = vld [vmem:[#allocation3 + $0x340] sm:$0xff]  ;;  %v391_v42 = vld [vmem:[#allocation3 + $0x348] sm:$0xff] }
  0x46   : > { %597 = vmatpush.msrb.mxu2 %v356_v6  ;;  %617 = vmatpush.msrb.mxu3 %v357_v7  ;;  %v392_v43 = vld [vmem:[#allocation3 + $0x350] sm:$0xff]  ;;  %v393_v44 = vld [vmem:[#allocation3 + $0x358] sm:$0xff]  ;;  %v374_v45 = vld [vmem:[#allocation3 + $0x2c0] sm:$0xff] }
  0x47   : > { %558 = vmatpush.msrb.mxu0 %v338_v8  ;;  %578 = vmatpush.msrb.mxu1 %v339_v9  ;;  %v375_v46 = vld [vmem:[#allocation3 + $0x2c8] sm:$0xff]  ;;  %v376_v47 = vld [vmem:[#allocation3 + $0x2d0] sm:$0xff]  ;;  %v377_v48 = vld [vmem:[#allocation3 + $0x2d8] sm:$0xff] }
  0x48   : > { %598 = vmatpush.msrb.mxu2 %v340_v10  ;;  %618 = vmatpush.msrb.mxu3 %v341_v11  ;;  %v358_v49 = vld [vmem:[#allocation3 + $0x240] sm:$0xff]  ;;  %v359_v50 = vld [vmem:[#allocation3 + $0x248] sm:$0xff]  ;;  %v360_v51 = vld [vmem:[#allocation3 + $0x250] sm:$0xff] }
  0x49   : > { %559 = vmatpush.msrb.mxu0 %v322_v12  ;;  %579 = vmatpush.msrb.mxu1 %v323_v13  ;;  %v361_v52 = vld [vmem:[#allocation3 + $0x258] sm:$0xff]  ;;  %v342_v53 = vld [vmem:[#allocation3 + $0x1c0] sm:$0xff]  ;;  %v343_v54 = vld [vmem:[#allocation3 + $0x1c8] sm:$0xff] }
  0x4a   : > { %599 = vmatpush.msrb.mxu2 %v324_v14  ;;  %619 = vmatpush.msrb.mxu3 %v325_v15  ;;  %v344_v55 = vld [vmem:[#allocation3 + $0x1d0] sm:$0xff]  ;;  %v345_v56 = vld [vmem:[#allocation3 + $0x1d8] sm:$0xff]  ;;  %v326_v57 = vld [vmem:[#allocation3 + $0x140] sm:$0xff] }
  0x4b   : > { %560 = vmatpush.msrb.mxu0 %v306_v16  ;;  %580 = vmatpush.msrb.mxu1 %v307_v17  ;;  %v327_v58 = vld [vmem:[#allocation3 + $0x148] sm:$0xff]  ;;  %v328_v59 = vld [vmem:[#allocation3 + $0x150] sm:$0xff]  ;;  %v329_v60 = vld [vmem:[#allocation3 + $0x158] sm:$0xff] }
  0x4c   : > { %600 = vmatpush.msrb.mxu2 %v308_v18  ;;  %620 = vmatpush.msrb.mxu3 %v309_v19  ;;  %v310_v61 = vld [vmem:[#allocation3 + $0xc0] sm:$0xff]  ;;  %v311_v62 = vld [vmem:[#allocation3 + $0xc8] sm:$0xff]  ;;  %v312_v63 = vld [vmem:[#allocation3 + $0xd0] sm:$0xff] }
  0x4d   : > { %561 = vmatpush.msrb.mxu0 %v290_v20  ;;  %581 = vmatpush.msrb.mxu1 %v291_v21  ;;  %v313_v0 = vld [vmem:[#allocation3 + $0xd8] sm:$0xff]  ;;  %v294_v1 = vld [vmem:[#allocation3 + $0x40] sm:$0xff]  ;;  %v295_v2 = vld [vmem:[#allocation3 + $0x48] sm:$0xff] }
  0x4e   : > { %601 = vmatpush.msrb.mxu2 %v292_v22  ;;  %621 = vmatpush.msrb.mxu3 %v293_v23  ;;  %v296_v3 = vld [vmem:[#allocation3 + $0x50] sm:$0xff]  ;;  %v297_v4 = vld [vmem:[#allocation3 + $0x58] sm:$0xff]  ;;  %v458_v5 = vld [vmem:[#allocation3 + $0x560] sm:$0xff] }
  0x4f   : > { %4302 = vmatmul.msk.f32.vlgmr.msra.gmra.mxu0 %vm462_vm0, %v4828_v24  ;;  %4303 = vmatmul.msk.f32.vlgmr.msra.gmra.mxu1 %vm462_vm0, %v4828_v24  ;;  %v459_v6 = vld [vmem:[#allocation3 + $0x568] sm:$0xff]  ;;  %v460_v7 = vld [vmem:[#allocation3 + $0x570] sm:$0xff]  ;;  %v461_v8 = vld [vmem:[#allocation3 + $0x578] sm:$0xff] }
  0x50   : > { %4304 = vmatmul.msk.f32.vlgmr.msra.gmra.mxu2 %vm462_vm0, %v4828_v24  ;;  %4305 = vmatmul.msk.f32.vlgmr.msra.gmra.mxu3 %vm462_vm0, %v4828_v24  ;;  %v442_v9 = vld [vmem:[#allocation3 + $0x4e0] sm:$0xff]  ;;  %v443_v10 = vld [vmem:[#allocation3 + $0x4e8] sm:$0xff]  ;;  %v444_v11 = vld [vmem:[#allocation3 + $0x4f0] sm:$0xff] }
  0x51   : > { %631 = vmatpush.msra.mxu0 %v454_v25  ;;  %651 = vmatpush.msra.mxu1 %v455_v26  ;;  %v445_v12 = vld [vmem:[#allocation3 + $0x4f8] sm:$0xff]  ;;  %v426_v13 = vld [vmem:[#allocation3 + $0x460] sm:$0xff]  ;;  %v427_v14 = vld [vmem:[#allocation3 + $0x468] sm:$0xff] }
  0x52   : > { %671 = vmatpush.msra.mxu2 %v456_v27  ;;  %691 = vmatpush.msra.mxu3 %v457_v28  ;;  %v428_v15 = vld [vmem:[#allocation3 + $0x470] sm:$0xff]  ;;  %v429_v16 = vld [vmem:[#allocation3 + $0x478] sm:$0xff]  ;;  %v410_v17 = vld [vmem:[#allocation3 + $0x3e0] sm:$0xff] }
  0x53   : > { %632 = vmatpush.msra.mxu0 %v438_v29  ;;  %652 = vmatpush.msra.mxu1 %v439_v30  ;;  %v411_v18 = vld [vmem:[#allocation3 + $0x3e8] sm:$0xff]  ;;  %v412_v19 = vld [vmem:[#allocation3 + $0x3f0] sm:$0xff]  ;;  %v413_v20 = vld [vmem:[#allocation3 + $0x3f8] sm:$0xff] }
  0x54   : > { %672 = vmatpush.msra.mxu2 %v440_v31  ;;  %692 = vmatpush.msra.mxu3 %v441_v32  ;;  %v394_v21 = vld [vmem:[#allocation3 + $0x360] sm:$0xff]  ;;  %v395_v22 = vld [vmem:[#allocation3 + $0x368] sm:$0xff]  ;;  %v396_v23 = vld [vmem:[#allocation3 + $0x370] sm:$0xff] }
  0x55   : > { %633 = vmatpush.msra.mxu0 %v422_v33  ;;  %653 = vmatpush.msra.mxu1 %v423_v34  ;;  %v397_v25 = vld [vmem:[#allocation3 + $0x378] sm:$0xff]  ;;  %v378_v26 = vld [vmem:[#allocation3 + $0x2e0] sm:$0xff]  ;;  %v379_v27 = vld [vmem:[#allocation3 + $0x2e8] sm:$0xff] }
  0x56   : > { %673 = vmatpush.msra.mxu2 %v424_v35  ;;  %693 = vmatpush.msra.mxu3 %v425_v36  ;;  %v380_v28 = vld [vmem:[#allocation3 + $0x2f0] sm:$0xff]  ;;  %v381_v29 = vld [vmem:[#allocation3 + $0x2f8] sm:$0xff]  ;;  %v362_v30 = vld [vmem:[#allocation3 + $0x260] sm:$0xff] }
  0x57   : > { %634 = vmatpush.msra.mxu0 %v406_v37  ;;  %654 = vmatpush.msra.mxu1 %v407_v38  ;;  %v363_v31 = vld [vmem:[#allocation3 + $0x268] sm:$0xff]  ;;  %v364_v32 = vld [vmem:[#allocation3 + $0x270] sm:$0xff]  ;;  %v365_v33 = vld [vmem:[#allocation3 + $0x278] sm:$0xff] }
  0x58   : > { %674 = vmatpush.msra.mxu2 %v408_v39  ;;  %694 = vmatpush.msra.mxu3 %v409_v40  ;;  %v346_v34 = vld [vmem:[#allocation3 + $0x1e0] sm:$0xff]  ;;  %v347_v35 = vld [vmem:[#allocation3 + $0x1e8] sm:$0xff]  ;;  %v348_v36 = vld [vmem:[#allocation3 + $0x1f0] sm:$0xff] }
  0x59   : > { %635 = vmatpush.msra.mxu0 %v390_v41  ;;  %655 = vmatpush.msra.mxu1 %v391_v42  ;;  %v349_v37 = vld [vmem:[#allocation3 + $0x1f8] sm:$0xff]  ;;  %v330_v38 = vld [vmem:[#allocation3 + $0x160] sm:$0xff]  ;;  %v331_v39 = vld [vmem:[#allocation3 + $0x168] sm:$0xff] }
  0x5a   : > { %675 = vmatpush.msra.mxu2 %v392_v43  ;;  %695 = vmatpush.msra.mxu3 %v393_v44  ;;  %v332_v40 = vld [vmem:[#allocation3 + $0x170] sm:$0xff]  ;;  %v333_v41 = vld [vmem:[#allocation3 + $0x178] sm:$0xff]  ;;  %v314_v42 = vld [vmem:[#allocation3 + $0xe0] sm:$0xff] }
  0x5b   : > { %636 = vmatpush.msra.mxu0 %v374_v45  ;;  %656 = vmatpush.msra.mxu1 %v375_v46  ;;  %v315_v43 = vld [vmem:[#allocation3 + $0xe8] sm:$0xff]  ;;  %v316_v44 = vld [vmem:[#allocation3 + $0xf0] sm:$0xff]  ;;  %v317_v45 = vld [vmem:[#allocation3 + $0xf8] sm:$0xff] }
  0x5c   : > { %676 = vmatpush.msra.mxu2 %v376_v47  ;;  %696 = vmatpush.msra.mxu3 %v377_v48  ;;  %v298_v46 = vld [vmem:[#allocation3 + $0x60] sm:$0xff]  ;;  %v299_v47 = vld [vmem:[#allocation3 + $0x68] sm:$0xff]  ;;  %v300_v48 = vld [vmem:[#allocation3 + $0x70] sm:$0xff] }
  0x5d   : > { %637 = vmatpush.msra.mxu0 %v358_v49  ;;  %657 = vmatpush.msra.mxu1 %v359_v50  ;;  %v301_v49 = vld [vmem:[#allocation3 + $0x78] sm:$0xff]  ;;  %v998_v50 = vld [vmem:[#allocation3 + $0xa80] sm:$0xff] }
  0x5e   : > { %677 = vmatpush.msra.mxu2 %v360_v51  ;;  %697 = vmatpush.msra.mxu3 %v361_v52  ;;  %v999_v51 = vld [vmem:[#allocation3 + $0xa88] sm:$0xff]  ;;  %v1000_v52 = vld [vmem:[#allocation3 + $0xa90] sm:$0xff] }
  0x5f   : > { %638 = vmatpush.msra.mxu0 %v342_v53  ;;  %658 = vmatpush.msra.mxu1 %v343_v54  ;;  %v1001_v53 = vld [vmem:[#allocation3 + $0xa98] sm:$0xff]  ;;  %v982_v54 = vld [vmem:[#allocation3 + $0xa00] sm:$0xff] }
  0x60   : > { %678 = vmatpush.msra.mxu2 %v344_v55  ;;  %698 = vmatpush.msra.mxu3 %v345_v56  ;;  %v983_v55 = vld [vmem:[#allocation3 + $0xa08] sm:$0xff]  ;;  %v984_v56 = vld [vmem:[#allocation3 + $0xa10] sm:$0xff] }
  0x61   : > { %639 = vmatpush.msra.mxu0 %v326_v57  ;;  %659 = vmatpush.msra.mxu1 %v327_v58  ;;  %v985_v57 = vld [vmem:[#allocation3 + $0xa18] sm:$0xff]  ;;  %v966_v58 = vld [vmem:[#allocation3 + $0x980] sm:$0xff] }
  0x62   : > { %679 = vmatpush.msra.mxu2 %v328_v59  ;;  %699 = vmatpush.msra.mxu3 %v329_v60  ;;  %v967_v59 = vld [vmem:[#allocation3 + $0x988] sm:$0xff]  ;;  %v968_v60 = vld [vmem:[#allocation3 + $0x990] sm:$0xff] }
  0x63   : > { %640 = vmatpush.msra.mxu0 %v310_v61  ;;  %660 = vmatpush.msra.mxu1 %v311_v62  ;;  %v969_v61 = vld [vmem:[#allocation3 + $0x998] sm:$0xff]  ;;  %v950_v62 = vld [vmem:[#allocation3 + $0x900] sm:$0xff] }
  0x64   : > { %680 = vmatpush.msra.mxu2 %v312_v63  ;;  %700 = vmatpush.msra.mxu3 %v313_v0  ;;  %v951_v63 = vld [vmem:[#allocation3 + $0x908] sm:$0xff]  ;;  %v952_v0 = vld [vmem:[#allocation3 + $0x910] sm:$0xff] }
  0x65   : > { %641 = vmatpush.msra.mxu0 %v294_v1  ;;  %661 = vmatpush.msra.mxu1 %v295_v2  ;;  %v953_v1 = vld [vmem:[#allocation3 + $0x918] sm:$0xff]  ;;  %v934_v2 = vld [vmem:[#allocation3 + $0x880] sm:$0xff] }
  0x66   : > { %681 = vmatpush.msra.mxu2 %v296_v3  ;;  %701 = vmatpush.msra.mxu3 %v297_v4  ;;  %v935_v3 = vld [vmem:[#allocation3 + $0x888] sm:$0xff]  ;;  %v936_v4 = vld [vmem:[#allocation3 + $0x890] sm:$0xff] }
  0x67   : > { %4306 = vmatmul.msk.f32.vlgmr.msrb.gmra.mxu0 %vm462_vm0, %v4828_v24  ;;  %4307 = vmatmul.msk.f32.vlgmr.msrb.gmra.mxu1 %vm462_vm0, %v4828_v24 }
  0x68   : > { %4308 = vmatmul.msk.f32.vlgmr.msrb.gmra.mxu2 %vm462_vm0, %v4828_v24  ;;  %4309 = vmatmul.msk.f32.vlgmr.msrb.gmra.mxu3 %vm462_vm0, %v4828_v24 }
  0x69   : > { %711 = vmatpush.msrb.mxu0 %v458_v5  ;;  %731 = vmatpush.msrb.mxu1 %v459_v6  ;;  %v937_v5 = vld [vmem:[#allocation3 + $0x898] sm:$0xff]  ;;  %v918_v6 = vld [vmem:[#allocation3 + $0x800] sm:$0xff] }
  0x6a   : > { %751 = vmatpush.msrb.mxu2 %v460_v7  ;;  %771 = vmatpush.msrb.mxu3 %v461_v8  ;;  %v919_v7 = vld [vmem:[#allocation3 + $0x808] sm:$0xff]  ;;  %v920_v8 = vld [vmem:[#allocation3 + $0x810] sm:$0xff] }
  0x6b   : > { %712 = vmatpush.msrb.mxu0 %v442_v9  ;;  %732 = vmatpush.msrb.mxu1 %v443_v10  ;;  %v921_v9 = vld [vmem:[#allocation3 + $0x818] sm:$0xff]  ;;  %v902_v10 = vld [vmem:[#allocation3 + $0x780] sm:$0xff] }
  0x6c   : > { %752 = vmatpush.msrb.mxu2 %v444_v11  ;;  %772 = vmatpush.msrb.mxu3 %v445_v12  ;;  %v903_v11 = vld [vmem:[#allocation3 + $0x788] sm:$0xff]  ;;  %v904_v12 = vld [vmem:[#allocation3 + $0x790] sm:$0xff] }
  0x6d   : > { %713 = vmatpush.msrb.mxu0 %v426_v13  ;;  %733 = vmatpush.msrb.mxu1 %v427_v14  ;;  %v905_v13 = vld [vmem:[#allocation3 + $0x798] sm:$0xff]  ;;  %v886_v14 = vld [vmem:[#allocation3 + $0x700] sm:$0xff] }
  0x6e   : > { %753 = vmatpush.msrb.mxu2 %v428_v15  ;;  %773 = vmatpush.msrb.mxu3 %v429_v16  ;;  %v887_v15 = vld [vmem:[#allocation3 + $0x708] sm:$0xff]  ;;  %v888_v16 = vld [vmem:[#allocation3 + $0x710] sm:$0xff] }
  0x6f   : > { %714 = vmatpush.msrb.mxu0 %v410_v17  ;;  %734 = vmatpush.msrb.mxu1 %v411_v18  ;;  %v889_v17 = vld [vmem:[#allocation3 + $0x718] sm:$0xff]  ;;  %v870_v18 = vld [vmem:[#allocation3 + $0x680] sm:$0xff] }
  0x70   : > { %754 = vmatpush.msrb.mxu2 %v412_v19  ;;  %774 = vmatpush.msrb.mxu3 %v413_v20  ;;  %v871_v19 = vld [vmem:[#allocation3 + $0x688] sm:$0xff]  ;;  %v872_v20 = vld [vmem:[#allocation3 + $0x690] sm:$0xff] }
  0x71   : > { %715 = vmatpush.msrb.mxu0 %v394_v21  ;;  %735 = vmatpush.msrb.mxu1 %v395_v22  ;;  %v873_v21 = vld [vmem:[#allocation3 + $0x698] sm:$0xff]  ;;  %v854_v22 = vld [vmem:[#allocation3 + $0x600] sm:$0xff] }
  0x72   : > { %755 = vmatpush.msrb.mxu2 %v396_v23  ;;  %775 = vmatpush.msrb.mxu3 %v397_v25  ;;  %v855_v23 = vld [vmem:[#allocation3 + $0x608] sm:$0xff]  ;;  %v856_v25 = vld [vmem:[#allocation3 + $0x610] sm:$0xff] }
  0x73   : > { %716 = vmatpush.msrb.mxu0 %v378_v26  ;;  %736 = vmatpush.msrb.mxu1 %v379_v27  ;;  %v857_v26 = vld [vmem:[#allocation3 + $0x618] sm:$0xff]  ;;  %v838_v27 = vld [vmem:[#allocation3 + $0x580] sm:$0xff] }
  0x74   : > { %756 = vmatpush.msrb.mxu2 %v380_v28  ;;  %776 = vmatpush.msrb.mxu3 %v381_v29  ;;  %v839_v28 = vld [vmem:[#allocation3 + $0x588] sm:$0xff]  ;;  %v841_v29 = vld [vmem:[#allocation3 + $0x598] sm:$0xff] }
  0x75   : > { %717 = vmatpush.msrb.mxu0 %v362_v30  ;;  %737 = vmatpush.msrb.mxu1 %v363_v31  ;;  %v4863_v30 = vld [vmem:[%s4825_s7 + $0x1] sm:$0xff] }
  0x76   : > { %757 = vmatpush.msrb.mxu2 %v364_v32  ;;  %777 = vmatpush.msrb.mxu3 %v365_v33  ;;  %v1002_v31 = vld [vmem:[#allocation3 + $0xaa0] sm:$0xff]  ;;  %v1003_v32 = vld [vmem:[#allocation3 + $0xaa8] sm:$0xff]  ;;  %v1004_v33 = vld [vmem:[#allocation3 + $0xab0] sm:$0xff] }
  0x77   : > { %718 = vmatpush.msrb.mxu0 %v346_v34  ;;  %738 = vmatpush.msrb.mxu1 %v347_v35  ;;  %v1005_v34 = vld [vmem:[#allocation3 + $0xab8] sm:$0xff]  ;;  %v986_v35 = vld [vmem:[#allocation3 + $0xa20] sm:$0xff] }
  0x78   : > { %758 = vmatpush.msrb.mxu2 %v348_v36  ;;  %778 = vmatpush.msrb.mxu3 %v349_v37  ;;  %v987_v36 = vld [vmem:[#allocation3 + $0xa28] sm:$0xff]  ;;  %v988_v37 = vld [vmem:[#allocation3 + $0xa30] sm:$0xff] }
  0x79   : > { %719 = vmatpush.msrb.mxu0 %v330_v38  ;;  %739 = vmatpush.msrb.mxu1 %v331_v39  ;;  %v989_v38 = vld [vmem:[#allocation3 + $0xa38] sm:$0xff]  ;;  %v970_v39 = vld [vmem:[#allocation3 + $0x9a0] sm:$0xff] }
  0x7a   : > { %759 = vmatpush.msrb.mxu2 %v332_v40  ;;  %779 = vmatpush.msrb.mxu3 %v333_v41  ;;  %v971_v40 = vld [vmem:[#allocation3 + $0x9a8] sm:$0xff]  ;;  %v972_v41 = vld [vmem:[#allocation3 + $0x9b0] sm:$0xff] }
  0x7b   : > { %720 = vmatpush.msrb.mxu0 %v314_v42  ;;  %740 = vmatpush.msrb.mxu1 %v315_v43  ;;  %v973_v42 = vld [vmem:[#allocation3 + $0x9b8] sm:$0xff]  ;;  %v954_v43 = vld [vmem:[#allocation3 + $0x920] sm:$0xff] }
  0x7c   : > { %760 = vmatpush.msrb.mxu2 %v316_v44  ;;  %780 = vmatpush.msrb.mxu3 %v317_v45  ;;  %v955_v44 = vld [vmem:[#allocation3 + $0x928] sm:$0xff]  ;;  %v956_v45 = vld [vmem:[#allocation3 + $0x930] sm:$0xff] }
  0x7d   : > { %721 = vmatpush.msrb.mxu0 %v298_v46  ;;  %741 = vmatpush.msrb.mxu1 %v299_v47  ;;  %v957_v46 = vld [vmem:[#allocation3 + $0x938] sm:$0xff]  ;;  %v938_v47 = vld [vmem:[#allocation3 + $0x8a0] sm:$0xff] }
  0x7e   : > { %761 = vmatpush.msrb.mxu2 %v300_v48  ;;  %781 = vmatpush.msrb.mxu3 %v301_v49  ;;  %v939_v48 = vld [vmem:[#allocation3 + $0x8a8] sm:$0xff]  ;;  %v940_v49 = vld [vmem:[#allocation3 + $0x8b0] sm:$0xff] }
  0x7f   : > { %4310 = vmatmul.msk.f32.vlgmr.msra.gmra.mxu0 %vm462_vm0, %v4828_v24  ;;  %4311 = vmatmul.msk.f32.vlgmr.msra.gmra.mxu1 %vm462_vm0, %v4828_v24 }
  0x80   : > { %4312 = vmatmul.msk.f32.vlgmr.msra.gmra.mxu2 %vm462_vm0, %v4828_v24  ;;  %4313 = vmatmul.msk.f32.vlgmr.msra.gmra.mxu3 %vm462_vm0, %v4828_v24 }
  0x81   : > { %1022 = vmatpush.msra.mxu0 %v998_v50  ;;  %1042 = vmatpush.msra.mxu1 %v999_v51  ;;  %v941_v50 = vld [vmem:[#allocation3 + $0x8b8] sm:$0xff]  ;;  %v922_v51 = vld [vmem:[#allocation3 + $0x820] sm:$0xff] }
  0x82   : > { %1062 = vmatpush.msra.mxu2 %v1000_v52  ;;  %1082 = vmatpush.msra.mxu3 %v1001_v53  ;;  %v923_v52 = vld [vmem:[#allocation3 + $0x828] sm:$0xff]  ;;  %v924_v53 = vld [vmem:[#allocation3 + $0x830] sm:$0xff] }
  0x83   : > { %1023 = vmatpush.msra.mxu0 %v982_v54  ;;  %1043 = vmatpush.msra.mxu1 %v983_v55  ;;  %v925_v54 = vld [vmem:[#allocation3 + $0x838] sm:$0xff]  ;;  %v906_v55 = vld [vmem:[#allocation3 + $0x7a0] sm:$0xff] }
  0x84   : > { %1063 = vmatpush.msra.mxu2 %v984_v56  ;;  %1083 = vmatpush.msra.mxu3 %v985_v57  ;;  %v907_v56 = vld [vmem:[#allocation3 + $0x7a8] sm:$0xff]  ;;  %v908_v57 = vld [vmem:[#allocation3 + $0x7b0] sm:$0xff] }
  0x85   : > { %1024 = vmatpush.msra.mxu0 %v966_v58  ;;  %1044 = vmatpush.msra.mxu1 %v967_v59  ;;  %v909_v58 = vld [vmem:[#allocation3 + $0x7b8] sm:$0xff]  ;;  %v890_v59 = vld [vmem:[#allocation3 + $0x720] sm:$0xff] }
  0x86   : > { %1064 = vmatpush.msra.mxu2 %v968_v60  ;;  %1084 = vmatpush.msra.mxu3 %v969_v61  ;;  %v891_v60 = vld [vmem:[#allocation3 + $0x728] sm:$0xff]  ;;  %v892_v61 = vld [vmem:[#allocation3 + $0x730] sm:$0xff] }
  0x87   : > { %1025 = vmatpush.msra.mxu0 %v950_v62  ;;  %1045 = vmatpush.msra.mxu1 %v951_v63  ;;  %v893_v62 = vld [vmem:[#allocation3 + $0x738] sm:$0xff]  ;;  %v874_v63 = vld [vmem:[#allocation3 + $0x6a0] sm:$0xff] }
  0x88   : > { %1065 = vmatpush.msra.mxu2 %v952_v0  ;;  %1085 = vmatpush.msra.mxu3 %v953_v1  ;;  %v875_v0 = vld [vmem:[#allocation3 + $0x6a8] sm:$0xff]  ;;  %v876_v1 = vld [vmem:[#allocation3 + $0x6b0] sm:$0xff] }
  0x89   : > { %1026 = vmatpush.msra.mxu0 %v934_v2  ;;  %1046 = vmatpush.msra.mxu1 %v935_v3  ;;  %v877_v2 = vld [vmem:[#allocation3 + $0x6b8] sm:$0xff]  ;;  %v858_v3 = vld [vmem:[#allocation3 + $0x620] sm:$0xff] }
  0x8a   : > { %1066 = vmatpush.msra.mxu2 %v936_v4  ;;  %1086 = vmatpush.msra.mxu3 %v937_v5  ;;  %v859_v4 = vld [vmem:[#allocation3 + $0x628] sm:$0xff]  ;;  %v860_v5 = vld [vmem:[#allocation3 + $0x630] sm:$0xff] }
  0x8b   : > { %1027 = vmatpush.msra.mxu0 %v918_v6  ;;  %1047 = vmatpush.msra.mxu1 %v919_v7  ;;  %v861_v6 = vld [vmem:[#allocation3 + $0x638] sm:$0xff]  ;;  %v842_v7 = vld [vmem:[#allocation3 + $0x5a0] sm:$0xff] }
  0x8c   : > { %1067 = vmatpush.msra.mxu2 %v920_v8  ;;  %1087 = vmatpush.msra.mxu3 %v921_v9  ;;  %v843_v8 = vld [vmem:[#allocation3 + $0x5a8] sm:$0xff]  ;;  %v844_v9 = vld [vmem:[#allocation3 + $0x5b0] sm:$0xff] }
  0x8d   : > { %1028 = vmatpush.msra.mxu0 %v902_v10  ;;  %1048 = vmatpush.msra.mxu1 %v903_v11  ;;  %v845_v10 = vld [vmem:[#allocation3 + $0x5b8] sm:$0xff]  ;;  %v1006_v11 = vld [vmem:[#allocation3 + $0xac0] sm:$0xff] }
  0x8e   : > { %1068 = vmatpush.msra.mxu2 %v904_v12  ;;  %1088 = vmatpush.msra.mxu3 %v905_v13  ;;  %v1007_v12 = vld [vmem:[#allocation3 + $0xac8] sm:$0xff]  ;;  %v1008_v13 = vld [vmem:[#allocation3 + $0xad0] sm:$0xff] }
  0x8f   : > { %4314 = vmatmul.msk.f32.vlgmr.msrb.gmra.mxu0 %vm462_vm0, %v4828_v24  ;;  %4315 = vmatmul.msk.f32.vlgmr.msrb.gmra.mxu1 %vm462_vm0, %v4828_v24 }
  0x90   : > { %4316 = vmatmul.msk.f32.vlgmr.msrb.gmra.mxu2 %vm462_vm0, %v4828_v24  ;;  %4317 = vmatmul.msk.f32.vlgmr.msrb.gmra.mxu3 %vm462_vm0, %v4828_v24  ;;  %v840_v24 = vld [vmem:[#allocation3 + $0x590] sm:$0xff] }
  0x91   : > { %1029 = vmatpush.msra.mxu0 %v886_v14  ;;  %1049 = vmatpush.msra.mxu1 %v887_v15  ;;  %v1009_v14 = vld [vmem:[#allocation3 + $0xad8] sm:$0xff]  ;;  %v990_v15 = vld [vmem:[#allocation3 + $0xa40] sm:$0xff] }
  0x92   : > { %1069 = vmatpush.msra.mxu2 %v888_v16  ;;  %1089 = vmatpush.msra.mxu3 %v889_v17  ;;  %v991_v16 = vld [vmem:[#allocation3 + $0xa48] sm:$0xff]  ;;  %v992_v17 = vld [vmem:[#allocation3 + $0xa50] sm:$0xff] }
  0x93   : > { %1030 = vmatpush.msra.mxu0 %v870_v18  ;;  %1050 = vmatpush.msra.mxu1 %v871_v19  ;;  %v993_v18 = vld [vmem:[#allocation3 + $0xa58] sm:$0xff]  ;;  %v974_v19 = vld [vmem:[#allocation3 + $0x9c0] sm:$0xff] }
  0x94   : > { %1070 = vmatpush.msra.mxu2 %v872_v20  ;;  %1090 = vmatpush.msra.mxu3 %v873_v21  ;;  %v975_v20 = vld [vmem:[#allocation3 + $0x9c8] sm:$0xff]  ;;  %v976_v21 = vld [vmem:[#allocation3 + $0x9d0] sm:$0xff] }
  0x95   : > { %1031 = vmatpush.msra.mxu0 %v854_v22  ;;  %1051 = vmatpush.msra.mxu1 %v855_v23  ;;  %v977_v22 = vld [vmem:[#allocation3 + $0x9d8] sm:$0xff]  ;;  %v958_v23 = vld [vmem:[#allocation3 + $0x940] sm:$0xff] }
  0x96   : > { %1071 = vmatpush.msra.mxu2 %v856_v25  ;;  %1091 = vmatpush.msra.mxu3 %v857_v26  ;;  %v959_v25 = vld [vmem:[#allocation3 + $0x948] sm:$0xff]  ;;  %v960_v26 = vld [vmem:[#allocation3 + $0x950] sm:$0xff] }
  0x97   : > { %1032 = vmatpush.msra.mxu0 %v838_v27  ;;  %1052 = vmatpush.msra.mxu1 %v839_v28  ;;  %v961_v27 = vld [vmem:[#allocation3 + $0x958] sm:$0xff]  ;;  %v942_v28 = vld [vmem:[#allocation3 + $0x8c0] sm:$0xff] }
  0x98   : > { %1072 = vmatpush.msra.mxu2 %v840_v24  ;;  %1092 = vmatpush.msra.mxu3 %v841_v29  ;;  %v943_v24 = vld [vmem:[#allocation3 + $0x8c8] sm:$0xff]  ;;  %v944_v29 = vld [vmem:[#allocation3 + $0x8d0] sm:$0xff] }
  0x99   : > { %4320 = vmatmul.msk.f32.vlgmr.msra.gmra.mxu0 %vm462_vm0, %v4863_v30  ;;  %4321 = vmatmul.msk.f32.vlgmr.msra.gmra.mxu1 %vm462_vm0, %v4863_v30 }
  0x9a   : > { %4322 = vmatmul.msk.f32.vlgmr.msra.gmra.mxu2 %vm462_vm0, %v4863_v30  ;;  %4323 = vmatmul.msk.f32.vlgmr.msra.gmra.mxu3 %vm462_vm0, %v4863_v30 }
  0x9b   : > { %1102 = vmatpush.msrb.mxu0 %v1002_v31  ;;  %1122 = vmatpush.msrb.mxu1 %v1003_v32  ;;  %v945_v31 = vld [vmem:[#allocation3 + $0x8d8] sm:$0xff]  ;;  %v926_v32 = vld [vmem:[#allocation3 + $0x840] sm:$0xff] }
  0x9c   : > { %1142 = vmatpush.msrb.mxu2 %v1004_v33  ;;  %1162 = vmatpush.msrb.mxu3 %v1005_v34  ;;  %v927_v33 = vld [vmem:[#allocation3 + $0x848] sm:$0xff]  ;;  %v928_v34 = vld [vmem:[#allocation3 + $0x850] sm:$0xff] }
  0x9d   : > { %1103 = vmatpush.msrb.mxu0 %v986_v35  ;;  %1123 = vmatpush.msrb.mxu1 %v987_v36  ;;  %v929_v35 = vld [vmem:[#allocation3 + $0x858] sm:$0xff]  ;;  %v910_v36 = vld [vmem:[#allocation3 + $0x7c0] sm:$0xff] }
  0x9e   : > { %1143 = vmatpush.msrb.mxu2 %v988_v37  ;;  %1163 = vmatpush.msrb.mxu3 %v989_v38  ;;  %v911_v37 = vld [vmem:[#allocation3 + $0x7c8] sm:$0xff]  ;;  %v912_v38 = vld [vmem:[#allocation3 + $0x7d0] sm:$0xff] }
  0x9f   : > { %1104 = vmatpush.msrb.mxu0 %v970_v39  ;;  %1124 = vmatpush.msrb.mxu1 %v971_v40  ;;  %v913_v39 = vld [vmem:[#allocation3 + $0x7d8] sm:$0xff]  ;;  %v894_v40 = vld [vmem:[#allocation3 + $0x740] sm:$0xff] }
  0xa0   : > { %1144 = vmatpush.msrb.mxu2 %v972_v41  ;;  %1164 = vmatpush.msrb.mxu3 %v973_v42  ;;  %v895_v41 = vld [vmem:[#allocation3 + $0x748] sm:$0xff]  ;;  %v896_v42 = vld [vmem:[#allocation3 + $0x750] sm:$0xff] }
  0xa1   : > { %1105 = vmatpush.msrb.mxu0 %v954_v43  ;;  %1125 = vmatpush.msrb.mxu1 %v955_v44  ;;  %v897_v43 = vld [vmem:[#allocation3 + $0x758] sm:$0xff]  ;;  %v878_v44 = vld [vmem:[#allocation3 + $0x6c0] sm:$0xff] }
  0xa2   : > { %1145 = vmatpush.msrb.mxu2 %v956_v45  ;;  %1165 = vmatpush.msrb.mxu3 %v957_v46  ;;  %v879_v45 = vld [vmem:[#allocation3 + $0x6c8] sm:$0xff]  ;;  %v880_v46 = vld [vmem:[#allocation3 + $0x6d0] sm:$0xff] }
  0xa3   : > { %1106 = vmatpush.msrb.mxu0 %v938_v47  ;;  %1126 = vmatpush.msrb.mxu1 %v939_v48  ;;  %v881_v47 = vld [vmem:[#allocation3 + $0x6d8] sm:$0xff]  ;;  %v862_v48 = vld [vmem:[#allocation3 + $0x640] sm:$0xff] }
  0xa4   : > { %1146 = vmatpush.msrb.mxu2 %v940_v49  ;;  %1166 = vmatpush.msrb.mxu3 %v941_v50  ;;  %v863_v49 = vld [vmem:[#allocation3 + $0x648] sm:$0xff]  ;;  %v864_v50 = vld [vmem:[#allocation3 + $0x650] sm:$0xff] }
  0xa5   : > { %1107 = vmatpush.msrb.mxu0 %v922_v51  ;;  %1127 = vmatpush.msrb.mxu1 %v923_v52  ;;  %v865_v51 = vld [vmem:[#allocation3 + $0x658] sm:$0xff]  ;;  %v846_v52 = vld [vmem:[#allocation3 + $0x5c0] sm:$0xff] }
  0xa6   : > { %1147 = vmatpush.msrb.mxu2 %v924_v53  ;;  %1167 = vmatpush.msrb.mxu3 %v925_v54  ;;  %v847_v53 = vld [vmem:[#allocation3 + $0x5c8] sm:$0xff]  ;;  %v848_v54 = vld [vmem:[#allocation3 + $0x5d0] sm:$0xff] }
  0xa7   : > { %1108 = vmatpush.msrb.mxu0 %v906_v55  ;;  %1128 = vmatpush.msrb.mxu1 %v907_v56  ;;  %v849_v55 = vld [vmem:[#allocation3 + $0x5d8] sm:$0xff]  ;;  %v1010_v56 = vld [vmem:[#allocation3 + $0xae0] sm:$0xff] }
  0xa8   : > { %1148 = vmatpush.msrb.mxu2 %v908_v57  ;;  %1168 = vmatpush.msrb.mxu3 %v909_v58  ;;  %v1011_v57 = vld [vmem:[#allocation3 + $0xae8] sm:$0xff]  ;;  %v1012_v58 = vld [vmem:[#allocation3 + $0xaf0] sm:$0xff] }
  0xa9   : > { %1109 = vmatpush.msrb.mxu0 %v890_v59  ;;  %1129 = vmatpush.msrb.mxu1 %v891_v60  ;;  %v1013_v59 = vld [vmem:[#allocation3 + $0xaf8] sm:$0xff]  ;;  %v994_v60 = vld [vmem:[#allocation3 + $0xa60] sm:$0xff] }
  0xaa   : > { %1149 = vmatpush.msrb.mxu2 %v892_v61  ;;  %1169 = vmatpush.msrb.mxu3 %v893_v62  ;;  %v995_v61 = vld [vmem:[#allocation3 + $0xa68] sm:$0xff]  ;;  %v996_v62 = vld [vmem:[#allocation3 + $0xa70] sm:$0xff] }
  0xab   : > { %1110 = vmatpush.msrb.mxu0 %v874_v63  ;;  %1130 = vmatpush.msrb.mxu1 %v875_v0  ;;  %v997_v63 = vld [vmem:[#allocation3 + $0xa78] sm:$0xff]  ;;  %v978_v0 = vld [vmem:[#allocation3 + $0x9e0] sm:$0xff] }
  0xac   : > { %1150 = vmatpush.msrb.mxu2 %v876_v1  ;;  %1170 = vmatpush.msrb.mxu3 %v877_v2  ;;  %v979_v1 = vld [vmem:[#allocation3 + $0x9e8] sm:$0xff]  ;;  %v980_v2 = vld [vmem:[#allocation3 + $0x9f0] sm:$0xff] }
  0xad   : > { %1111 = vmatpush.msrb.mxu0 %v858_v3  ;;  %1131 = vmatpush.msrb.mxu1 %v859_v4  ;;  %v981_v3 = vld [vmem:[#allocation3 + $0x9f8] sm:$0xff]  ;;  %v962_v4 = vld [vmem:[#allocation3 + $0x960] sm:$0xff] }
  0xae   : > { %1151 = vmatpush.msrb.mxu2 %v860_v5  ;;  %1171 = vmatpush.msrb.mxu3 %v861_v6  ;;  %v963_v5 = vld [vmem:[#allocation3 + $0x968] sm:$0xff]  ;;  %v964_v6 = vld [vmem:[#allocation3 + $0x970] sm:$0xff] }
  0xaf   : > { %1112 = vmatpush.msrb.mxu0 %v842_v7  ;;  %1132 = vmatpush.msrb.mxu1 %v843_v8  ;;  %v965_v7 = vld [vmem:[#allocation3 + $0x978] sm:$0xff]  ;;  %v946_v8 = vld [vmem:[#allocation3 + $0x8e0] sm:$0xff] }
  0xb0   : > { %1152 = vmatpush.msrb.mxu2 %v844_v9  ;;  %1172 = vmatpush.msrb.mxu3 %v845_v10  ;;  %v947_v9 = vld [vmem:[#allocation3 + $0x8e8] sm:$0xff]  ;;  %v948_v10 = vld [vmem:[#allocation3 + $0x8f0] sm:$0xff] }
  0xb1   : > { %4324 = vmatmul.msk.f32.vlgmr.msrb.gmra.mxu0 %vm462_vm0, %v4863_v30  ;;  %4325 = vmatmul.msk.f32.vlgmr.msrb.gmra.mxu1 %vm462_vm0, %v4863_v30 }
  0xb2   : > { %4326 = vmatmul.msk.f32.vlgmr.msrb.gmra.mxu2 %vm462_vm0, %v4863_v30  ;;  %4327 = vmatmul.msk.f32.vlgmr.msrb.gmra.mxu3 %vm462_vm0, %v4863_v30 }
  0xb3   : > { %1182 = vmatpush.msra.mxu0 %v1006_v11  ;;  %1202 = vmatpush.msra.mxu1 %v1007_v12  ;;  %v949_v11 = vld [vmem:[#allocation3 + $0x8f8] sm:$0xff]  ;;  %v930_v12 = vld [vmem:[#allocation3 + $0x860] sm:$0xff] }
  0xb4   : > { %1222 = vmatpush.msra.mxu2 %v1008_v13  ;;  %1242 = vmatpush.msra.mxu3 %v1009_v14  ;;  %v931_v13 = vld [vmem:[#allocation3 + $0x868] sm:$0xff]  ;;  %v932_v14 = vld [vmem:[#allocation3 + $0x870] sm:$0xff] }
  0xb5   : > { %1183 = vmatpush.msra.mxu0 %v990_v15  ;;  %1203 = vmatpush.msra.mxu1 %v991_v16  ;;  %v933_v15 = vld [vmem:[#allocation3 + $0x878] sm:$0xff]  ;;  %v914_v16 = vld [vmem:[#allocation3 + $0x7e0] sm:$0xff] }
  0xb6   : > { %1223 = vmatpush.msra.mxu2 %v992_v17  ;;  %1243 = vmatpush.msra.mxu3 %v993_v18  ;;  %v915_v17 = vld [vmem:[#allocation3 + $0x7e8] sm:$0xff]  ;;  %v916_v18 = vld [vmem:[#allocation3 + $0x7f0] sm:$0xff] }
  0xb7   : > { %1184 = vmatpush.msra.mxu0 %v974_v19  ;;  %1204 = vmatpush.msra.mxu1 %v975_v20  ;;  %v917_v19 = vld [vmem:[#allocation3 + $0x7f8] sm:$0xff]  ;;  %v898_v20 = vld [vmem:[#allocation3 + $0x760] sm:$0xff] }
  0xb8   : > { %1224 = vmatpush.msra.mxu2 %v976_v21  ;;  %1244 = vmatpush.msra.mxu3 %v977_v22  ;;  %v899_v21 = vld [vmem:[#allocation3 + $0x768] sm:$0xff]  ;;  %v900_v22 = vld [vmem:[#allocation3 + $0x770] sm:$0xff] }
  0xb9   : > { %1185 = vmatpush.msra.mxu0 %v958_v23  ;;  %1205 = vmatpush.msra.mxu1 %v959_v25  ;;  %v901_v23 = vld [vmem:[#allocation3 + $0x778] sm:$0xff]  ;;  %v882_v25 = vld [vmem:[#allocation3 + $0x6e0] sm:$0xff] }
  0xba   : > { %1225 = vmatpush.msra.mxu2 %v960_v26  ;;  %1245 = vmatpush.msra.mxu3 %v961_v27  ;;  %v883_v26 = vld [vmem:[#allocation3 + $0x6e8] sm:$0xff]  ;;  %v884_v27 = vld [vmem:[#allocation3 + $0x6f0] sm:$0xff] }
  0xbb   : > { %1186 = vmatpush.msra.mxu0 %v942_v28  ;;  %1206 = vmatpush.msra.mxu1 %v943_v24  ;;  %v885_v28 = vld [vmem:[#allocation3 + $0x6f8] sm:$0xff]  ;;  %v866_v24 = vld [vmem:[#allocation3 + $0x660] sm:$0xff] }
  0xbc   : > { %1226 = vmatpush.msra.mxu2 %v944_v29  ;;  %1246 = vmatpush.msra.mxu3 %v945_v31  ;;  %v867_v29 = vld [vmem:[#allocation3 + $0x668] sm:$0xff]  ;;  %v868_v31 = vld [vmem:[#allocation3 + $0x670] sm:$0xff] }
  0xbd   : > { %1187 = vmatpush.msra.mxu0 %v926_v32  ;;  %1207 = vmatpush.msra.mxu1 %v927_v33  ;;  %v869_v32 = vld [vmem:[#allocation3 + $0x678] sm:$0xff]  ;;  %v850_v33 = vld [vmem:[#allocation3 + $0x5e0] sm:$0xff] }
  0xbe   : > { %1227 = vmatpush.msra.mxu2 %v928_v34  ;;  %1247 = vmatpush.msra.mxu3 %v929_v35  ;;  %v851_v34 = vld [vmem:[#allocation3 + $0x5e8] sm:$0xff]  ;;  %v852_v35 = vld [vmem:[#allocation3 + $0x5f0] sm:$0xff] }
  0xbf   : > { %1188 = vmatpush.msra.mxu0 %v910_v36  ;;  %1208 = vmatpush.msra.mxu1 %v911_v37  ;;  %v853_v36 = vld [vmem:[#allocation3 + $0x5f8] sm:$0xff]  ;;  %v1549_v37 = vld [vmem:[#allocation3 + $0x1000] sm:$0xff] }
  0xc0   : > { %1228 = vmatpush.msra.mxu2 %v912_v38  ;;  %1248 = vmatpush.msra.mxu3 %v913_v39  ;;  %v1550_v38 = vld [vmem:[#allocation3 + $0x1008] sm:$0xff]  ;;  %v1551_v39 = vld [vmem:[#allocation3 + $0x1010] sm:$0xff] }
  0xc1   : > { %1189 = vmatpush.msra.mxu0 %v894_v40  ;;  %1209 = vmatpush.msra.mxu1 %v895_v41  ;;  %v1552_v40 = vld [vmem:[#allocation3 + $0x1018] sm:$0xff]  ;;  %v1533_v41 = vld [vmem:[#allocation3 + $0xf80] sm:$0xff] }
  0xc2   : > { %1229 = vmatpush.msra.mxu2 %v896_v42  ;;  %1249 = vmatpush.msra.mxu3 %v897_v43  ;;  %v1534_v42 = vld [vmem:[#allocation3 + $0xf88] sm:$0xff]  ;;  %v1535_v43 = vld [vmem:[#allocation3 + $0xf90] sm:$0xff] }
  0xc3   : > { %1190 = vmatpush.msra.mxu0 %v878_v44  ;;  %1210 = vmatpush.msra.mxu1 %v879_v45  ;;  %v1536_v44 = vld [vmem:[#allocation3 + $0xf98] sm:$0xff]  ;;  %v1517_v45 = vld [vmem:[#allocation3 + $0xf00] sm:$0xff] }
  0xc4   : > { %1230 = vmatpush.msra.mxu2 %v880_v46  ;;  %1250 = vmatpush.msra.mxu3 %v881_v47  ;;  %v1518_v46 = vld [vmem:[#allocation3 + $0xf08] sm:$0xff]  ;;  %v1519_v47 = vld [vmem:[#allocation3 + $0xf10] sm:$0xff] }
  0xc5   : > { %1191 = vmatpush.msra.mxu0 %v862_v48  ;;  %1211 = vmatpush.msra.mxu1 %v863_v49  ;;  %v1520_v48 = vld [vmem:[#allocation3 + $0xf18] sm:$0xff]  ;;  %v1501_v49 = vld [vmem:[#allocation3 + $0xe80] sm:$0xff] }
  0xc6   : > { %1231 = vmatpush.msra.mxu2 %v864_v50  ;;  %1251 = vmatpush.msra.mxu3 %v865_v51  ;;  %v1502_v50 = vld [vmem:[#allocation3 + $0xe88] sm:$0xff]  ;;  %v1504_v51 = vld [vmem:[#allocation3 + $0xe98] sm:$0xff] }
  0xc7   : > { %1192 = vmatpush.msra.mxu0 %v846_v52  ;;  %1212 = vmatpush.msra.mxu1 %v847_v53  ;;  %v1485_v52 = vld [vmem:[#allocation3 + $0xe00] sm:$0xff]  ;;  %v1486_v53 = vld [vmem:[#allocation3 + $0xe08] sm:$0xff] }
  0xc8   : > { %1232 = vmatpush.msra.mxu2 %v848_v54  ;;  %1252 = vmatpush.msra.mxu3 %v849_v55  ;;  %v1487_v54 = vld [vmem:[#allocation3 + $0xe10] sm:$0xff]  ;;  %v1488_v55 = vld [vmem:[#allocation3 + $0xe18] sm:$0xff] }
  0xc9   : > { %4328 = vmatmul.msk.f32.vlgmr.msra.gmra.mxu0 %vm462_vm0, %v4863_v30  ;;  %4329 = vmatmul.msk.f32.vlgmr.msra.gmra.mxu1 %vm462_vm0, %v4863_v30 }
  0xca   : > { %4330 = vmatmul.msk.f32.vlgmr.msra.gmra.mxu2 %vm462_vm0, %v4863_v30  ;;  %4331 = vmatmul.msk.f32.vlgmr.msra.gmra.mxu3 %vm462_vm0, %v4863_v30 }
  0xcb   : > { %1262 = vmatpush.msrb.mxu0 %v1010_v56  ;;  %1282 = vmatpush.msrb.mxu1 %v1011_v57  ;;  %v1469_v56 = vld [vmem:[#allocation3 + $0xd80] sm:$0xff]  ;;  %v1470_v57 = vld [vmem:[#allocation3 + $0xd88] sm:$0xff] }
  0xcc   : > { %1302 = vmatpush.msrb.mxu2 %v1012_v58  ;;  %1322 = vmatpush.msrb.mxu3 %v1013_v59  ;;  %v1471_v58 = vld [vmem:[#allocation3 + $0xd90] sm:$0xff]  ;;  %v1472_v59 = vld [vmem:[#allocation3 + $0xd98] sm:$0xff] }
  0xcd   : > { %1263 = vmatpush.msrb.mxu0 %v994_v60  ;;  %1283 = vmatpush.msrb.mxu1 %v995_v61  ;;  %v1453_v60 = vld [vmem:[#allocation3 + $0xd00] sm:$0xff]  ;;  %v1454_v61 = vld [vmem:[#allocation3 + $0xd08] sm:$0xff] }
  0xce   : > { %1303 = vmatpush.msrb.mxu2 %v996_v62  ;;  %1323 = vmatpush.msrb.mxu3 %v997_v63  ;;  %v1455_v62 = vld [vmem:[#allocation3 + $0xd10] sm:$0xff]  ;;  %v1456_v63 = vld [vmem:[#allocation3 + $0xd18] sm:$0xff] }
  0xcf   : > { %1264 = vmatpush.msrb.mxu0 %v978_v0  ;;  %1284 = vmatpush.msrb.mxu1 %v979_v1  ;;  %v1437_v0 = vld [vmem:[#allocation3 + $0xc80] sm:$0xff]  ;;  %v1438_v1 = vld [vmem:[#allocation3 + $0xc88] sm:$0xff] }
  0xd0   : > { %1304 = vmatpush.msrb.mxu2 %v980_v2  ;;  %1324 = vmatpush.msrb.mxu3 %v981_v3  ;;  %v1439_v2 = vld [vmem:[#allocation3 + $0xc90] sm:$0xff]  ;;  %v1440_v3 = vld [vmem:[#allocation3 + $0xc98] sm:$0xff] }
  0xd1   : > { %1265 = vmatpush.msrb.mxu0 %v962_v4  ;;  %1285 = vmatpush.msrb.mxu1 %v963_v5  ;;  %v1421_v4 = vld [vmem:[#allocation3 + $0xc00] sm:$0xff]  ;;  %v1422_v5 = vld [vmem:[#allocation3 + $0xc08] sm:$0xff] }
  0xd2   : > { %1305 = vmatpush.msrb.mxu2 %v964_v6  ;;  %1325 = vmatpush.msrb.mxu3 %v965_v7  ;;  %v1423_v6 = vld [vmem:[#allocation3 + $0xc10] sm:$0xff]  ;;  %v1424_v7 = vld [vmem:[#allocation3 + $0xc18] sm:$0xff] }
  0xd3   : > { %1266 = vmatpush.msrb.mxu0 %v946_v8  ;;  %1286 = vmatpush.msrb.mxu1 %v947_v9  ;;  %v1405_v8 = vld [vmem:[#allocation3 + $0xb80] sm:$0xff]  ;;  %v1406_v9 = vld [vmem:[#allocation3 + $0xb88] sm:$0xff] }
  0xd4   : > { %1306 = vmatpush.msrb.mxu2 %v948_v10  ;;  %1326 = vmatpush.msrb.mxu3 %v949_v11  ;;  %v1407_v10 = vld [vmem:[#allocation3 + $0xb90] sm:$0xff]  ;;  %v1408_v11 = vld [vmem:[#allocation3 + $0xb98] sm:$0xff] }
  0xd5   : > { %1267 = vmatpush.msrb.mxu0 %v930_v12  ;;  %1287 = vmatpush.msrb.mxu1 %v931_v13  ;;  %v1389_v12 = vld [vmem:[#allocation3 + $0xb00] sm:$0xff]  ;;  %v1390_v13 = vld [vmem:[#allocation3 + $0xb08] sm:$0xff] }
  0xd6   : > { %1307 = vmatpush.msrb.mxu2 %v932_v14  ;;  %1327 = vmatpush.msrb.mxu3 %v933_v15  ;;  %v1391_v14 = vld [vmem:[#allocation3 + $0xb10] sm:$0xff]  ;;  %v1392_v15 = vld [vmem:[#allocation3 + $0xb18] sm:$0xff] }
  0xd7   : > { %1268 = vmatpush.msrb.mxu0 %v914_v16  ;;  %1288 = vmatpush.msrb.mxu1 %v915_v17  ;;  %v4898_v16 = vld [vmem:[%s4825_s7 + $0x2] sm:$0xff] }
  0xd8   : > { %1308 = vmatpush.msrb.mxu2 %v916_v18  ;;  %1328 = vmatpush.msrb.mxu3 %v917_v19  ;;  %v1553_v17 = vld [vmem:[#allocation3 + $0x1020] sm:$0xff]  ;;  %v1554_v18 = vld [vmem:[#allocation3 + $0x1028] sm:$0xff]  ;;  %v1555_v19 = vld [vmem:[#allocation3 + $0x1030] sm:$0xff] }
  0xd9   : > { %1269 = vmatpush.msrb.mxu0 %v898_v20  ;;  %1289 = vmatpush.msrb.mxu1 %v899_v21  ;;  %v1556_v20 = vld [vmem:[#allocation3 + $0x1038] sm:$0xff]  ;;  %v1537_v21 = vld [vmem:[#allocation3 + $0xfa0] sm:$0xff] }
  0xda   : > { %1309 = vmatpush.msrb.mxu2 %v900_v22  ;;  %1329 = vmatpush.msrb.mxu3 %v901_v23  ;;  %v1538_v22 = vld [vmem:[#allocation3 + $0xfa8] sm:$0xff]  ;;  %v1539_v23 = vld [vmem:[#allocation3 + $0xfb0] sm:$0xff] }
  0xdb   : > { %1270 = vmatpush.msrb.mxu0 %v882_v25  ;;  %1290 = vmatpush.msrb.mxu1 %v883_v26  ;;  %v1540_v25 = vld [vmem:[#allocation3 + $0xfb8] sm:$0xff]  ;;  %v1521_v26 = vld [vmem:[#allocation3 + $0xf20] sm:$0xff] }
  0xdc   : > { %1310 = vmatpush.msrb.mxu2 %v884_v27  ;;  %1330 = vmatpush.msrb.mxu3 %v885_v28  ;;  %v1522_v27 = vld [vmem:[#allocation3 + $0xf28] sm:$0xff]  ;;  %v1523_v28 = vld [vmem:[#allocation3 + $0xf30] sm:$0xff] }
  0xdd   : > { %1271 = vmatpush.msrb.mxu0 %v866_v24  ;;  %1291 = vmatpush.msrb.mxu1 %v867_v29  ;;  %v1524_v24 = vld [vmem:[#allocation3 + $0xf38] sm:$0xff]  ;;  %v1505_v29 = vld [vmem:[#allocation3 + $0xea0] sm:$0xff] }
  0xde   : > { %1311 = vmatpush.msrb.mxu2 %v868_v31  ;;  %1331 = vmatpush.msrb.mxu3 %v869_v32  ;;  %v1506_v31 = vld [vmem:[#allocation3 + $0xea8] sm:$0xff]  ;;  %v1507_v32 = vld [vmem:[#allocation3 + $0xeb0] sm:$0xff] }
  0xdf   : > { %1272 = vmatpush.msrb.mxu0 %v850_v33  ;;  %1292 = vmatpush.msrb.mxu1 %v851_v34  ;;  %v1508_v33 = vld [vmem:[#allocation3 + $0xeb8] sm:$0xff]  ;;  %v1489_v34 = vld [vmem:[#allocation3 + $0xe20] sm:$0xff] }
  0xe0   : > { %1312 = vmatpush.msrb.mxu2 %v852_v35  ;;  %1332 = vmatpush.msrb.mxu3 %v853_v36  ;;  %v1490_v35 = vld [vmem:[#allocation3 + $0xe28] sm:$0xff]  ;;  %v1491_v36 = vld [vmem:[#allocation3 + $0xe30] sm:$0xff] }
  0xe1   : > { %4332 = vmatmul.msk.f32.vlgmr.msrb.gmra.mxu0 %vm462_vm0, %v4863_v30  ;;  %4333 = vmatmul.msk.f32.vlgmr.msrb.gmra.mxu1 %vm462_vm0, %v4863_v30 }
  0xe2   : > { %4334 = vmatmul.msk.f32.vlgmr.msrb.gmra.mxu2 %vm462_vm0, %v4863_v30  ;;  %4335 = vmatmul.msk.f32.vlgmr.msrb.gmra.mxu3 %vm462_vm0, %v4863_v30  ;;  %v1503_v30 = vld [vmem:[#allocation3 + $0xe90] sm:$0xff] }
  0xe3   : > { %1573 = vmatpush.msra.mxu0 %v1549_v37  ;;  %1593 = vmatpush.msra.mxu1 %v1550_v38  ;;  %v1492_v37 = vld [vmem:[#allocation3 + $0xe38] sm:$0xff]  ;;  %v1473_v38 = vld [vmem:[#allocation3 + $0xda0] sm:$0xff] }
  0xe4   : > { %1613 = vmatpush.msra.mxu2 %v1551_v39  ;;  %1633 = vmatpush.msra.mxu3 %v1552_v40  ;;  %v1474_v39 = vld [vmem:[#allocation3 + $0xda8] sm:$0xff]  ;;  %v1475_v40 = vld [vmem:[#allocation3 + $0xdb0] sm:$0xff] }
  0xe5   : > { %1574 = vmatpush.msra.mxu0 %v1533_v41  ;;  %1594 = vmatpush.msra.mxu1 %v1534_v42  ;;  %v1476_v41 = vld [vmem:[#allocation3 + $0xdb8] sm:$0xff]  ;;  %v1457_v42 = vld [vmem:[#allocation3 + $0xd20] sm:$0xff] }
  0xe6   : > { %1614 = vmatpush.msra.mxu2 %v1535_v43  ;;  %1634 = vmatpush.msra.mxu3 %v1536_v44  ;;  %v1458_v43 = vld [vmem:[#allocation3 + $0xd28] sm:$0xff]  ;;  %v1459_v44 = vld [vmem:[#allocation3 + $0xd30] sm:$0xff] }
  0xe7   : > { %1575 = vmatpush.msra.mxu0 %v1517_v45  ;;  %1595 = vmatpush.msra.mxu1 %v1518_v46  ;;  %v1460_v45 = vld [vmem:[#allocation3 + $0xd38] sm:$0xff]  ;;  %v1441_v46 = vld [vmem:[#allocation3 + $0xca0] sm:$0xff] }
  0xe8   : > { %1615 = vmatpush.msra.mxu2 %v1519_v47  ;;  %1635 = vmatpush.msra.mxu3 %v1520_v48  ;;  %v1442_v47 = vld [vmem:[#allocation3 + $0xca8] sm:$0xff]  ;;  %v1443_v48 = vld [vmem:[#allocation3 + $0xcb0] sm:$0xff] }
  0xe9   : > { %1576 = vmatpush.msra.mxu0 %v1501_v49  ;;  %1596 = vmatpush.msra.mxu1 %v1502_v50  ;;  %v1444_v49 = vld [vmem:[#allocation3 + $0xcb8] sm:$0xff]  ;;  %v1425_v50 = vld [vmem:[#allocation3 + $0xc20] sm:$0xff] }
  0xea   : > { %1616 = vmatpush.msra.mxu2 %v1503_v30  ;;  %1636 = vmatpush.msra.mxu3 %v1504_v51  ;;  %v1426_v30 = vld [vmem:[#allocation3 + $0xc28] sm:$0xff]  ;;  %v1427_v51 = vld [vmem:[#allocation3 + $0xc30] sm:$0xff] }
  0xeb   : > { %1577 = vmatpush.msra.mxu0 %v1485_v52  ;;  %1597 = vmatpush.msra.mxu1 %v1486_v53  ;;  %v1428_v52 = vld [vmem:[#allocation3 + $0xc38] sm:$0xff]  ;;  %v1409_v53 = vld [vmem:[#allocation3 + $0xba0] sm:$0xff] }
  0xec   : > { %1617 = vmatpush.msra.mxu2 %v1487_v54  ;;  %1637 = vmatpush.msra.mxu3 %v1488_v55  ;;  %v1410_v54 = vld [vmem:[#allocation3 + $0xba8] sm:$0xff]  ;;  %v1411_v55 = vld [vmem:[#allocation3 + $0xbb0] sm:$0xff] }
  0xed   : > { %1578 = vmatpush.msra.mxu0 %v1469_v56  ;;  %1598 = vmatpush.msra.mxu1 %v1470_v57  ;;  %v1412_v56 = vld [vmem:[#allocation3 + $0xbb8] sm:$0xff]  ;;  %v1393_v57 = vld [vmem:[#allocation3 + $0xb20] sm:$0xff] }
  0xee   : > { %1618 = vmatpush.msra.mxu2 %v1471_v58  ;;  %1638 = vmatpush.msra.mxu3 %v1472_v59  ;;  %v1394_v58 = vld [vmem:[#allocation3 + $0xb28] sm:$0xff]  ;;  %v1395_v59 = vld [vmem:[#allocation3 + $0xb30] sm:$0xff] }
  0xef   : > { %1579 = vmatpush.msra.mxu0 %v1453_v60  ;;  %1599 = vmatpush.msra.mxu1 %v1454_v61  ;;  %v1396_v60 = vld [vmem:[#allocation3 + $0xb38] sm:$0xff]  ;;  %v1557_v61 = vld [vmem:[#allocation3 + $0x1040] sm:$0xff] }
  0xf0   : > { %1619 = vmatpush.msra.mxu2 %v1455_v62  ;;  %1639 = vmatpush.msra.mxu3 %v1456_v63  ;;  %v1558_v62 = vld [vmem:[#allocation3 + $0x1048] sm:$0xff]  ;;  %v1559_v63 = vld [vmem:[#allocation3 + $0x1050] sm:$0xff] }
  0xf1   : > { %1580 = vmatpush.msra.mxu0 %v1437_v0  ;;  %1600 = vmatpush.msra.mxu1 %v1438_v1  ;;  %v1560_v0 = vld [vmem:[#allocation3 + $0x1058] sm:$0xff]  ;;  %v1541_v1 = vld [vmem:[#allocation3 + $0xfc0] sm:$0xff] }
  0xf2   : > { %1620 = vmatpush.msra.mxu2 %v1439_v2  ;;  %1640 = vmatpush.msra.mxu3 %v1440_v3  ;;  %v1542_v2 = vld [vmem:[#allocation3 + $0xfc8] sm:$0xff]  ;;  %v1543_v3 = vld [vmem:[#allocation3 + $0xfd0] sm:$0xff] }
  0xf3   : > { %1581 = vmatpush.msra.mxu0 %v1421_v4  ;;  %1601 = vmatpush.msra.mxu1 %v1422_v5  ;;  %v1544_v4 = vld [vmem:[#allocation3 + $0xfd8] sm:$0xff]  ;;  %v1525_v5 = vld [vmem:[#allocation3 + $0xf40] sm:$0xff] }
  0xf4   : > { %1621 = vmatpush.msra.mxu2 %v1423_v6  ;;  %1641 = vmatpush.msra.mxu3 %v1424_v7  ;;  %v1526_v6 = vld [vmem:[#allocation3 + $0xf48] sm:$0xff]  ;;  %v1527_v7 = vld [vmem:[#allocation3 + $0xf50] sm:$0xff] }
  0xf5   : > { %1582 = vmatpush.msra.mxu0 %v1405_v8  ;;  %1602 = vmatpush.msra.mxu1 %v1406_v9  ;;  %v1528_v8 = vld [vmem:[#allocation3 + $0xf58] sm:$0xff]  ;;  %v1509_v9 = vld [vmem:[#allocation3 + $0xec0] sm:$0xff] }
  0xf6   : > { %1622 = vmatpush.msra.mxu2 %v1407_v10  ;;  %1642 = vmatpush.msra.mxu3 %v1408_v11  ;;  %v1510_v10 = vld [vmem:[#allocation3 + $0xec8] sm:$0xff]  ;;  %v1511_v11 = vld [vmem:[#allocation3 + $0xed0] sm:$0xff] }
  0xf7   : > { %1583 = vmatpush.msra.mxu0 %v1389_v12  ;;  %1603 = vmatpush.msra.mxu1 %v1390_v13  ;;  %v1512_v12 = vld [vmem:[#allocation3 + $0xed8] sm:$0xff]  ;;  %v1493_v13 = vld [vmem:[#allocation3 + $0xe40] sm:$0xff] }
  0xf8   : > { %1623 = vmatpush.msra.mxu2 %v1391_v14  ;;  %1643 = vmatpush.msra.mxu3 %v1392_v15  ;;  %v1494_v14 = vld [vmem:[#allocation3 + $0xe48] sm:$0xff]  ;;  %v1495_v15 = vld [vmem:[#allocation3 + $0xe50] sm:$0xff] }
  0xf9   : > { %4338 = vmatmul.msk.f32.vlgmr.msra.gmra.mxu0 %vm462_vm0, %v4898_v16  ;;  %4339 = vmatmul.msk.f32.vlgmr.msra.gmra.mxu1 %vm462_vm0, %v4898_v16 }
  0xfa   : > { %4340 = vmatmul.msk.f32.vlgmr.msra.gmra.mxu2 %vm462_vm0, %v4898_v16  ;;  %4341 = vmatmul.msk.f32.vlgmr.msra.gmra.mxu3 %vm462_vm0, %v4898_v16 }
  0xfb   : > { %1653 = vmatpush.msrb.mxu0 %v1553_v17  ;;  %1673 = vmatpush.msrb.mxu1 %v1554_v18  ;;  %v1496_v17 = vld [vmem:[#allocation3 + $0xe58] sm:$0xff]  ;;  %v1477_v18 = vld [vmem:[#allocation3 + $0xdc0] sm:$0xff] }
  0xfc   : > { %1693 = vmatpush.msrb.mxu2 %v1555_v19  ;;  %1713 = vmatpush.msrb.mxu3 %v1556_v20  ;;  %v1478_v19 = vld [vmem:[#allocation3 + $0xdc8] sm:$0xff]  ;;  %v1479_v20 = vld [vmem:[#allocation3 + $0xdd0] sm:$0xff] }
  0xfd   : > { %1654 = vmatpush.msrb.mxu0 %v1537_v21  ;;  %1674 = vmatpush.msrb.mxu1 %v1538_v22  ;;  %v1480_v21 = vld [vmem:[#allocation3 + $0xdd8] sm:$0xff]  ;;  %v1461_v22 = vld [vmem:[#allocation3 + $0xd40] sm:$0xff] }
  0xfe   : > { %1694 = vmatpush.msrb.mxu2 %v1539_v23  ;;  %1714 = vmatpush.msrb.mxu3 %v1540_v25  ;;  %v1462_v23 = vld [vmem:[#allocation3 + $0xd48] sm:$0xff]  ;;  %v1463_v25 = vld [vmem:[#allocation3 + $0xd50] sm:$0xff] }
  0xff   : > { %1655 = vmatpush.msrb.mxu0 %v1521_v26  ;;  %1675 = vmatpush.msrb.mxu1 %v1522_v27  ;;  %v1464_v26 = vld [vmem:[#allocation3 + $0xd58] sm:$0xff]  ;;  %v1445_v27 = vld [vmem:[#allocation3 + $0xcc0] sm:$0xff] }
 0x100   : > { %1695 = vmatpush.msrb.mxu2 %v1523_v28  ;;  %1715 = vmatpush.msrb.mxu3 %v1524_v24  ;;  %v1446_v28 = vld [vmem:[#allocation3 + $0xcc8] sm:$0xff]  ;;  %v1447_v24 = vld [vmem:[#allocation3 + $0xcd0] sm:$0xff] }
 0x101   : > { %1656 = vmatpush.msrb.mxu0 %v1505_v29  ;;  %1676 = vmatpush.msrb.mxu1 %v1506_v31  ;;  %v1448_v29 = vld [vmem:[#allocation3 + $0xcd8] sm:$0xff]  ;;  %v1429_v31 = vld [vmem:[#allocation3 + $0xc40] sm:$0xff] }
 0x102   : > { %1696 = vmatpush.msrb.mxu2 %v1507_v32  ;;  %1716 = vmatpush.msrb.mxu3 %v1508_v33  ;;  %v1430_v32 = vld [vmem:[#allocation3 + $0xc48] sm:$0xff]  ;;  %v1431_v33 = vld [vmem:[#allocation3 + $0xc50] sm:$0xff] }
 0x103   : > { %1657 = vmatpush.msrb.mxu0 %v1489_v34  ;;  %1677 = vmatpush.msrb.mxu1 %v1490_v35  ;;  %v1432_v34 = vld [vmem:[#allocation3 + $0xc58] sm:$0xff]  ;;  %v1413_v35 = vld [vmem:[#allocation3 + $0xbc0] sm:$0xff] }
 0x104   : > { %1697 = vmatpush.msrb.mxu2 %v1491_v36  ;;  %1717 = vmatpush.msrb.mxu3 %v1492_v37  ;;  %v1414_v36 = vld [vmem:[#allocation3 + $0xbc8] sm:$0xff]  ;;  %v1415_v37 = vld [vmem:[#allocation3 + $0xbd0] sm:$0xff] }
 0x105   : > { %1658 = vmatpush.msrb.mxu0 %v1473_v38  ;;  %1678 = vmatpush.msrb.mxu1 %v1474_v39  ;;  %v1416_v38 = vld [vmem:[#allocation3 + $0xbd8] sm:$0xff]  ;;  %v1397_v39 = vld [vmem:[#allocation3 + $0xb40] sm:$0xff] }
 0x106   : > { %1698 = vmatpush.msrb.mxu2 %v1475_v40  ;;  %1718 = vmatpush.msrb.mxu3 %v1476_v41  ;;  %v1398_v40 = vld [vmem:[#allocation3 + $0xb48] sm:$0xff]  ;;  %v1399_v41 = vld [vmem:[#allocation3 + $0xb50] sm:$0xff] }
 0x107   : > { %1659 = vmatpush.msrb.mxu0 %v1457_v42  ;;  %1679 = vmatpush.msrb.mxu1 %v1458_v43  ;;  %v1400_v42 = vld [vmem:[#allocation3 + $0xb58] sm:$0xff]  ;;  %v1561_v43 = vld [vmem:[#allocation3 + $0x1060] sm:$0xff] }
 0x108   : > { %1699 = vmatpush.msrb.mxu2 %v1459_v44  ;;  %1719 = vmatpush.msrb.mxu3 %v1460_v45  ;;  %v1562_v44 = vld [vmem:[#allocation3 + $0x1068] sm:$0xff]  ;;  %v1563_v45 = vld [vmem:[#allocation3 + $0x1070] sm:$0xff] }
 0x109   : > { %1660 = vmatpush.msrb.mxu0 %v1441_v46  ;;  %1680 = vmatpush.msrb.mxu1 %v1442_v47  ;;  %v1564_v46 = vld [vmem:[#allocation3 + $0x1078] sm:$0xff]  ;;  %v1545_v47 = vld [vmem:[#allocation3 + $0xfe0] sm:$0xff] }
 0x10a   : > { %1700 = vmatpush.msrb.mxu2 %v1443_v48  ;;  %1720 = vmatpush.msrb.mxu3 %v1444_v49  ;;  %v1546_v48 = vld [vmem:[#allocation3 + $0xfe8] sm:$0xff]  ;;  %v1547_v49 = vld [vmem:[#allocation3 + $0xff0] sm:$0xff] }
 0x10b   : > { %1661 = vmatpush.msrb.mxu0 %v1425_v50  ;;  %1681 = vmatpush.msrb.mxu1 %v1426_v30  ;;  %v1548_v50 = vld [vmem:[#allocation3 + $0xff8] sm:$0xff]  ;;  %v1529_v30 = vld [vmem:[#allocation3 + $0xf60] sm:$0xff] }
 0x10c   : > { %1701 = vmatpush.msrb.mxu2 %v1427_v51  ;;  %1721 = vmatpush.msrb.mxu3 %v1428_v52  ;;  %v1530_v51 = vld [vmem:[#allocation3 + $0xf68] sm:$0xff]  ;;  %v1531_v52 = vld [vmem:[#allocation3 + $0xf70] sm:$0xff] }
 0x10d   : > { %1662 = vmatpush.msrb.mxu0 %v1409_v53  ;;  %1682 = vmatpush.msrb.mxu1 %v1410_v54  ;;  %v1532_v53 = vld [vmem:[#allocation3 + $0xf78] sm:$0xff]  ;;  %v1513_v54 = vld [vmem:[#allocation3 + $0xee0] sm:$0xff] }
 0x10e   : > { %1702 = vmatpush.msrb.mxu2 %v1411_v55  ;;  %1722 = vmatpush.msrb.mxu3 %v1412_v56  ;;  %v1514_v55 = vld [vmem:[#allocation3 + $0xee8] sm:$0xff]  ;;  %v1515_v56 = vld [vmem:[#allocation3 + $0xef0] sm:$0xff] }
 0x10f   : > { %1663 = vmatpush.msrb.mxu0 %v1393_v57  ;;  %1683 = vmatpush.msrb.mxu1 %v1394_v58  ;;  %v1516_v57 = vld [vmem:[#allocation3 + $0xef8] sm:$0xff]  ;;  %v1497_v58 = vld [vmem:[#allocation3 + $0xe60] sm:$0xff] }
 0x110   : > { %1703 = vmatpush.msrb.mxu2 %v1395_v59  ;;  %1723 = vmatpush.msrb.mxu3 %v1396_v60  ;;  %v1498_v59 = vld [vmem:[#allocation3 + $0xe68] sm:$0xff]  ;;  %v1499_v60 = vld [vmem:[#allocation3 + $0xe70] sm:$0xff] }
 0x111   : > { %4342 = vmatmul.msk.f32.vlgmr.msrb.gmra.mxu0 %vm462_vm0, %v4898_v16  ;;  %4343 = vmatmul.msk.f32.vlgmr.msrb.gmra.mxu1 %vm462_vm0, %v4898_v16 }
 0x112   : > { %4344 = vmatmul.msk.f32.vlgmr.msrb.gmra.mxu2 %vm462_vm0, %v4898_v16  ;;  %4345 = vmatmul.msk.f32.vlgmr.msrb.gmra.mxu3 %vm462_vm0, %v4898_v16 }
 0x113   : > { %1733 = vmatpush.msra.mxu0 %v1557_v61  ;;  %1753 = vmatpush.msra.mxu1 %v1558_v62  ;;  %v1500_v61 = vld [vmem:[#allocation3 + $0xe78] sm:$0xff]  ;;  %v4924_v62 = vpop.f32.mrf.mxu0 }
 0x114   : > { %1773 = vmatpush.msra.mxu2 %v1559_v63  ;;  %1793 = vmatpush.msra.mxu3 %v1560_v0  ;;  %v4926_v63 = vpop.f32.mrf.mxu1  ;;  %v1481_v0 = vld [vmem:[#allocation3 + $0xde0] sm:$0xff] }
 0x115   : > { %1734 = vmatpush.msra.mxu0 %v1541_v1  ;;  %1754 = vmatpush.msra.mxu1 %v1542_v2  ;;  %v1482_v1 = vld [vmem:[#allocation3 + $0xde8] sm:$0xff]  ;;  %v1483_v2 = vld [vmem:[#allocation3 + $0xdf0] sm:$0xff] }
 0x116   : > { %1774 = vmatpush.msra.mxu2 %v1543_v3  ;;  %1794 = vmatpush.msra.mxu3 %v1544_v4  ;;  %v1484_v3 = vld [vmem:[#allocation3 + $0xdf8] sm:$0xff]  ;;  %v1465_v4 = vld [vmem:[#allocation3 + $0xd60] sm:$0xff] }
 0x117   : > { %1735 = vmatpush.msra.mxu0 %v1525_v5  ;;  %1755 = vmatpush.msra.mxu1 %v1526_v6  ;;  %v1466_v5 = vld [vmem:[#allocation3 + $0xd68] sm:$0xff]  ;;  %v1467_v6 = vld [vmem:[#allocation3 + $0xd70] sm:$0xff] }
 0x118   : > { %1775 = vmatpush.msra.mxu2 %v1527_v7  ;;  %1795 = vmatpush.msra.mxu3 %v1528_v8  ;;  %v1468_v7 = vld [vmem:[#allocation3 + $0xd78] sm:$0xff]  ;;  %v1449_v8 = vld [vmem:[#allocation3 + $0xce0] sm:$0xff] }
 0x119   : > { %1736 = vmatpush.msra.mxu0 %v1509_v9  ;;  %1756 = vmatpush.msra.mxu1 %v1510_v10  ;;  %v1450_v9 = vld [vmem:[#allocation3 + $0xce8] sm:$0xff]  ;;  %v1451_v10 = vld [vmem:[#allocation3 + $0xcf0] sm:$0xff] }
 0x11a   : > { %1776 = vmatpush.msra.mxu2 %v1511_v11  ;;  %1796 = vmatpush.msra.mxu3 %v1512_v12  ;;  %v1452_v11 = vld [vmem:[#allocation3 + $0xcf8] sm:$0xff]  ;;  %v1433_v12 = vld [vmem:[#allocation3 + $0xc60] sm:$0xff] }
 0x11b   : > { %1737 = vmatpush.msra.mxu0 %v1493_v13  ;;  %1757 = vmatpush.msra.mxu1 %v1494_v14  ;;  %v1434_v13 = vld [vmem:[#allocation3 + $0xc68] sm:$0xff]  ;;  %v1435_v14 = vld [vmem:[#allocation3 + $0xc70] sm:$0xff] }
 0x11c   : > { %1777 = vmatpush.msra.mxu2 %v1495_v15  ;;  %1797 = vmatpush.msra.mxu3 %v1496_v17  ;;  %v1436_v15 = vld [vmem:[#allocation3 + $0xc78] sm:$0xff]  ;;  %v4928_v17 = vpop.f32.mrf.mxu0 }
 0x11d   : > { %1738 = vmatpush.msra.mxu0 %v1477_v18  ;;  %1758 = vmatpush.msra.mxu1 %v1478_v19  ;;  %v4930_v18 = vpop.f32.mrf.mxu1  ;;  %v1417_v19 = vld [vmem:[#allocation3 + $0xbe0] sm:$0xff] }
 0x11e   : > { %1778 = vmatpush.msra.mxu2 %v1479_v20  ;;  %1798 = vmatpush.msra.mxu3 %v1480_v21  ;;  %v1418_v20 = vld [vmem:[#allocation3 + $0xbe8] sm:$0xff]  ;;  %v4932_v21 = vpop.f32.mrf.mxu2 }
 0x11f   : > { %1739 = vmatpush.msra.mxu0 %v1461_v22  ;;  %1759 = vmatpush.msra.mxu1 %v1462_v23  ;;  %v4934_v22 = vpop.f32.mrf.mxu3  ;;  %v1419_v23 = vld [vmem:[#allocation3 + $0xbf0] sm:$0xff] }
 0x120   : > { %1779 = vmatpush.msra.mxu2 %v1463_v25  ;;  %1799 = vmatpush.msra.mxu3 %v1464_v26  ;;  %v1420_v25 = vld [vmem:[#allocation3 + $0xbf8] sm:$0xff]  ;;  %v1401_v26 = vld [vmem:[#allocation3 + $0xb60] sm:$0xff] }
 0x121   : > { %1740 = vmatpush.msra.mxu0 %v1445_v27  ;;  %1760 = vmatpush.msra.mxu1 %v1446_v28  ;;  %v1402_v27 = vld [vmem:[#allocation3 + $0xb68] sm:$0xff]  ;;  %v1403_v28 = vld [vmem:[#allocation3 + $0xb70] sm:$0xff] }
 0x122   : > { %1780 = vmatpush.msra.mxu2 %v1447_v24  ;;  %1800 = vmatpush.msra.mxu3 %v1448_v29  ;;  %v1404_v24 = vld [vmem:[#allocation3 + $0xb78] sm:$0xff]  ;;  %v2100_v29 = vld [vmem:[#allocation3 + $0x1580] sm:$0xff] }
 0x123   : > { %1741 = vmatpush.msra.mxu0 %v1429_v31  ;;  %1761 = vmatpush.msra.mxu1 %v1430_v32  ;;  %v2101_v31 = vld [vmem:[#allocation3 + $0x1588] sm:$0xff]  ;;  %v2102_v32 = vld [vmem:[#allocation3 + $0x1590] sm:$0xff] }
 0x124   : > { %1781 = vmatpush.msra.mxu2 %v1431_v33  ;;  %1801 = vmatpush.msra.mxu3 %v1432_v34  ;;  %v2103_v33 = vld [vmem:[#allocation3 + $0x1598] sm:$0xff]  ;;  %v4940_v34 = vpop.f32.mrf.mxu0 }
 0x125   : > { %1742 = vmatpush.msra.mxu0 %v1413_v35  ;;  %1762 = vmatpush.msra.mxu1 %v1414_v36  ;;  %v4942_v35 = vpop.f32.mrf.mxu1  ;;  %v2084_v36 = vld [vmem:[#allocation3 + $0x1500] sm:$0xff] }
 0x126   : > { %1782 = vmatpush.msra.mxu2 %v1415_v37  ;;  %1802 = vmatpush.msra.mxu3 %v1416_v38  ;;  %v2085_v37 = vld [vmem:[#allocation3 + $0x1508] sm:$0xff]  ;;  %v4948_v38 = vpop.f32.mrf.mxu2 }
 0x127   : > { %1743 = vmatpush.msra.mxu0 %v1397_v39  ;;  %1763 = vmatpush.msra.mxu1 %v1398_v40  ;;  %v4950_v39 = vpop.f32.mrf.mxu3  ;;  %v2086_v40 = vld [vmem:[#allocation3 + $0x1510] sm:$0xff] }
 0x128   : > { %1783 = vmatpush.msra.mxu2 %v1399_v41  ;;  %1803 = vmatpush.msra.mxu3 %v1400_v42  ;;  %v2087_v41 = vld [vmem:[#allocation3 + $0x1518] sm:$0xff]  ;;  %v2068_v42 = vld [vmem:[#allocation3 + $0x1480] sm:$0xff] }
 0x129   : > { %4346 = vmatmul.msk.f32.vlgmr.msra.gmra.mxu0 %vm462_vm0, %v4898_v16  ;;  %4347 = vmatmul.msk.f32.vlgmr.msra.gmra.mxu1 %vm462_vm0, %v4898_v16 }
 0x12a   : > { %4348 = vmatmul.msk.f32.vlgmr.msra.gmra.mxu2 %vm462_vm0, %v4898_v16  ;;  %4349 = vmatmul.msk.f32.vlgmr.msra.gmra.mxu3 %vm462_vm0, %v4898_v16 }
 0x12b   : > { %1813 = vmatpush.msrb.mxu0 %v1561_v43  ;;  %1833 = vmatpush.msrb.mxu1 %v1562_v44  ;;  %v2069_v43 = vld [vmem:[#allocation3 + $0x1488] sm:$0xff]  ;;  %v2070_v44 = vld [vmem:[#allocation3 + $0x1490] sm:$0xff] }
 0x12c   : > { %1853 = vmatpush.msrb.mxu2 %v1563_v45  ;;  %1873 = vmatpush.msrb.mxu3 %v1564_v46  ;;  %v2071_v45 = vld [vmem:[#allocation3 + $0x1498] sm:$0xff]  ;;  %v2053_v46 = vld [vmem:[#allocation3 + $0x1408] sm:$0xff] }
 0x12d   : > { %1814 = vmatpush.msrb.mxu0 %v1545_v47  ;;  %1834 = vmatpush.msrb.mxu1 %v1546_v48  ;;  %v2054_v47 = vld [vmem:[#allocation3 + $0x1410] sm:$0xff]  ;;  %v2055_v48 = vld [vmem:[#allocation3 + $0x1418] sm:$0xff] }
 0x12e   : > { %1854 = vmatpush.msrb.mxu2 %v1547_v49  ;;  %1874 = vmatpush.msrb.mxu3 %v1548_v50  ;;  %v2036_v49 = vld [vmem:[#allocation3 + $0x1380] sm:$0xff]  ;;  %v2037_v50 = vld [vmem:[#allocation3 + $0x1388] sm:$0xff] }
 0x12f   : > { %1815 = vmatpush.msrb.mxu0 %v1529_v30  ;;  %1835 = vmatpush.msrb.mxu1 %v1530_v51  ;;  %v2038_v30 = vld [vmem:[#allocation3 + $0x1390] sm:$0xff]  ;;  %v2039_v51 = vld [vmem:[#allocation3 + $0x1398] sm:$0xff] }
 0x130   : > { %1855 = vmatpush.msrb.mxu2 %v1531_v52  ;;  %1875 = vmatpush.msrb.mxu3 %v1532_v53  ;;  %v2020_v52 = vld [vmem:[#allocation3 + $0x1300] sm:$0xff]  ;;  %v2021_v53 = vld [vmem:[#allocation3 + $0x1308] sm:$0xff] }
 0x131   : > { %1816 = vmatpush.msrb.mxu0 %v1513_v54  ;;  %1836 = vmatpush.msrb.mxu1 %v1514_v55  ;;  %v4952_v54 = vpop.f32.mrf.mxu2  ;;  %v4954_v55 = vpop.f32.mrf.mxu3 }
 0x132   : > { %1856 = vmatpush.msrb.mxu2 %v1515_v56  ;;  %1876 = vmatpush.msrb.mxu3 %v1516_v57  ;;  %v2022_v56 = vld [vmem:[#allocation3 + $0x1310] sm:$0xff]  ;;  %v2023_v57 = vld [vmem:[#allocation3 + $0x1318] sm:$0xff] }
 0x133   : > { %1817 = vmatpush.msrb.mxu0 %v1497_v58  ;;  %1837 = vmatpush.msrb.mxu1 %v1498_v59  ;;  %v4956_v58 = vpop.f32.mrf.mxu0  ;;  %v4958_v59 = vpop.f32.mrf.mxu1 }
 0x134   : > { %1857 = vmatpush.msrb.mxu2 %v1499_v60  ;;  %1877 = vmatpush.msrb.mxu3 %v1500_v61  ;;  %v2004_v60 = vld [vmem:[#allocation3 + $0x1280] sm:$0xff]  ;;  %v2005_v61 = vld [vmem:[#allocation3 + $0x1288] sm:$0xff] }
 0x135   : > { %1818 = vmatpush.msrb.mxu0 %v1481_v0  ;;  %1838 = vmatpush.msrb.mxu1 %v1482_v1  ;;  %v2006_v0 = vld [vmem:[#allocation3 + $0x1290] sm:$0xff]  ;;  %v2007_v1 = vld [vmem:[#allocation3 + $0x1298] sm:$0xff] }
 0x136   : > { %1858 = vmatpush.msrb.mxu2 %v1483_v2  ;;  %1878 = vmatpush.msrb.mxu3 %v1484_v3  ;;  %v1988_v2 = vld [vmem:[#allocation3 + $0x1200] sm:$0xff]  ;;  %v1989_v3 = vld [vmem:[#allocation3 + $0x1208] sm:$0xff] }
 0x137   : > { %1819 = vmatpush.msrb.mxu0 %v1465_v4  ;;  %1839 = vmatpush.msrb.mxu1 %v1466_v5  ;;  %v1990_v4 = vld [vmem:[#allocation3 + $0x1210] sm:$0xff]  ;;  %v1991_v5 = vld [vmem:[#allocation3 + $0x1218] sm:$0xff] }
 0x138   : > { %1859 = vmatpush.msrb.mxu2 %v1467_v6  ;;  %1879 = vmatpush.msrb.mxu3 %v1468_v7  ;;  %v1972_v6 = vld [vmem:[#allocation3 + $0x1180] sm:$0xff]  ;;  %v1973_v7 = vld [vmem:[#allocation3 + $0x1188] sm:$0xff] }
 0x139   : > { %1820 = vmatpush.msrb.mxu0 %v1449_v8  ;;  %1840 = vmatpush.msrb.mxu1 %v1450_v9  ;;  %v1974_v8 = vld [vmem:[#allocation3 + $0x1190] sm:$0xff]  ;;  %v1975_v9 = vld [vmem:[#allocation3 + $0x1198] sm:$0xff] }
 0x13a   : > { %1860 = vmatpush.msrb.mxu2 %v1451_v10  ;;  %1880 = vmatpush.msrb.mxu3 %v1452_v11  ;;  %v1956_v10 = vld [vmem:[#allocation3 + $0x1100] sm:$0xff]  ;;  %v1957_v11 = vld [vmem:[#allocation3 + $0x1108] sm:$0xff] }
 0x13b   : > { %1821 = vmatpush.msrb.mxu0 %v1433_v12  ;;  %1841 = vmatpush.msrb.mxu1 %v1434_v13  ;;  %v4960_v12 = vpop.f32.mrf.mxu2  ;;  %v4962_v13 = vpop.f32.mrf.mxu3 }
 0x13c   : > { %1861 = vmatpush.msrb.mxu2 %v1435_v14  ;;  %1881 = vmatpush.msrb.mxu3 %v1436_v15  ;;  %v1958_v14 = vld [vmem:[#allocation3 + $0x1110] sm:$0xff]  ;;  %v1959_v15 = vld [vmem:[#allocation3 + $0x1118] sm:$0xff] }
 0x13d   : > { %1822 = vmatpush.msrb.mxu0 %v1417_v19  ;;  %1842 = vmatpush.msrb.mxu1 %v1418_v20  ;;  %v1940_v19 = vld [vmem:[#allocation3 + $0x1080] sm:$0xff]  ;;  %v1941_v20 = vld [vmem:[#allocation3 + $0x1088] sm:$0xff] }
 0x13e   : > { %1862 = vmatpush.msrb.mxu2 %v1419_v23  ;;  %1882 = vmatpush.msrb.mxu3 %v1420_v25  ;;  %v1942_v23 = vld [vmem:[#allocation3 + $0x1090] sm:$0xff]  ;;  %v1943_v25 = vld [vmem:[#allocation3 + $0x1098] sm:$0xff] }
 0x13f   : > { %1823 = vmatpush.msrb.mxu0 %v1401_v26  ;;  %1843 = vmatpush.msrb.mxu1 %v1402_v27  ;;  %v4964_v26 = vpop.f32.mrf.mxu0  ;;  %v4966_v27 = vpop.f32.mrf.mxu1 }
 0x140   : > { %1863 = vmatpush.msrb.mxu2 %v1403_v28  ;;  %1883 = vmatpush.msrb.mxu3 %v1404_v24  ;;  %v4969_v28 = vld [vmem:[%s4825_s7 + $0x3] sm:$0xff] }
 0x141   : > { %4350 = vmatmul.msk.f32.vlgmr.msrb.gmra.mxu0 %vm462_vm0, %v4898_v16  ;;  %4351 = vmatmul.msk.f32.vlgmr.msrb.gmra.mxu1 %vm462_vm0, %v4898_v16  ;;  %v2104_v24 = vld [vmem:[#allocation3 + $0x15a0] sm:$0xff] }
 0x142   : > { %4352 = vmatmul.msk.f32.vlgmr.msrb.gmra.mxu2 %vm462_vm0, %v4898_v16  ;;  %4353 = vmatmul.msk.f32.vlgmr.msrb.gmra.mxu3 %vm462_vm0, %v4898_v16  ;;  %v2052_v16 = vld [vmem:[#allocation3 + $0x1400] sm:$0xff] }
 0x143   : > { %2124 = vmatpush.msra.mxu0 %v2100_v29  ;;  %2144 = vmatpush.msra.mxu1 %v2101_v31  ;;  %v2105_v29 = vld [vmem:[#allocation3 + $0x15a8] sm:$0xff]  ;;  %v2106_v31 = vld [vmem:[#allocation3 + $0x15b0] sm:$0xff] }
 0x144   : > { %2164 = vmatpush.msra.mxu2 %v2102_v32  ;;  %2184 = vmatpush.msra.mxu3 %v2103_v33  ;;  %v2107_v32 = vld [vmem:[#allocation3 + $0x15b8] sm:$0xff]  ;;  %v2088_v33 = vld [vmem:[#allocation3 + $0x1520] sm:$0xff] }
 0x145   : > { %2125 = vmatpush.msra.mxu0 %v2084_v36  ;;  %2145 = vmatpush.msra.mxu1 %v2085_v37  ;;  %v2089_v36 = vld [vmem:[#allocation3 + $0x1528] sm:$0xff]  ;;  %v2090_v37 = vld [vmem:[#allocation3 + $0x1530] sm:$0xff] }
 0x146   : > { %2165 = vmatpush.msra.mxu2 %v2086_v40  ;;  %2185 = vmatpush.msra.mxu3 %v2087_v41  ;;  %v2091_v40 = vld [vmem:[#allocation3 + $0x1538] sm:$0xff]  ;;  %v2072_v41 = vld [vmem:[#allocation3 + $0x14a0] sm:$0xff] }
 0x147   : > { %2126 = vmatpush.msra.mxu0 %v2068_v42  ;;  %2146 = vmatpush.msra.mxu1 %v2069_v43  ;;  %v2073_v42 = vld [vmem:[#allocation3 + $0x14a8] sm:$0xff]  ;;  %v4979_v43 = vpop.f32.mrf.mxu2 }
 0x148   : > { %2166 = vmatpush.msra.mxu2 %v2070_v44  ;;  %2186 = vmatpush.msra.mxu3 %v2071_v45  ;;  %v4981_v44 = vpop.f32.mrf.mxu3  ;;  %v2074_v45 = vld [vmem:[#allocation3 + $0x14b0] sm:$0xff] }
 0x149   : > { %2127 = vmatpush.msra.mxu0 %v2052_v16  ;;  %2147 = vmatpush.msra.mxu1 %v2053_v46  ;;  %v2075_v16 = vld [vmem:[#allocation3 + $0x14b8] sm:$0xff]  ;;  %v4983_v46 = vpop.f32.mrf.mxu0 }
 0x14a   : > { %2167 = vmatpush.msra.mxu2 %v2054_v47  ;;  %2187 = vmatpush.msra.mxu3 %v2055_v48  ;;  %v4985_v47 = vpop.f32.mrf.mxu1  ;;  %v2056_v48 = vld [vmem:[#allocation3 + $0x1420] sm:$0xff] }
 0x14b   : > { %2128 = vmatpush.msra.mxu0 %v2036_v49  ;;  %2148 = vmatpush.msra.mxu1 %v2037_v50  ;;  %v2057_v49 = vld [vmem:[#allocation3 + $0x1428] sm:$0xff]  ;;  %v2058_v50 = vld [vmem:[#allocation3 + $0x1430] sm:$0xff] }
 0x14c   : > { %2168 = vmatpush.msra.mxu2 %v2038_v30  ;;  %2188 = vmatpush.msra.mxu3 %v2039_v51  ;;  %v2059_v30 = vld [vmem:[#allocation3 + $0x1438] sm:$0xff]  ;;  %v2040_v51 = vld [vmem:[#allocation3 + $0x13a0] sm:$0xff] }
 0x14d   : > { %2129 = vmatpush.msra.mxu0 %v2020_v52  ;;  %2149 = vmatpush.msra.mxu1 %v2021_v53  ;;  %v2041_v52 = vld [vmem:[#allocation3 + $0x13a8] sm:$0xff]  ;;  %v2042_v53 = vld [vmem:[#allocation3 + $0x13b0] sm:$0xff] }
 0x14e   : > { %2169 = vmatpush.msra.mxu2 %v2022_v56  ;;  %2189 = vmatpush.msra.mxu3 %v2023_v57  ;;  %v2043_v56 = vld [vmem:[#allocation3 + $0x13b8] sm:$0xff]  ;;  %v2024_v57 = vld [vmem:[#allocation3 + $0x1320] sm:$0xff] }
 0x14f   : > { %2130 = vmatpush.msra.mxu0 %v2004_v60  ;;  %2150 = vmatpush.msra.mxu1 %v2005_v61  ;;  %v2025_v60 = vld [vmem:[#allocation3 + $0x1328] sm:$0xff]  ;;  %v2026_v61 = vld [vmem:[#allocation3 + $0x1330] sm:$0xff] }
 0x150   : > { %2170 = vmatpush.msra.mxu2 %v2006_v0  ;;  %2190 = vmatpush.msra.mxu3 %v2007_v1  ;;  %v2027_v0 = vld [vmem:[#allocation3 + $0x1338] sm:$0xff]  ;;  %v2008_v1 = vld [vmem:[#allocation3 + $0x12a0] sm:$0xff] }
 0x151   : > { %2131 = vmatpush.msra.mxu0 %v1988_v2  ;;  %2151 = vmatpush.msra.mxu1 %v1989_v3  ;;  %v2009_v2 = vld [vmem:[#allocation3 + $0x12a8] sm:$0xff]  ;;  %v4987_v3 = vpop.f32.mrf.mxu2 }
 0x152   : > { %2171 = vmatpush.msra.mxu2 %v1990_v4  ;;  %2191 = vmatpush.msra.mxu3 %v1991_v5  ;;  %v4989_v4 = vpop.f32.mrf.mxu3  ;;  %v2010_v5 = vld [vmem:[#allocation3 + $0x12b0] sm:$0xff] }
 0x153   : > { %2132 = vmatpush.msra.mxu0 %v1972_v6  ;;  %2152 = vmatpush.msra.mxu1 %v1973_v7  ;;  %v2011_v6 = vld [vmem:[#allocation3 + $0x12b8] sm:$0xff]  ;;  %v4991_v7 = vpop.f32.mrf.mxu0 }
 0x154   : > { %2172 = vmatpush.msra.mxu2 %v1974_v8  ;;  %2192 = vmatpush.msra.mxu3 %v1975_v9  ;;  %v4993_v8 = vpop.f32.mrf.mxu1  ;;  %v1992_v9 = vld [vmem:[#allocation3 + $0x1220] sm:$0xff] }
 0x155   : > { %2133 = vmatpush.msra.mxu0 %v1956_v10  ;;  %2153 = vmatpush.msra.mxu1 %v1957_v11  ;;  %v1993_v10 = vld [vmem:[#allocation3 + $0x1228] sm:$0xff]  ;;  %v1994_v11 = vld [vmem:[#allocation3 + $0x1230] sm:$0xff] }
 0x156   : > { %2173 = vmatpush.msra.mxu2 %v1958_v14  ;;  %2193 = vmatpush.msra.mxu3 %v1959_v15  ;;  %v1995_v14 = vld [vmem:[#allocation3 + $0x1238] sm:$0xff]  ;;  %v1976_v15 = vld [vmem:[#allocation3 + $0x11a0] sm:$0xff] }
 0x157   : > { %2134 = vmatpush.msra.mxu0 %v1940_v19  ;;  %2154 = vmatpush.msra.mxu1 %v1941_v20  ;;  %v1977_v19 = vld [vmem:[#allocation3 + $0x11a8] sm:$0xff]  ;;  %v1978_v20 = vld [vmem:[#allocation3 + $0x11b0] sm:$0xff] }
 0x158   : > { %2174 = vmatpush.msra.mxu2 %v1942_v23  ;;  %2194 = vmatpush.msra.mxu3 %v1943_v25  ;;  %v1979_v23 = vld [vmem:[#allocation3 + $0x11b8] sm:$0xff]  ;;  %v1960_v25 = vld [vmem:[#allocation3 + $0x1120] sm:$0xff] }
 0x159   : > { %4356 = vmatmul.msk.f32.vlgmr.msra.gmra.mxu0 %vm462_vm0, %v4969_v28  ;;  %4357 = vmatmul.msk.f32.vlgmr.msra.gmra.mxu1 %vm462_vm0, %v4969_v28 }
 0x15a   : > { %4358 = vmatmul.msk.f32.vlgmr.msra.gmra.mxu2 %vm462_vm0, %v4969_v28  ;;  %4359 = vmatmul.msk.f32.vlgmr.msra.gmra.mxu3 %vm462_vm0, %v4969_v28 }
 0x15b   : > { %2204 = vmatpush.msrb.mxu0 %v2104_v24  ;;  %2224 = vmatpush.msrb.mxu1 %v2105_v29  ;;  %v1961_v24 = vld [vmem:[#allocation3 + $0x1128] sm:$0xff]  ;;  %v1962_v29 = vld [vmem:[#allocation3 + $0x1130] sm:$0xff] }
 0x15c   : > { %2244 = vmatpush.msrb.mxu2 %v2106_v31  ;;  %2264 = vmatpush.msrb.mxu3 %v2107_v32  ;;  %v1963_v31 = vld [vmem:[#allocation3 + $0x1138] sm:$0xff]  ;;  %v4995_v32 = vld [vmem:[#allocation6] sm:$0xff] }
 0x15d   : > { %2205 = vmatpush.msrb.mxu0 %v2088_v33  ;;  %2225 = vmatpush.msrb.mxu1 %v2089_v36  ;;  %v1944_v33 = vld [vmem:[#allocation3 + $0x10a0] sm:$0xff]  ;;  %v1945_v36 = vld [vmem:[#allocation3 + $0x10a8] sm:$0xff] }
 0x15e   : > { %2245 = vmatpush.msrb.mxu2 %v2090_v37  ;;  %2265 = vmatpush.msrb.mxu3 %v2091_v40  ;;  %v4997_v37 = vpop.f32.mrf.mxu2  ;;  %v4999_v40 = vpop.f32.mrf.mxu3 }
 0x15f   : > { %2206 = vmatpush.msrb.mxu0 %v2072_v41  ;;  %2226 = vmatpush.msrb.mxu1 %v2073_v42  ;;  %v1946_v41 = vld [vmem:[#allocation3 + $0x10b0] sm:$0xff]  ;;  %v1947_v42 = vld [vmem:[#allocation3 + $0x10b8] sm:$0xff] }
 0x160   : > { %2246 = vmatpush.msrb.mxu2 %v2074_v45  ;;  %2266 = vmatpush.msrb.mxu3 %v2075_v16  ;;  %v5001_v45 = vpop.f32.mrf.mxu0  ;;  %v5003_v16 = vpop.f32.mrf.mxu1 }
 0x161   : > { %2207 = vmatpush.msrb.mxu0 %v2056_v48  ;;  %2227 = vmatpush.msrb.mxu1 %v2057_v49  ;;  %v220_v48 = vperm.slane %v4995_v32, 0  ;;  %v221_v49 = vperm.slane %v4995_v32, 1 }
 0x162   : > { %2247 = vmatpush.msrb.mxu2 %v2058_v50  ;;  %2267 = vmatpush.msrb.mxu3 %v2059_v30  ;;  %v2108_v50 = vld [vmem:[#allocation3 + $0x15c0] sm:$0xff]  ;;  %v2109_v30 = vld [vmem:[#allocation3 + $0x15c8] sm:$0xff] }
 0x163   : > { %2208 = vmatpush.msrb.mxu0 %v2040_v51  ;;  %2228 = vmatpush.msrb.mxu1 %v2041_v52  ;;  %v2110_v51 = vld [vmem:[#allocation3 + $0x15d0] sm:$0xff]  ;;  %v2111_v52 = vld [vmem:[#allocation3 + $0x15d8] sm:$0xff] }
 0x164   : > { %2248 = vmatpush.msrb.mxu2 %v2042_v53  ;;  %2268 = vmatpush.msrb.mxu3 %v2043_v56  ;;  %v2092_v53 = vld [vmem:[#allocation3 + $0x1540] sm:$0xff]  ;;  %v2093_v56 = vld [vmem:[#allocation3 + $0x1548] sm:$0xff] }
 0x165   : > { %2209 = vmatpush.msrb.mxu0 %v2024_v57  ;;  %2229 = vmatpush.msrb.mxu1 %v2025_v60  ;;  %v786_v57 = vadd.f32 %v4924_v62, %v220_v48  ;;  %v787_v60 = vadd.f32 %v4926_v63, %v221_v49  ;;  %v222_v63 = vperm.slane %v4995_v32, 2  ;;  %v2028_v48 = vld [vmem:[#allocation3 + $0x1340] sm:$0xff]  ;;  %v2029_v49 = vld [vmem:[#allocation3 + $0x1348] sm:$0xff] }
 0x166   : > { %2249 = vmatpush.msrb.mxu2 %v2026_v61  ;;  %2269 = vmatpush.msrb.mxu3 %v2027_v0  ;;  %v2094_v61 = vld [vmem:[#allocation3 + $0x1550] sm:$0xff]  ;;  %v2095_v0 = vld [vmem:[#allocation3 + $0x1558] sm:$0xff]  ;;  %v5021_v62 = vpop.f32.mrf.mxu3 }
 0x167   : > { %2210 = vmatpush.msrb.mxu0 %v2008_v1  ;;  %2230 = vmatpush.msrb.mxu1 %v2009_v2  ;;  %v2076_v1 = vld [vmem:[#allocation3 + $0x14c0] sm:$0xff]  ;;  %v2077_v2 = vld [vmem:[#allocation3 + $0x14c8] sm:$0xff] }
 0x168   : > { %2250 = vmatpush.msrb.mxu2 %v2010_v5  ;;  %2270 = vmatpush.msrb.mxu3 %v2011_v6  ;;  %v1337_v5 = vadd.f32 %v4964_v26, %v786_v57  ;;  %v1338_v6 = vadd.f32 %v4966_v27, %v787_v60  ;;  %v2062_v27 = vld [vmem:[#allocation3 + $0x1450] sm:$0xff] }
 0x169   : > { %2211 = vmatpush.msrb.mxu0 %v1992_v9  ;;  %2231 = vmatpush.msrb.mxu1 %v1993_v10  ;;  %v2078_v9 = vld [vmem:[#allocation3 + $0x14d0] sm:$0xff]  ;;  %v2079_v10 = vld [vmem:[#allocation3 + $0x14d8] sm:$0xff] }
 0x16a   : > { %2251 = vmatpush.msrb.mxu2 %v1994_v11  ;;  %2271 = vmatpush.msrb.mxu3 %v1995_v14  ;;  %v5019_v11 = vpop.f32.mrf.mxu2  ;;  %v223_v14 = vperm.slane %v4995_v32, 3 }
 0x16b   : > { %2212 = vmatpush.msrb.mxu0 %v1976_v15  ;;  %2232 = vmatpush.msrb.mxu1 %v1977_v19  ;;  %v2060_v15 = vld [vmem:[#allocation3 + $0x1440] sm:$0xff]  ;;  %v2061_v19 = vld [vmem:[#allocation3 + $0x1448] sm:$0xff] }
 0x16c   : > { %2252 = vmatpush.msrb.mxu2 %v1978_v20  ;;  %2272 = vmatpush.msrb.mxu3 %v1979_v23  ;;  %v2063_v23 = vld [vmem:[#allocation3 + $0x1458] sm:$0xff] }
 0x16d   : > { %2213 = vmatpush.msrb.mxu0 %v1960_v25  ;;  %2233 = vmatpush.msrb.mxu1 %v1961_v24 }
 0x16e   : > { %2253 = vmatpush.msrb.mxu2 %v1962_v29  ;;  %2273 = vmatpush.msrb.mxu3 %v1963_v31  ;;  %v2044_v29 = vld [vmem:[#allocation3 + $0x13c0] sm:$0xff]  ;;  %v2045_v31 = vld [vmem:[#allocation3 + $0x13c8] sm:$0xff] }
 0x16f   : > { %2214 = vmatpush.msrb.mxu0 %v1944_v33  ;;  %2234 = vmatpush.msrb.mxu1 %v1945_v36  ;;  %v2046_v33 = vld [vmem:[#allocation3 + $0x13d0] sm:$0xff]  ;;  %v2047_v36 = vld [vmem:[#allocation3 + $0x13d8] sm:$0xff] }
 0x170   : > { %2254 = vmatpush.msrb.mxu2 %v1946_v41  ;;  %2274 = vmatpush.msrb.mxu3 %v1947_v42  ;;  %v788_v41 = vadd.f32 %v4932_v21, %v222_v63  ;;  %v789_v42 = vadd.f32 %v4934_v22, %v223_v14  ;;  %v2014_v21 = vld [vmem:[#allocation3 + $0x12d0] sm:$0xff]  ;;  %v2015_v22 = vld [vmem:[#allocation3 + $0x12d8] sm:$0xff]  ;;  %v1964_v63 = vld [vmem:[#allocation3 + $0x1140] sm:$0xff] }
 0x171   : > { %4360 = vmatmul.msk.f32.vlgmr.msrb.gmra.mxu0 %vm462_vm0, %v4969_v28  ;;  %4361 = vmatmul.msk.f32.vlgmr.msrb.gmra.mxu1 %vm462_vm0, %v4969_v28  ;;  %v1965_v14 = vld [vmem:[#allocation3 + $0x1148] sm:$0xff] }
 0x172   : > { %4362 = vmatmul.msk.f32.vlgmr.msrb.gmra.mxu2 %vm462_vm0, %v4969_v28  ;;  %4363 = vmatmul.msk.f32.vlgmr.msrb.gmra.mxu3 %vm462_vm0, %v4969_v28 }
 0x173   : > { %2284 = vmatpush.msra.mxu0 %v2108_v50  ;;  %2304 = vmatpush.msra.mxu1 %v2109_v30  ;;  %v2030_v50 = vld [vmem:[#allocation3 + $0x1350] sm:$0xff]  ;;  %v2031_v30 = vld [vmem:[#allocation3 + $0x1358] sm:$0xff] }
 0x174   : > { %2324 = vmatpush.msra.mxu2 %v2110_v51  ;;  %2344 = vmatpush.msra.mxu3 %v2111_v52  ;;  %v1339_v51 = vadd.f32 %v4979_v43, %v788_v41  ;;  %v1340_v52 = vadd.f32 %v4981_v44, %v789_v42  ;;  %v1998_v43 = vld [vmem:[#allocation3 + $0x1250] sm:$0xff]  ;;  %v1999_v44 = vld [vmem:[#allocation3 + $0x1258] sm:$0xff] }
 0x175   : > { %2285 = vmatpush.msra.mxu0 %v2092_v53  ;;  %2305 = vmatpush.msra.mxu1 %v2093_v56  ;;  %v2012_v53 = vld [vmem:[#allocation3 + $0x12c0] sm:$0xff]  ;;  %v2013_v56 = vld [vmem:[#allocation3 + $0x12c8] sm:$0xff]  ;;  %v2114_v41 = vld [vmem:[#allocation3 + $0x15f0] sm:$0xff] }
 0x176   : > { %2325 = vmatpush.msra.mxu2 %v2094_v61  ;;  %2345 = vmatpush.msra.mxu3 %v2095_v0  ;;  %v1585_v20 = vpop.f32.mrf.mxu0  ;;  %v1605_v26 = vpop.f32.mrf.mxu1  ;;  %v1996_v61 = vld [vmem:[#allocation3 + $0x1240] sm:$0xff]  ;;  %v1997_v0 = vld [vmem:[#allocation3 + $0x1248] sm:$0xff]  ;;  %v2115_v42 = vld [vmem:[#allocation3 + $0x15f8] sm:$0xff] }
 0x177   : > { %2286 = vmatpush.msra.mxu0 %v2076_v1  ;;  %2306 = vmatpush.msra.mxu1 %v2077_v2  ;;  %v5025_v25 = vadd.f32 %v1585_v20, %v1337_v5  ;;  %v5027_v24 = vadd.f32 %v1605_v26, %v1338_v6  ;;  %v1980_v5 = vld [vmem:[#allocation3 + $0x11c0] sm:$0xff]  ;;  %v1981_v6 = vld [vmem:[#allocation3 + $0x11c8] sm:$0xff] }
 0x178   : > { %2326 = vmatpush.msra.mxu2 %v2078_v9  ;;  %2346 = vmatpush.msra.mxu3 %v2079_v10  ;;  %v1982_v9 = vld [vmem:[#allocation3 + $0x11d0] sm:$0xff]  ;;  %v1983_v10 = vld [vmem:[#allocation3 + $0x11d8] sm:$0xff]  ;;  %v1948_v20 = vld [vmem:[#allocation3 + $0x10c0] sm:$0xff] }
 0x179   : > { %2287 = vmatpush.msra.mxu0 %v2060_v15  ;;  %2307 = vmatpush.msra.mxu1 %v2061_v19  ;;  %v1966_v15 = vld [vmem:[#allocation3 + $0x1150] sm:$0xff]  ;;  %v1967_v19 = vld [vmem:[#allocation3 + $0x1158] sm:$0xff]  ;;  %v1949_v26 = vld [vmem:[#allocation3 + $0x10c8] sm:$0xff] }
 0x17a   : > { %2327 = vmatpush.msra.mxu2 %v2062_v27  ;;  %2347 = vmatpush.msra.mxu3 %v2063_v23  ;;  %v1950_v27 = vld [vmem:[#allocation3 + $0x10d0] sm:$0xff]  ;;  %v1951_v23 = vld [vmem:[#allocation3 + $0x10d8] sm:$0xff] }
 0x17b   : > { %2288 = vmatpush.msra.mxu0 %v2044_v29  ;;  %2308 = vmatpush.msra.mxu1 %v2045_v31  ;;  %v224_v29 = vperm.slane %v4995_v32, 4  ;;  %v225_v31 = vperm.slane %v4995_v32, 5 }
 0x17c   : > { %2328 = vmatpush.msra.mxu2 %v2046_v33  ;;  %2348 = vmatpush.msra.mxu3 %v2047_v36  ;;  %v2112_v33 = vld [vmem:[#allocation3 + $0x15e0] sm:$0xff]  ;;  %v2113_v36 = vld [vmem:[#allocation3 + $0x15e8] sm:$0xff] }
 0x17d   : > { %2289 = vmatpush.msra.mxu0 %v2028_v48  ;;  %2309 = vmatpush.msra.mxu1 %v2029_v49  ;;  %v1625_v57 = vpop.f32.mrf.mxu2  ;;  %v1645_v60 = vpop.f32.mrf.mxu3  ;;  %v2096_v48 = vld [vmem:[#allocation3 + $0x1560] sm:$0xff]  ;;  %v2097_v49 = vld [vmem:[#allocation3 + $0x1568] sm:$0xff] }
 0x17e   : > { %2329 = vmatpush.msra.mxu2 %v2030_v50  ;;  %2349 = vmatpush.msra.mxu3 %v2031_v30  ;;  %v5033_v1 = vadd.f32 %v1625_v57, %v1339_v51  ;;  %v5035_v2 = vadd.f32 %v1645_v60, %v1340_v52  ;;  %v790_v50 = vadd.f32 %v4928_v17, %v224_v29  ;;  %v2098_v51 = vld [vmem:[#allocation3 + $0x1570] sm:$0xff]  ;;  %v2099_v52 = vld [vmem:[#allocation3 + $0x1578] sm:$0xff]  ;;  %v226_v17 = vperm.slane %v4995_v32, 6 }
 0x17f   : > { %2290 = vmatpush.msra.mxu0 %v2012_v53  ;;  %2310 = vmatpush.msra.mxu1 %v2013_v56  ;;  %v791_v30 = vadd.f32 %v4930_v18, %v225_v31  ;;  %v2080_v53 = vld [vmem:[#allocation3 + $0x14e0] sm:$0xff]  ;;  %v2081_v56 = vld [vmem:[#allocation3 + $0x14e8] sm:$0xff]  ;;  %v2082_v57 = vld [vmem:[#allocation3 + $0x14f0] sm:$0xff]  ;;  %v227_v18 = vperm.slane %v4995_v32, 7 }
 0x180   : > { %2330 = vmatpush.msra.mxu2 %v2014_v21  ;;  %2350 = vmatpush.msra.mxu3 %v2015_v22  ;;  %v1341_v21 = vadd.f32 %v4983_v46, %v790_v50  ;;  %v2083_v60 = vld [vmem:[#allocation3 + $0x14f8] sm:$0xff]  ;;  %v2050_v32 = vld [vmem:[#allocation3 + $0x13f0] sm:$0xff]  ;;  %v2016_v31 = vld [vmem:[#allocation3 + $0x12e0] sm:$0xff] }
 0x181   : > { %2291 = vmatpush.msra.mxu0 %v1996_v61  ;;  %2311 = vmatpush.msra.mxu1 %v1997_v0  ;;  %v1342_v22 = vadd.f32 %v4985_v47, %v791_v30  ;;  %v2064_v61 = vld [vmem:[#allocation3 + $0x1460] sm:$0xff]  ;;  %v2065_v0 = vld [vmem:[#allocation3 + $0x1468] sm:$0xff]  ;;  %v2067_v46 = vld [vmem:[#allocation3 + $0x1478] sm:$0xff] }
 0x182   : > { %2331 = vmatpush.msra.mxu2 %v1998_v43  ;;  %2351 = vmatpush.msra.mxu3 %v1999_v44  ;;  %v1984_v30 = vld [vmem:[#allocation3 + $0x11e0] sm:$0xff] }
 0x183   : > { %2292 = vmatpush.msra.mxu0 %v1980_v5  ;;  %2312 = vmatpush.msra.mxu1 %v1981_v6  ;;  %v2066_v5 = vld [vmem:[#allocation3 + $0x1470] sm:$0xff] }
 0x184   : > { %2332 = vmatpush.msra.mxu2 %v1982_v9  ;;  %2352 = vmatpush.msra.mxu3 %v1983_v10  ;;  %v2048_v9 = vld [vmem:[#allocation3 + $0x13e0] sm:$0xff]  ;;  %v2049_v10 = vld [vmem:[#allocation3 + $0x13e8] sm:$0xff] }
 0x185   : > { %2293 = vmatpush.msra.mxu0 %v1964_v63  ;;  %2313 = vmatpush.msra.mxu1 %v1965_v14  ;;  %v2051_v63 = vld [vmem:[#allocation3 + $0x13f8] sm:$0xff]  ;;  %v792_v14 = vadd.f32 %v4948_v38, %v226_v17  ;;  %v2018_v38 = vld [vmem:[#allocation3 + $0x12f0] sm:$0xff]  ;;  %v1952_v17 = vld [vmem:[#allocation3 + $0x10e0] sm:$0xff] }
 0x186   : > { %2333 = vmatpush.msra.mxu2 %v1966_v15  ;;  %2353 = vmatpush.msra.mxu3 %v1967_v19  ;;  %v793_v15 = vadd.f32 %v4950_v39, %v227_v18  ;;  %v2032_v19 = vld [vmem:[#allocation3 + $0x1360] sm:$0xff]  ;;  %v2019_v39 = vld [vmem:[#allocation3 + $0x12f8] sm:$0xff]  ;;  %v1953_v18 = vld [vmem:[#allocation3 + $0x10e8] sm:$0xff] }
 0x187   : > { %2294 = vmatpush.msra.mxu0 %v1948_v20  ;;  %2314 = vmatpush.msra.mxu1 %v1949_v26  ;;  %v2033_v20 = vld [vmem:[#allocation3 + $0x1368] sm:$0xff]  ;;  %v2034_v26 = vld [vmem:[#allocation3 + $0x1370] sm:$0xff] }
 0x188   : > { %2334 = vmatpush.msra.mxu2 %v1950_v27  ;;  %2354 = vmatpush.msra.mxu3 %v1951_v23  ;;  %v2035_v27 = vld [vmem:[#allocation3 + $0x1378] sm:$0xff]  ;;  %v1343_v23 = vadd.f32 %v4987_v3, %v792_v14  ;;  %v1344_v29 = vadd.f32 %v4989_v4, %v793_v15  ;;  %v2002_v3 = vld [vmem:[#allocation3 + $0x1270] sm:$0xff] }
 0x189   : > { %4364 = vmatmul.msk.f32.vlgmr.msra.gmra.mxu0 %vm462_vm0, %v4969_v28  ;;  %4365 = vmatmul.msk.f32.vlgmr.msra.gmra.mxu1 %vm462_vm0, %v4969_v28  ;;  %v2003_v4 = vld [vmem:[#allocation3 + $0x1278] sm:$0xff] }
 0x18a   : > { %4366 = vmatmul.msk.f32.vlgmr.msra.gmra.mxu2 %vm462_vm0, %v4969_v28  ;;  %4367 = vmatmul.msk.f32.vlgmr.msra.gmra.mxu3 %vm462_vm0, %v4969_v28 }
 0x18b   : > { %2364 = vmatpush.msrb.mxu0 %v2112_v33  ;;  %2384 = vmatpush.msrb.mxu1 %v2113_v36  ;;  %v2017_v33 = vld [vmem:[#allocation3 + $0x12e8] sm:$0xff] }
 0x18c   : > { %2404 = vmatpush.msrb.mxu2 %v2114_v41  ;;  %2424 = vmatpush.msrb.mxu3 %v2115_v42  ;;  %v2000_v42 = vld [vmem:[#allocation3 + $0x1260] sm:$0xff] }
 0x18d   : > { %2365 = vmatpush.msrb.mxu0 %v2096_v48  ;;  %2385 = vmatpush.msrb.mxu1 %v2097_v49  ;;  %v2001_v48 = vld [vmem:[#allocation3 + $0x1268] sm:$0xff] }
 0x18e   : > { %2405 = vmatpush.msrb.mxu2 %v2098_v51  ;;  %2425 = vmatpush.msrb.mxu3 %v2099_v52  ;;  %v1665_v43 = vpop.f32.mrf.mxu0  ;;  %v1685_v44 = vpop.f32.mrf.mxu1  ;;  %v1985_v51 = vld [vmem:[#allocation3 + $0x11e8] sm:$0xff]  ;;  %v1986_v52 = vld [vmem:[#allocation3 + $0x11f0] sm:$0xff] }
 0x18f   : > { %2366 = vmatpush.msrb.mxu0 %v2080_v53  ;;  %2386 = vmatpush.msrb.mxu1 %v2081_v56  ;;  %v5053_v6 = vadd.f32 %v1665_v43, %v1341_v21  ;;  %v5055_v47 = vadd.f32 %v1685_v44, %v1342_v22  ;;  %v1987_v53 = vld [vmem:[#allocation3 + $0x11f8] sm:$0xff]  ;;  %v1968_v56 = vld [vmem:[#allocation3 + $0x1160] sm:$0xff]  ;;  %v1969_v21 = vld [vmem:[#allocation3 + $0x1168] sm:$0xff] }
 0x190   : > { %2406 = vmatpush.msrb.mxu2 %v2082_v57  ;;  %2426 = vmatpush.msrb.mxu3 %v2083_v60  ;;  %v1970_v22 = vld [vmem:[#allocation3 + $0x1170] sm:$0xff]  ;;  %v1971_v57 = vld [vmem:[#allocation3 + $0x1178] sm:$0xff]  ;;  %v5065_v60 = vld [vmem:[#allocation6 + $0x8] sm:$0xff] }
 0x191   : > { %2367 = vmatpush.msrb.mxu0 %v2064_v61  ;;  %2387 = vmatpush.msrb.mxu1 %v2065_v0  ;;  %v1954_v61 = vld [vmem:[#allocation3 + $0x10f0] sm:$0xff]  ;;  %v1955_v0 = vld [vmem:[#allocation3 + $0x10f8] sm:$0xff]  ;;  %v228_v43 = vperm.slane %v5065_v60, 0  ;;  %v229_v44 = vperm.slane %v5065_v60, 1 }
 0x192   : > { %2407 = vmatpush.msrb.mxu2 %v2066_v5  ;;  %2427 = vmatpush.msrb.mxu3 %v2067_v46  ;;  %v2651_v5 = vld [vmem:[#allocation3 + $0x1b00] sm:$0xff]  ;;  %v2652_v46 = vld [vmem:[#allocation3 + $0x1b08] sm:$0xff] }
 0x193   : > { %2368 = vmatpush.msrb.mxu0 %v2048_v9  ;;  %2388 = vmatpush.msrb.mxu1 %v2049_v10  ;;  %v2653_v9 = vld [vmem:[#allocation3 + $0x1b10] sm:$0xff]  ;;  %v2654_v10 = vld [vmem:[#allocation3 + $0x1b18] sm:$0xff]  ;;  %v794_v14 = vadd.f32 %v4940_v34, %v228_v43  ;;  %v795_v15 = vadd.f32 %v4942_v35, %v229_v44  ;;  %v230_v34 = vperm.slane %v5065_v60, 2  ;;  %v231_v35 = vperm.slane %v5065_v60, 3  ;;  %v2539_v44 = vld [vmem:[#allocation3 + $0x1780] sm:$0xff] }
 0x194   : > { %2408 = vmatpush.msrb.mxu2 %v2050_v32  ;;  %2428 = vmatpush.msrb.mxu3 %v2051_v63  ;;  %v2635_v32 = vld [vmem:[#allocation3 + $0x1a80] sm:$0xff]  ;;  %v2636_v63 = vld [vmem:[#allocation3 + $0x1a88] sm:$0xff] }
 0x195   : > { %2369 = vmatpush.msrb.mxu0 %v2032_v19  ;;  %2389 = vmatpush.msrb.mxu1 %v2033_v20  ;;  %v1705_v36 = vpop.f32.mrf.mxu2  ;;  %v1725_v41 = vpop.f32.mrf.mxu3  ;;  %v2637_v19 = vld [vmem:[#allocation3 + $0x1a90] sm:$0xff]  ;;  %v2638_v20 = vld [vmem:[#allocation3 + $0x1a98] sm:$0xff] }
 0x196   : > { %2409 = vmatpush.msrb.mxu2 %v2034_v26  ;;  %2429 = vmatpush.msrb.mxu3 %v2035_v27  ;;  %v5061_v49 = vadd.f32 %v1705_v36, %v1343_v23  ;;  %v5063_v50 = vadd.f32 %v1725_v41, %v1344_v29  ;;  %v2619_v26 = vld [vmem:[#allocation3 + $0x1a00] sm:$0xff]  ;;  %v2620_v27 = vld [vmem:[#allocation3 + $0x1a08] sm:$0xff]  ;;  %v1345_v23 = vadd.f32 %v4991_v7, %v794_v14  ;;  %v2605_v41 = vld [vmem:[#allocation3 + $0x1990] sm:$0xff] }
 0x197   : > { %2370 = vmatpush.msrb.mxu0 %v2016_v31  ;;  %2390 = vmatpush.msrb.mxu1 %v2017_v33  ;;  %v1346_v29 = vadd.f32 %v4993_v8, %v795_v15  ;;  %v2622_v31 = vld [vmem:[#allocation3 + $0x1a18] sm:$0xff]  ;;  %v2603_v33 = vld [vmem:[#allocation3 + $0x1980] sm:$0xff] }
 0x198   : > { %2410 = vmatpush.msrb.mxu2 %v2018_v38  ;;  %2430 = vmatpush.msrb.mxu3 %v2019_v39  ;;  %v2604_v38 = vld [vmem:[#allocation3 + $0x1988] sm:$0xff]  ;;  %v2606_v7 = vld [vmem:[#allocation3 + $0x1998] sm:$0xff]  ;;  %v2507_v15 = vld [vmem:[#allocation3 + $0x1680] sm:$0xff] }
 0x199   : > { %2371 = vmatpush.msrb.mxu0 %v2000_v42  ;;  %2391 = vmatpush.msrb.mxu1 %v2001_v48  ;;  %v2587_v48 = vld [vmem:[#allocation3 + $0x1900] sm:$0xff]  ;;  %v2526_v14 = vld [vmem:[#allocation3 + $0x1718] sm:$0xff] }
 0x19a   : > { %2411 = vmatpush.msrb.mxu2 %v2002_v3  ;;  %2431 = vmatpush.msrb.mxu3 %v2003_v4  ;;  %v2588_v3 = vld [vmem:[#allocation3 + $0x1908] sm:$0xff]  ;;  %v2589_v4 = vld [vmem:[#allocation3 + $0x1910] sm:$0xff] }
 0x19b   : > { %2372 = vmatpush.msrb.mxu0 %v1984_v30  ;;  %2392 = vmatpush.msrb.mxu1 %v1985_v51  ;;  %v2590_v30 = vld [vmem:[#allocation3 + $0x1918] sm:$0xff]  ;;  %v796_v51 = vadd.f32 %v4952_v54, %v230_v34  ;;  %v2557_v54 = vld [vmem:[#allocation3 + $0x1810] sm:$0xff]  ;;  %v232_v34 = vperm.slane %v5065_v60, 4 }
 0x19c   : > { %2412 = vmatpush.msrb.mxu2 %v1986_v52  ;;  %2432 = vmatpush.msrb.mxu3 %v1987_v53  ;;  %v797_v52 = vadd.f32 %v4954_v55, %v231_v35  ;;  %v2571_v53 = vld [vmem:[#allocation3 + $0x1880] sm:$0xff]  ;;  %v2558_v55 = vld [vmem:[#allocation3 + $0x1818] sm:$0xff]  ;;  %v233_v35 = vperm.slane %v5065_v60, 5 }
 0x19d   : > { %2373 = vmatpush.msrb.mxu0 %v1968_v56  ;;  %2393 = vmatpush.msrb.mxu1 %v1969_v21  ;;  %v2572_v56 = vld [vmem:[#allocation3 + $0x1888] sm:$0xff]  ;;  %v2573_v21 = vld [vmem:[#allocation3 + $0x1890] sm:$0xff] }
 0x19e   : > { %2413 = vmatpush.msrb.mxu2 %v1970_v22  ;;  %2433 = vmatpush.msrb.mxu3 %v1971_v57  ;;  %v2574_v22 = vld [vmem:[#allocation3 + $0x1898] sm:$0xff]  ;;  %v1347_v57 = vadd.f32 %v4997_v37, %v796_v51  ;;  %v2541_v37 = vld [vmem:[#allocation3 + $0x1790] sm:$0xff]  ;;  %v2623_v51 = vld [vmem:[#allocation3 + $0x1a20] sm:$0xff] }
 0x19f   : > { %2374 = vmatpush.msrb.mxu0 %v1952_v17  ;;  %2394 = vmatpush.msrb.mxu1 %v1953_v18  ;;  %v1348_v17 = vadd.f32 %v4999_v40, %v797_v52  ;;  %v2555_v18 = vld [vmem:[#allocation3 + $0x1800] sm:$0xff]  ;;  %v2542_v40 = vld [vmem:[#allocation3 + $0x1798] sm:$0xff]  ;;  %v2624_v52 = vld [vmem:[#allocation3 + $0x1a28] sm:$0xff] }
 0x1a0   : > { %2414 = vmatpush.msrb.mxu2 %v1954_v61  ;;  %2434 = vmatpush.msrb.mxu3 %v1955_v0  ;;  %v2556_v61 = vld [vmem:[#allocation3 + $0x1808] sm:$0xff] }
 0x1a1   : > { %4368 = vmatmul.msk.f32.vlgmr.msrb.gmra.mxu0 %vm462_vm0, %v4969_v28  ;;  %4369 = vmatmul.msk.f32.vlgmr.msrb.gmra.mxu1 %vm462_vm0, %v4969_v28 }
 0x1a2   : > { %4370 = vmatmul.msk.f32.vlgmr.msrb.gmra.mxu2 %vm462_vm0, %v4969_v28  ;;  %4371 = vmatmul.msk.f32.vlgmr.msrb.gmra.mxu3 %vm462_vm0, %v4969_v28  ;;  %v2621_v28 = vld [vmem:[#allocation3 + $0x1a10] sm:$0xff] }
 0x1a3   : > { %2675 = vmatpush.msra.mxu0 %v2651_v5  ;;  %2695 = vmatpush.msra.mxu1 %v2652_v46  ;;  %v2540_v5 = vld [vmem:[#allocation3 + $0x1788] sm:$0xff] }
 0x1a4   : > { %2715 = vmatpush.msra.mxu2 %v2653_v9  ;;  %2735 = vmatpush.msra.mxu3 %v2654_v10  ;;  %v2523_v10 = vld [vmem:[#allocation3 + $0x1700] sm:$0xff] }
 0x1a5   : > { %2676 = vmatpush.msra.mxu0 %v2635_v32  ;;  %2696 = vmatpush.msra.mxu1 %v2636_v63  ;;  %v2524_v32 = vld [vmem:[#allocation3 + $0x1708] sm:$0xff]  ;;  %v2525_v63 = vld [vmem:[#allocation3 + $0x1710] sm:$0xff] }
 0x1a6   : > { %2716 = vmatpush.msra.mxu2 %v2637_v19  ;;  %2736 = vmatpush.msra.mxu3 %v2638_v20  ;;  %v1745_v39 = vpop.f32.mrf.mxu0  ;;  %v1765_v36 = vpop.f32.mrf.mxu1  ;;  %v2508_v19 = vld [vmem:[#allocation3 + $0x1688] sm:$0xff]  ;;  %v2509_v20 = vld [vmem:[#allocation3 + $0x1690] sm:$0xff] }
 0x1a7   : > { %2677 = vmatpush.msra.mxu0 %v2619_v26  ;;  %2697 = vmatpush.msra.mxu1 %v2620_v27  ;;  %v5083_v42 = vadd.f32 %v1745_v39, %v1345_v23  ;;  %v5085_v8 = vadd.f32 %v1765_v36, %v1346_v29  ;;  %v2510_v26 = vld [vmem:[#allocation3 + $0x1698] sm:$0xff]  ;;  %v2491_v27 = vld [vmem:[#allocation3 + $0x1600] sm:$0xff]  ;;  %v2492_v23 = vld [vmem:[#allocation3 + $0x1608] sm:$0xff] }
 0x1a8   : > { %2717 = vmatpush.msra.mxu2 %v2621_v28  ;;  %2737 = vmatpush.msra.mxu3 %v2622_v31  ;;  %v2493_v29 = vld [vmem:[#allocation3 + $0x1610] sm:$0xff]  ;;  %v2494_v28 = vld [vmem:[#allocation3 + $0x1618] sm:$0xff]  ;;  %v5096_v31 = vld [vmem:[%s4825_s7 + $0x4] sm:$0xff] }
 0x1a9   : > { %2678 = vmatpush.msra.mxu0 %v2603_v33  ;;  %2698 = vmatpush.msra.mxu1 %v2604_v38  ;;  %v2655_v33 = vld [vmem:[#allocation3 + $0x1b20] sm:$0xff]  ;;  %v2656_v38 = vld [vmem:[#allocation3 + $0x1b28] sm:$0xff]  ;;  %v2657_v39 = vld [vmem:[#allocation3 + $0x1b30] sm:$0xff] }
 0x1aa   : > { %2718 = vmatpush.msra.mxu2 %v2605_v41  ;;  %2738 = vmatpush.msra.mxu3 %v2606_v7  ;;  %v2658_v36 = vld [vmem:[#allocation3 + $0x1b38] sm:$0xff]  ;;  %v2639_v41 = vld [vmem:[#allocation3 + $0x1aa0] sm:$0xff]  ;;  %v2640_v7 = vld [vmem:[#allocation3 + $0x1aa8] sm:$0xff] }
 0x1ab   : > { %2679 = vmatpush.msra.mxu0 %v2587_v48  ;;  %2699 = vmatpush.msra.mxu1 %v2588_v3  ;;  %v798_v48 = vadd.f32 %v4956_v58, %v232_v34  ;;  %v799_v3 = vadd.f32 %v4958_v59, %v233_v35  ;;  %v234_v58 = vperm.slane %v5065_v60, 6  ;;  %v235_v59 = vperm.slane %v5065_v60, 7  ;;  %v2593_v60 = vld [vmem:[#allocation3 + $0x1930] sm:$0xff]  ;;  %v2527_v35 = vld [vmem:[#allocation3 + $0x1720] sm:$0xff] }
 0x1ac   : > { %2719 = vmatpush.msra.mxu2 %v2589_v4  ;;  %2739 = vmatpush.msra.mxu3 %v2590_v30  ;;  %v2641_v4 = vld [vmem:[#allocation3 + $0x1ab0] sm:$0xff]  ;;  %v2642_v30 = vld [vmem:[#allocation3 + $0x1ab8] sm:$0xff] }
 0x1ad   : > { %2680 = vmatpush.msra.mxu0 %v2571_v53  ;;  %2700 = vmatpush.msra.mxu1 %v2572_v56  ;;  %v1785_v0 = vpop.f32.mrf.mxu2  ;;  %v1805_v43 = vpop.f32.mrf.mxu3  ;;  %v1349_v53 = vadd.f32 %v5001_v45, %v798_v48  ;;  %v1350_v56 = vadd.f32 %v5003_v16, %v799_v3  ;;  %v2610_v45 = vld [vmem:[#allocation3 + $0x19b8] sm:$0xff]  ;;  %v2495_v3 = vld [vmem:[#allocation3 + $0x1620] sm:$0xff] }
 0x1ae   : > { %2720 = vmatpush.msra.mxu2 %v2573_v21  ;;  %2740 = vmatpush.msra.mxu3 %v2574_v22  ;;  %v5091_v46 = vadd.f32 %v1785_v0, %v1347_v57  ;;  %v5093_v9 = vadd.f32 %v1805_v43, %v1348_v17  ;;  %v2625_v21 = vld [vmem:[#allocation3 + $0x1a30] sm:$0xff]  ;;  %v2626_v22 = vld [vmem:[#allocation3 + $0x1a38] sm:$0xff]  ;;  %v2607_v57 = vld [vmem:[#allocation3 + $0x19a0] sm:$0xff] }
 0x1af   : > { %2681 = vmatpush.msra.mxu0 %v2555_v18  ;;  %2701 = vmatpush.msra.mxu1 %v2556_v61  ;;  %v2608_v17 = vld [vmem:[#allocation3 + $0x19a8] sm:$0xff]  ;;  %v2591_v0 = vld [vmem:[#allocation3 + $0x1920] sm:$0xff]  ;;  %v2514_v48 = vld [vmem:[#allocation3 + $0x16b8] sm:$0xff] }
 0x1b0   : > { %2721 = vmatpush.msra.mxu2 %v2557_v54  ;;  %2741 = vmatpush.msra.mxu3 %v2558_v55  ;;  %v2609_v54 = vld [vmem:[#allocation3 + $0x19b0] sm:$0xff]  ;;  %v2592_v43 = vld [vmem:[#allocation3 + $0x1928] sm:$0xff] }
 0x1b1   : > { %2682 = vmatpush.msra.mxu0 %v2539_v44  ;;  %2702 = vmatpush.msra.mxu1 %v2540_v5  ;;  %v2594_v44 = vld [vmem:[#allocation3 + $0x1938] sm:$0xff]  ;;  %v800_v5 = vadd.f32 %v4960_v12, %v234_v58  ;;  %v2561_v12 = vld [vmem:[#allocation3 + $0x1830] sm:$0xff]  ;;  %v2644_v58 = vld [vmem:[#allocation3 + $0x1ac8] sm:$0xff] }
 0x1b2   : > { %2722 = vmatpush.msra.mxu2 %v2541_v37  ;;  %2742 = vmatpush.msra.mxu3 %v2542_v40  ;;  %v801_v37 = vadd.f32 %v4962_v13, %v235_v59  ;;  %v2575_v40 = vld [vmem:[#allocation3 + $0x18a0] sm:$0xff]  ;;  %v2562_v13 = vld [vmem:[#allocation3 + $0x1838] sm:$0xff]  ;;  %v2645_v59 = vld [vmem:[#allocation3 + $0x1ad0] sm:$0xff] }
 0x1b3   : > { %2683 = vmatpush.msra.mxu0 %v2523_v10  ;;  %2703 = vmatpush.msra.mxu1 %v2524_v32  ;;  %v2576_v10 = vld [vmem:[#allocation3 + $0x18a8] sm:$0xff]  ;;  %v2577_v32 = vld [vmem:[#allocation3 + $0x18b0] sm:$0xff] }
 0x1b4   : > { %2723 = vmatpush.msra.mxu2 %v2525_v63  ;;  %2743 = vmatpush.msra.mxu3 %v2526_v14  ;;  %v2578_v63 = vld [vmem:[#allocation3 + $0x18b8] sm:$0xff]  ;;  %v1351_v14 = vadd.f32 %v5019_v11, %v800_v5  ;;  %v2545_v11 = vld [vmem:[#allocation3 + $0x17b0] sm:$0xff] }
 0x1b5   : > { %2684 = vmatpush.msra.mxu0 %v2507_v15  ;;  %2704 = vmatpush.msra.mxu1 %v2508_v19  ;;  %v1352_v15 = vadd.f32 %v5021_v62, %v801_v37  ;;  %v2559_v19 = vld [vmem:[#allocation3 + $0x1820] sm:$0xff]  ;;  %v2546_v62 = vld [vmem:[#allocation3 + $0x17b8] sm:$0xff] }
 0x1b6   : > { %2724 = vmatpush.msra.mxu2 %v2509_v20  ;;  %2744 = vmatpush.msra.mxu3 %v2510_v26  ;;  %v2560_v20 = vld [vmem:[#allocation3 + $0x1828] sm:$0xff]  ;;  %v2614_v5 = vld [vmem:[#allocation3 + $0x19d8] sm:$0xff] }
 0x1b7   : > { %2685 = vmatpush.msra.mxu0 %v2491_v27  ;;  %2705 = vmatpush.msra.mxu1 %v2492_v23  ;;  %v2543_v23 = vld [vmem:[#allocation3 + $0x17a0] sm:$0xff] }
 0x1b8   : > { %2725 = vmatpush.msra.mxu2 %v2493_v29  ;;  %2745 = vmatpush.msra.mxu3 %v2494_v28  ;;  %v2544_v29 = vld [vmem:[#allocation3 + $0x17a8] sm:$0xff] }
 0x1b9   : > { %4374 = vmatmul.msk.f32.vlgmr.msra.gmra.mxu0 %vm462_vm0, %v5096_v31  ;;  %4375 = vmatmul.msk.f32.vlgmr.msra.gmra.mxu1 %vm462_vm0, %v5096_v31 }
 0x1ba   : > { %4376 = vmatmul.msk.f32.vlgmr.msra.gmra.mxu2 %vm462_vm0, %v5096_v31  ;;  %4377 = vmatmul.msk.f32.vlgmr.msra.gmra.mxu3 %vm462_vm0, %v5096_v31 }
 0x1bb   : > { %2755 = vmatpush.msrb.mxu0 %v2655_v33  ;;  %2775 = vmatpush.msrb.mxu1 %v2656_v38  ;;  %v2528_v33 = vld [vmem:[#allocation3 + $0x1728] sm:$0xff]  ;;  %v2529_v38 = vld [vmem:[#allocation3 + $0x1730] sm:$0xff] }
 0x1bc   : > { %2795 = vmatpush.msrb.mxu2 %v2657_v39  ;;  %2815 = vmatpush.msrb.mxu3 %v2658_v36  ;;  %v2530_v39 = vld [vmem:[#allocation3 + $0x1738] sm:$0xff]  ;;  %v2511_v36 = vld [vmem:[#allocation3 + $0x16a0] sm:$0xff] }
 0x1bd   : > { %2756 = vmatpush.msrb.mxu0 %v2639_v41  ;;  %2776 = vmatpush.msrb.mxu1 %v2640_v7  ;;  %v2512_v41 = vld [vmem:[#allocation3 + $0x16a8] sm:$0xff]  ;;  %v2513_v7 = vld [vmem:[#allocation3 + $0x16b0] sm:$0xff] }
 0x1be   : > { %2796 = vmatpush.msrb.mxu2 %v2641_v4  ;;  %2816 = vmatpush.msrb.mxu3 %v2642_v30  ;;  %v1825_v18 = vpop.f32.mrf.mxu0  ;;  %v1845_v61 = vpop.f32.mrf.mxu1  ;;  %v2496_v4 = vld [vmem:[#allocation3 + $0x1628] sm:$0xff]  ;;  %v2497_v30 = vld [vmem:[#allocation3 + $0x1630] sm:$0xff] }
 0x1bf   : > { %2757 = vmatpush.msrb.mxu0 %v2623_v51  ;;  %2777 = vmatpush.msrb.mxu1 %v2624_v52  ;;  %v5114_v55 = vadd.f32 %v1825_v18, %v1349_v53  ;;  %v5116_v16 = vadd.f32 %v1845_v61, %v1350_v56  ;;  %v2498_v51 = vld [vmem:[#allocation3 + $0x1638] sm:$0xff]  ;;  %v2659_v52 = vld [vmem:[#allocation3 + $0x1b40] sm:$0xff]  ;;  %v2660_v53 = vld [vmem:[#allocation3 + $0x1b48] sm:$0xff] }
 0x1c0   : > { %2797 = vmatpush.msrb.mxu2 %v2625_v21  ;;  %2817 = vmatpush.msrb.mxu3 %v2626_v22  ;;  %v2661_v56 = vld [vmem:[#allocation3 + $0x1b50] sm:$0xff]  ;;  %v2662_v21 = vld [vmem:[#allocation3 + $0x1b58] sm:$0xff]  ;;  %v2643_v22 = vld [vmem:[#allocation3 + $0x1ac0] sm:$0xff] }
 0x1c1   : > { %2758 = vmatpush.msrb.mxu0 %v2607_v57  ;;  %2778 = vmatpush.msrb.mxu1 %v2608_v17  ;;  %v2646_v57 = vld [vmem:[#allocation3 + $0x1ad8] sm:$0xff]  ;;  %v2627_v17 = vld [vmem:[#allocation3 + $0x1a40] sm:$0xff]  ;;  %v2628_v18 = vld [vmem:[#allocation3 + $0x1a48] sm:$0xff] }
 0x1c2   : > { %2798 = vmatpush.msrb.mxu2 %v2609_v54  ;;  %2818 = vmatpush.msrb.mxu3 %v2610_v45  ;;  %v2629_v61 = vld [vmem:[#allocation3 + $0x1a50] sm:$0xff]  ;;  %v2630_v54 = vld [vmem:[#allocation3 + $0x1a58] sm:$0xff]  ;;  %v2611_v45 = vld [vmem:[#allocation3 + $0x19c0] sm:$0xff] }
 0x1c3   : > { %2759 = vmatpush.msrb.mxu0 %v2591_v0  ;;  %2779 = vmatpush.msrb.mxu1 %v2592_v43  ;;  %v2612_v0 = vld [vmem:[#allocation3 + $0x19c8] sm:$0xff] }
 0x1c4   : > { %2799 = vmatpush.msrb.mxu2 %v2593_v60  ;;  %2819 = vmatpush.msrb.mxu3 %v2594_v44  ;;  %v2613_v44 = vld [vmem:[#allocation3 + $0x19d0] sm:$0xff] }
 0x1c5   : > { %2760 = vmatpush.msrb.mxu0 %v2575_v40  ;;  %2780 = vmatpush.msrb.mxu1 %v2576_v10  ;;  %v1865_v26 = vpop.f32.mrf.mxu2  ;;  %v1885_v27 = vpop.f32.mrf.mxu3  ;;  %v2595_v10 = vld [vmem:[#allocation3 + $0x1940] sm:$0xff] }
 0x1c6   : > { %2800 = vmatpush.msrb.mxu2 %v2577_v32  ;;  %2820 = vmatpush.msrb.mxu3 %v2578_v63  ;;  %v5122_v28 = vadd.f32 %v1865_v26, %v1351_v14  ;;  %v5124_v34 = vadd.f32 %v1885_v27, %v1352_v15  ;;  %v2596_v32 = vld [vmem:[#allocation3 + $0x1948] sm:$0xff]  ;;  %v2597_v63 = vld [vmem:[#allocation3 + $0x1950] sm:$0xff]  ;;  %v2598_v14 = vld [vmem:[#allocation3 + $0x1958] sm:$0xff] }
 0x1c7   : > { %2761 = vmatpush.msrb.mxu0 %v2559_v19  ;;  %2781 = vmatpush.msrb.mxu1 %v2560_v20  ;;  %v2579_v15 = vld [vmem:[#allocation3 + $0x18c0] sm:$0xff]  ;;  %v2580_v19 = vld [vmem:[#allocation3 + $0x18c8] sm:$0xff]  ;;  %v2581_v20 = vld [vmem:[#allocation3 + $0x18d0] sm:$0xff] }
 0x1c8   : > { %2801 = vmatpush.msrb.mxu2 %v2561_v12  ;;  %2821 = vmatpush.msrb.mxu3 %v2562_v13  ;;  %v2564_v12 = vld [vmem:[#allocation3 + $0x1848] sm:$0xff]  ;;  %v2565_v13 = vld [vmem:[#allocation3 + $0x1850] sm:$0xff]  ;;  %v2566_v26 = vld [vmem:[#allocation3 + $0x1858] sm:$0xff] }
 0x1c9   : > { %2762 = vmatpush.msrb.mxu0 %v2543_v23  ;;  %2782 = vmatpush.msrb.mxu1 %v2544_v29  ;;  %v2547_v29 = vld [vmem:[#allocation3 + $0x17c0] sm:$0xff] }
 0x1ca   : > { %2802 = vmatpush.msrb.mxu2 %v2545_v11  ;;  %2822 = vmatpush.msrb.mxu3 %v2546_v62  ;;  %v2548_v11 = vld [vmem:[#allocation3 + $0x17c8] sm:$0xff] }
 0x1cb   : > { %2763 = vmatpush.msrb.mxu0 %v2527_v35  ;;  %2783 = vmatpush.msrb.mxu1 %v2528_v33  ;;  %v2549_v33 = vld [vmem:[#allocation3 + $0x17d0] sm:$0xff] }
 0x1cc   : > { %2803 = vmatpush.msrb.mxu2 %v2529_v38  ;;  %2823 = vmatpush.msrb.mxu3 %v2530_v39  ;;  %v2550_v38 = vld [vmem:[#allocation3 + $0x17d8] sm:$0xff]  ;;  %v2531_v39 = vld [vmem:[#allocation3 + $0x1740] sm:$0xff] }
 0x1cd   : > { %2764 = vmatpush.msrb.mxu0 %v2511_v36  ;;  %2784 = vmatpush.msrb.mxu1 %v2512_v41  ;;  %v2532_v36 = vld [vmem:[#allocation3 + $0x1748] sm:$0xff]  ;;  %v2533_v41 = vld [vmem:[#allocation3 + $0x1750] sm:$0xff] }
 0x1ce   : > { %2804 = vmatpush.msrb.mxu2 %v2513_v7  ;;  %2824 = vmatpush.msrb.mxu3 %v2514_v48  ;;  %v2534_v7 = vld [vmem:[#allocation3 + $0x1758] sm:$0xff]  ;;  %v2515_v48 = vld [vmem:[#allocation3 + $0x16c0] sm:$0xff] }
 0x1cf   : > { %2765 = vmatpush.msrb.mxu0 %v2495_v3  ;;  %2785 = vmatpush.msrb.mxu1 %v2496_v4  ;;  %v2518_v3 = vld [vmem:[#allocation3 + $0x16d8] sm:$0xff]  ;;  %v2499_v4 = vld [vmem:[#allocation3 + $0x1640] sm:$0xff] }
 0x1d0   : > { %2805 = vmatpush.msrb.mxu2 %v2497_v30  ;;  %2825 = vmatpush.msrb.mxu3 %v2498_v51  ;;  %v2500_v30 = vld [vmem:[#allocation3 + $0x1648] sm:$0xff]  ;;  %v2501_v51 = vld [vmem:[#allocation3 + $0x1650] sm:$0xff] }
 0x1d1   : > { %4378 = vmatmul.msk.f32.vlgmr.msrb.gmra.mxu0 %vm462_vm0, %v5096_v31  ;;  %4379 = vmatmul.msk.f32.vlgmr.msrb.gmra.mxu1 %vm462_vm0, %v5096_v31 }
 0x1d2   : > { %4380 = vmatmul.msk.f32.vlgmr.msrb.gmra.mxu2 %vm462_vm0, %v5096_v31  ;;  %4381 = vmatmul.msk.f32.vlgmr.msrb.gmra.mxu3 %vm462_vm0, %v5096_v31 }
 0x1d3   : > { %2835 = vmatpush.msra.mxu0 %v2659_v52  ;;  %2855 = vmatpush.msra.mxu1 %v2660_v53  ;;  %v2502_v52 = vld [vmem:[#allocation3 + $0x1658] sm:$0xff]  ;;  %v2663_v53 = vld [vmem:[#allocation3 + $0x1b60] sm:$0xff] }
 0x1d4   : > { %2875 = vmatpush.msra.mxu2 %v2661_v56  ;;  %2895 = vmatpush.msra.mxu3 %v2662_v21  ;;  %v2664_v56 = vld [vmem:[#allocation3 + $0x1b68] sm:$0xff]  ;;  %v2665_v21 = vld [vmem:[#allocation3 + $0x1b70] sm:$0xff] }
 0x1d5   : > { %2836 = vmatpush.msra.mxu0 %v2643_v22  ;;  %2856 = vmatpush.msra.mxu1 %v2644_v58  ;;  %v2666_v22 = vld [vmem:[#allocation3 + $0x1b78] sm:$0xff]  ;;  %v2647_v58 = vld [vmem:[#allocation3 + $0x1ae0] sm:$0xff] }
 0x1d6   : > { %2876 = vmatpush.msra.mxu2 %v2645_v59  ;;  %2896 = vmatpush.msra.mxu3 %v2646_v57  ;;  %v2136_v43 = vpop.f32.mrf.mxu0  ;;  %v2156_v60 = vpop.f32.mrf.mxu1  ;;  %v2648_v59 = vld [vmem:[#allocation3 + $0x1ae8] sm:$0xff]  ;;  %v2649_v57 = vld [vmem:[#allocation3 + $0x1af0] sm:$0xff] }
 0x1d7   : > { %2837 = vmatpush.msra.mxu0 %v2627_v17  ;;  %2857 = vmatpush.msra.mxu1 %v2628_v18  ;;  %v5135_v37 = vadd.f32 %v2136_v43, %v5025_v25  ;;  %v5138_v40 = vadd.f32 %v2156_v60, %v5027_v24  ;;  %v2582_v25 = vld [vmem:[#allocation3 + $0x18d8] sm:$0xff]  ;;  %v2563_v24 = vld [vmem:[#allocation3 + $0x1840] sm:$0xff]  ;;  %v2616_v43 = vld [vmem:[#allocation3 + $0x19e8] sm:$0xff] }
 0x1d8   : > { %2877 = vmatpush.msra.mxu2 %v2629_v61  ;;  %2897 = vmatpush.msra.mxu3 %v2630_v54  ;;  %v2650_v17 = vld [vmem:[#allocation3 + $0x1af8] sm:$0xff]  ;;  %v2631_v18 = vld [vmem:[#allocation3 + $0x1a60] sm:$0xff]  ;;  %v2632_v61 = vld [vmem:[#allocation3 + $0x1a68] sm:$0xff] }
 0x1d9   : > { %2838 = vmatpush.msra.mxu0 %v2611_v45  ;;  %2858 = vmatpush.msra.mxu1 %v2612_v0  ;;  %v2633_v54 = vld [vmem:[#allocation3 + $0x1a70] sm:$0xff]  ;;  %v2634_v45 = vld [vmem:[#allocation3 + $0x1a78] sm:$0xff]  ;;  %v2615_v0 = vld [vmem:[#allocation3 + $0x19e0] sm:$0xff] }
 0x1da   : > { %2878 = vmatpush.msra.mxu2 %v2613_v44  ;;  %2898 = vmatpush.msra.mxu3 %v2614_v5  ;;  %v2617_v5 = vld [vmem:[#allocation3 + $0x19f0] sm:$0xff] }
 0x1db   : > { %2839 = vmatpush.msra.mxu0 %v2595_v10  ;;  %2859 = vmatpush.msra.mxu1 %v2596_v32  ;;  %v2618_v10 = vld [vmem:[#allocation3 + $0x19f8] sm:$0xff] }
 0x1dc   : > { %2879 = vmatpush.msra.mxu2 %v2597_v63  ;;  %2899 = vmatpush.msra.mxu3 %v2598_v14  ;;  %v2599_v14 = vld [vmem:[#allocation3 + $0x1960] sm:$0xff] }
 0x1dd   : > { %2840 = vmatpush.msra.mxu0 %v2579_v15  ;;  %2860 = vmatpush.msra.mxu1 %v2580_v19  ;;  %v2176_v27 = vpop.f32.mrf.mxu2  ;;  %v2196_v23 = vpop.f32.mrf.mxu3  ;;  %v2600_v15 = vld [vmem:[#allocation3 + $0x1968] sm:$0xff]  ;;  %v2601_v19 = vld [vmem:[#allocation3 + $0x1970] sm:$0xff] }
 0x1de   : > { %2880 = vmatpush.msra.mxu2 %v2581_v20  ;;  %2900 = vmatpush.msra.mxu3 %v2582_v25  ;;  %v5141_v62 = vadd.f32 %v2176_v27, %v5033_v1  ;;  %v5144_v35 = vadd.f32 %v2196_v23, %v5035_v2  ;;  %v2516_v1 = vld [vmem:[#allocation3 + $0x16c8] sm:$0xff]  ;;  %v2517_v2 = vld [vmem:[#allocation3 + $0x16d0] sm:$0xff]  ;;  %v2602_v20 = vld [vmem:[#allocation3 + $0x1978] sm:$0xff] }
 0x1df   : > { %2841 = vmatpush.msra.mxu0 %v2563_v24  ;;  %2861 = vmatpush.msra.mxu1 %v2564_v12  ;;  %v2583_v25 = vld [vmem:[#allocation3 + $0x18e0] sm:$0xff]  ;;  %v2584_v24 = vld [vmem:[#allocation3 + $0x18e8] sm:$0xff]  ;;  %v2585_v12 = vld [vmem:[#allocation3 + $0x18f0] sm:$0xff] }
 0x1e0   : > { %2881 = vmatpush.msra.mxu2 %v2565_v13  ;;  %2901 = vmatpush.msra.mxu3 %v2566_v26  ;;  %v2568_v13 = vld [vmem:[#allocation3 + $0x1868] sm:$0xff]  ;;  %v2569_v26 = vld [vmem:[#allocation3 + $0x1870] sm:$0xff]  ;;  %v2570_v27 = vld [vmem:[#allocation3 + $0x1878] sm:$0xff] }
 0x1e1   : > { %2842 = vmatpush.msra.mxu0 %v2547_v29  ;;  %2862 = vmatpush.msra.mxu1 %v2548_v11  ;;  %v2551_v11 = vld [vmem:[#allocation3 + $0x17e0] sm:$0xff] }
 0x1e2   : > { %2882 = vmatpush.msra.mxu2 %v2549_v33  ;;  %2902 = vmatpush.msra.mxu3 %v2550_v38  ;;  %v2552_v33 = vld [vmem:[#allocation3 + $0x17e8] sm:$0xff] }
 0x1e3   : > { %2843 = vmatpush.msra.mxu0 %v2531_v39  ;;  %2863 = vmatpush.msra.mxu1 %v2532_v36  ;;  %v2553_v36 = vld [vmem:[#allocation3 + $0x17f0] sm:$0xff] }
 0x1e4   : > { %2883 = vmatpush.msra.mxu2 %v2533_v41  ;;  %2903 = vmatpush.msra.mxu3 %v2534_v7  ;;  %v2554_v41 = vld [vmem:[#allocation3 + $0x17f8] sm:$0xff]  ;;  %v2535_v7 = vld [vmem:[#allocation3 + $0x1760] sm:$0xff] }
 0x1e5   : > { %2844 = vmatpush.msra.mxu0 %v2515_v48  ;;  %2864 = vmatpush.msra.mxu1 %v2516_v1  ;;  %v2536_v48 = vld [vmem:[#allocation3 + $0x1768] sm:$0xff]  ;;  %v2537_v1 = vld [vmem:[#allocation3 + $0x1770] sm:$0xff] }
 0x1e6   : > { %2884 = vmatpush.msra.mxu2 %v2517_v2  ;;  %2904 = vmatpush.msra.mxu3 %v2518_v3  ;;  %v2538_v2 = vld [vmem:[#allocation3 + $0x1778] sm:$0xff]  ;;  %v2519_v3 = vld [vmem:[#allocation3 + $0x16e0] sm:$0xff] }
 0x1e7   : > { %2845 = vmatpush.msra.mxu0 %v2499_v4  ;;  %2865 = vmatpush.msra.mxu1 %v2500_v30  ;;  %v2522_v4 = vld [vmem:[#allocation3 + $0x16f8] sm:$0xff]  ;;  %v2503_v30 = vld [vmem:[#allocation3 + $0x1660] sm:$0xff] }
 0x1e8   : > { %2885 = vmatpush.msra.mxu2 %v2501_v51  ;;  %2905 = vmatpush.msra.mxu3 %v2502_v52  ;;  %v2504_v51 = vld [vmem:[#allocation3 + $0x1668] sm:$0xff]  ;;  %v2505_v52 = vld [vmem:[#allocation3 + $0x1670] sm:$0xff] }
 0x1e9   : > { %4382 = vmatmul.msk.f32.vlgmr.msra.gmra.mxu0 %vm462_vm0, %v5096_v31  ;;  %4383 = vmatmul.msk.f32.vlgmr.msra.gmra.mxu1 %vm462_vm0, %v5096_v31 }
 0x1ea   : > { %4384 = vmatmul.msk.f32.vlgmr.msra.gmra.mxu2 %vm462_vm0, %v5096_v31  ;;  %4385 = vmatmul.msk.f32.vlgmr.msra.gmra.mxu3 %vm462_vm0, %v5096_v31 }
 0x1eb   : > { %2915 = vmatpush.msrb.mxu0 %v2663_v53  ;;  %2935 = vmatpush.msrb.mxu1 %v2664_v56  ;;  %v2506_v53 = vld [vmem:[#allocation3 + $0x1678] sm:$0xff]  ;;  %v3202_v56 = vld [vmem:[#allocation3 + $0x2080] sm:$0xff] }
 0x1ec   : > { %2955 = vmatpush.msrb.mxu2 %v2665_v21  ;;  %2975 = vmatpush.msrb.mxu3 %v2666_v22  ;;  %v3203_v21 = vld [vmem:[#allocation3 + $0x2088] sm:$0xff]  ;;  %v3204_v22 = vld [vmem:[#allocation3 + $0x2090] sm:$0xff] }
 0x1ed   : > { %2916 = vmatpush.msrb.mxu0 %v2647_v58  ;;  %2936 = vmatpush.msrb.mxu1 %v2648_v59  ;;  %v3205_v58 = vld [vmem:[#allocation3 + $0x2098] sm:$0xff]  ;;  %v3186_v59 = vld [vmem:[#allocation3 + $0x2000] sm:$0xff] }
 0x1ee   : > { %2956 = vmatpush.msrb.mxu2 %v2649_v57  ;;  %2976 = vmatpush.msrb.mxu3 %v2650_v17  ;;  %v2216_v60 = vpop.f32.mrf.mxu0  ;;  %v2236_v44 = vpop.f32.mrf.mxu1  ;;  %v3187_v57 = vld [vmem:[#allocation3 + $0x2008] sm:$0xff]  ;;  %v3188_v17 = vld [vmem:[#allocation3 + $0x2010] sm:$0xff] }
 0x1ef   : > { %2917 = vmatpush.msrb.mxu0 %v2631_v18  ;;  %2937 = vmatpush.msrb.mxu1 %v2632_v61  ;;  %v5155_v32 = vadd.f32 %v2216_v60, %v5053_v6  ;;  %v5158_v63 = vadd.f32 %v2236_v44, %v5055_v47  ;;  %v2586_v6 = vld [vmem:[#allocation3 + $0x18f8] sm:$0xff]  ;;  %v2567_v47 = vld [vmem:[#allocation3 + $0x1860] sm:$0xff]  ;;  %v3155_v60 = vld [vmem:[#allocation3 + $0x1f08] sm:$0xff] }
 0x1f0   : > { %2957 = vmatpush.msrb.mxu2 %v2633_v54  ;;  %2977 = vmatpush.msrb.mxu3 %v2634_v45  ;;  %v3189_v18 = vld [vmem:[#allocation3 + $0x2018] sm:$0xff]  ;;  %v3170_v61 = vld [vmem:[#allocation3 + $0x1f80] sm:$0xff]  ;;  %v3171_v54 = vld [vmem:[#allocation3 + $0x1f88] sm:$0xff] }
 0x1f1   : > { %2918 = vmatpush.msrb.mxu0 %v2615_v0  ;;  %2938 = vmatpush.msrb.mxu1 %v2616_v43  ;;  %v3172_v45 = vld [vmem:[#allocation3 + $0x1f90] sm:$0xff]  ;;  %v3173_v0 = vld [vmem:[#allocation3 + $0x1f98] sm:$0xff]  ;;  %v3154_v43 = vld [vmem:[#allocation3 + $0x1f00] sm:$0xff] }
 0x1f2   : > { %2958 = vmatpush.msrb.mxu2 %v2617_v5  ;;  %2978 = vmatpush.msrb.mxu3 %v2618_v10  ;;  %v3156_v5 = vld [vmem:[#allocation3 + $0x1f10] sm:$0xff]  ;;  %v3157_v10 = vld [vmem:[#allocation3 + $0x1f18] sm:$0xff] }
 0x1f3   : > { %2919 = vmatpush.msrb.mxu0 %v2599_v14  ;;  %2939 = vmatpush.msrb.mxu1 %v2600_v15 }
 0x1f4   : > { %2959 = vmatpush.msrb.mxu2 %v2601_v19  ;;  %2979 = vmatpush.msrb.mxu3 %v2602_v20  ;;  %v3138_v19 = vld [vmem:[#allocation3 + $0x1e80] sm:$0xff]  ;;  %v3139_v20 = vld [vmem:[#allocation3 + $0x1e88] sm:$0xff] }
 0x1f5   : > { %2920 = vmatpush.msrb.mxu0 %v2583_v25  ;;  %2940 = vmatpush.msrb.mxu1 %v2584_v24  ;;  %v2256_v23 = vpop.f32.mrf.mxu2  ;;  %v2276_v29 = vpop.f32.mrf.mxu3  ;;  %v3140_v25 = vld [vmem:[#allocation3 + $0x1e90] sm:$0xff]  ;;  %v3141_v24 = vld [vmem:[#allocation3 + $0x1e98] sm:$0xff] }
 0x1f6   : > { %2960 = vmatpush.msrb.mxu2 %v2585_v12  ;;  %2980 = vmatpush.msrb.mxu3 %v2586_v6  ;;  %v5161_v38 = vadd.f32 %v2256_v23, %v5061_v49  ;;  %v5164_v39 = vadd.f32 %v2276_v29, %v5063_v50  ;;  %v2520_v49 = vld [vmem:[#allocation3 + $0x16e8] sm:$0xff]  ;;  %v2521_v50 = vld [vmem:[#allocation3 + $0x16f0] sm:$0xff]  ;;  %v3122_v12 = vld [vmem:[#allocation3 + $0x1e00] sm:$0xff] }
 0x1f7   : > { %2921 = vmatpush.msrb.mxu0 %v2567_v47  ;;  %2941 = vmatpush.msrb.mxu1 %v2568_v13  ;;  %v3123_v6 = vld [vmem:[#allocation3 + $0x1e08] sm:$0xff]  ;;  %v3124_v47 = vld [vmem:[#allocation3 + $0x1e10] sm:$0xff] }
 0x1f8   : > { %2961 = vmatpush.msrb.mxu2 %v2569_v26  ;;  %2981 = vmatpush.msrb.mxu3 %v2570_v27  ;;  %v3107_v13 = vld [vmem:[#allocation3 + $0x1d88] sm:$0xff]  ;;  %v3108_v26 = vld [vmem:[#allocation3 + $0x1d90] sm:$0xff]  ;;  %v3109_v27 = vld [vmem:[#allocation3 + $0x1d98] sm:$0xff] }
 0x1f9   : > { %2922 = vmatpush.msrb.mxu0 %v2551_v11  ;;  %2942 = vmatpush.msrb.mxu1 %v2552_v33  ;;  %v3090_v11 = vld [vmem:[#allocation3 + $0x1d00] sm:$0xff]  ;;  %v3091_v33 = vld [vmem:[#allocation3 + $0x1d08] sm:$0xff] }
 0x1fa   : > { %2962 = vmatpush.msrb.mxu2 %v2553_v36  ;;  %2982 = vmatpush.msrb.mxu3 %v2554_v41 }
 0x1fb   : > { %2923 = vmatpush.msrb.mxu0 %v2535_v7  ;;  %2943 = vmatpush.msrb.mxu1 %v2536_v48  ;;  %v3092_v7 = vld [vmem:[#allocation3 + $0x1d10] sm:$0xff]  ;;  %v3093_v48 = vld [vmem:[#allocation3 + $0x1d18] sm:$0xff] }
 0x1fc   : > { %2963 = vmatpush.msrb.mxu2 %v2537_v1  ;;  %2983 = vmatpush.msrb.mxu3 %v2538_v2  ;;  %v3074_v1 = vld [vmem:[#allocation3 + $0x1c80] sm:$0xff]  ;;  %v3075_v2 = vld [vmem:[#allocation3 + $0x1c88] sm:$0xff] }
 0x1fd   : > { %2924 = vmatpush.msrb.mxu0 %v2519_v3  ;;  %2944 = vmatpush.msrb.mxu1 %v2520_v49  ;;  %v3076_v3 = vld [vmem:[#allocation3 + $0x1c90] sm:$0xff]  ;;  %v3077_v49 = vld [vmem:[#allocation3 + $0x1c98] sm:$0xff] }
 0x1fe   : > { %2964 = vmatpush.msrb.mxu2 %v2521_v50  ;;  %2984 = vmatpush.msrb.mxu3 %v2522_v4  ;;  %v3058_v50 = vld [vmem:[#allocation3 + $0x1c00] sm:$0xff]  ;;  %v3061_v4 = vld [vmem:[#allocation3 + $0x1c18] sm:$0xff] }
 0x1ff   : > { %2925 = vmatpush.msrb.mxu0 %v2503_v30  ;;  %2945 = vmatpush.msrb.mxu1 %v2504_v51  ;;  %v3042_v30 = vld [vmem:[#allocation3 + $0x1b80] sm:$0xff]  ;;  %v3043_v51 = vld [vmem:[#allocation3 + $0x1b88] sm:$0xff] }
 0x200   : > { %2965 = vmatpush.msrb.mxu2 %v2505_v52  ;;  %2985 = vmatpush.msrb.mxu3 %v2506_v53  ;;  %v3044_v52 = vld [vmem:[#allocation3 + $0x1b90] sm:$0xff]  ;;  %v3045_v53 = vld [vmem:[#allocation3 + $0x1b98] sm:$0xff] }
 0x201   : > { %4386 = vmatmul.msk.f32.vlgmr.msrb.gmra.mxu0 %vm462_vm0, %v5096_v31  ;;  %4387 = vmatmul.msk.f32.vlgmr.msrb.gmra.mxu1 %vm462_vm0, %v5096_v31 }
 0x202   : > { %4388 = vmatmul.msk.f32.vlgmr.msrb.gmra.mxu2 %vm462_vm0, %v5096_v31  ;;  %4389 = vmatmul.msk.f32.vlgmr.msrb.gmra.mxu3 %vm462_vm0, %v5096_v31 }
 0x203   : > { %3226 = vmatpush.msra.mxu0 %v3202_v56  ;;  %3246 = vmatpush.msra.mxu1 %v3203_v21  ;;  %v5187_v56 = vld [vmem:[%s4825_s7 + $0x5] sm:$0xff] }
 0x204   : > { %3266 = vmatpush.msra.mxu2 %v3204_v22  ;;  %3286 = vmatpush.msra.mxu3 %v3205_v58  ;;  %v3206_v21 = vld [vmem:[#allocation3 + $0x20a0] sm:$0xff]  ;;  %v3207_v22 = vld [vmem:[#allocation3 + $0x20a8] sm:$0xff]  ;;  %v3208_v58 = vld [vmem:[#allocation3 + $0x20b0] sm:$0xff] }
 0x205   : > { %3227 = vmatpush.msra.mxu0 %v3186_v59  ;;  %3247 = vmatpush.msra.mxu1 %v3187_v57  ;;  %v3209_v59 = vld [vmem:[#allocation3 + $0x20b8] sm:$0xff]  ;;  %v3190_v57 = vld [vmem:[#allocation3 + $0x2020] sm:$0xff] }
 0x206   : > { %3267 = vmatpush.msra.mxu2 %v3188_v17  ;;  %3287 = vmatpush.msra.mxu3 %v3189_v18  ;;  %v2296_v44 = vpop.f32.mrf.mxu0  ;;  %v2316_v31 = vpop.f32.mrf.mxu1  ;;  %v3191_v17 = vld [vmem:[#allocation3 + $0x2028] sm:$0xff]  ;;  %v3192_v18 = vld [vmem:[#allocation3 + $0x2030] sm:$0xff] }
 0x207   : > { %3228 = vmatpush.msra.mxu0 %v3170_v61  ;;  %3248 = vmatpush.msra.mxu1 %v3171_v54  ;;  %v5175_v14 = vadd.f32 %v2296_v44, %v5083_v42  ;;  %v5178_v15 = vadd.f32 %v2316_v31, %v5085_v8  ;;  %v3125_v42 = vld [vmem:[#allocation3 + $0x1e18] sm:$0xff]  ;;  %v3106_v8 = vld [vmem:[#allocation3 + $0x1d80] sm:$0xff]  ;;  %v3159_v44 = vld [vmem:[#allocation3 + $0x1f28] sm:$0xff] }
 0x208   : > { %3268 = vmatpush.msra.mxu2 %v3172_v45  ;;  %3288 = vmatpush.msra.mxu3 %v3173_v0  ;;  %v3193_v61 = vld [vmem:[#allocation3 + $0x2038] sm:$0xff]  ;;  %v3174_v54 = vld [vmem:[#allocation3 + $0x1fa0] sm:$0xff]  ;;  %v3175_v45 = vld [vmem:[#allocation3 + $0x1fa8] sm:$0xff] }
 0x209   : > { %3229 = vmatpush.msra.mxu0 %v3154_v43  ;;  %3249 = vmatpush.msra.mxu1 %v3155_v60  ;;  %v3176_v0 = vld [vmem:[#allocation3 + $0x1fb0] sm:$0xff]  ;;  %v3177_v43 = vld [vmem:[#allocation3 + $0x1fb8] sm:$0xff]  ;;  %v3158_v60 = vld [vmem:[#allocation3 + $0x1f20] sm:$0xff] }
 0x20a   : > { %3269 = vmatpush.msra.mxu2 %v3156_v5  ;;  %3289 = vmatpush.msra.mxu3 %v3157_v10  ;;  %v3160_v10 = vld [vmem:[#allocation3 + $0x1f30] sm:$0xff] }
 0x20b   : > { %3230 = vmatpush.msra.mxu0 %v3138_v19  ;;  %3250 = vmatpush.msra.mxu1 %v3139_v20  ;;  %v3161_v19 = vld [vmem:[#allocation3 + $0x1f38] sm:$0xff] }
 0x20c   : > { %3270 = vmatpush.msra.mxu2 %v3140_v25  ;;  %3290 = vmatpush.msra.mxu3 %v3141_v24  ;;  %v3142_v24 = vld [vmem:[#allocation3 + $0x1ea0] sm:$0xff] }
 0x20d   : > { %3231 = vmatpush.msra.mxu0 %v3122_v12  ;;  %3251 = vmatpush.msra.mxu1 %v3123_v6  ;;  %v2336_v23 = vpop.f32.mrf.mxu2  ;;  %v2356_v29 = vpop.f32.mrf.mxu3  ;;  %v3143_v12 = vld [vmem:[#allocation3 + $0x1ea8] sm:$0xff]  ;;  %v3144_v6 = vld [vmem:[#allocation3 + $0x1eb0] sm:$0xff] }
 0x20e   : > { %3271 = vmatpush.msra.mxu2 %v3124_v47  ;;  %3291 = vmatpush.msra.mxu3 %v3125_v42  ;;  %v5181_v36 = vadd.f32 %v2336_v23, %v5091_v46  ;;  %v5184_v41 = vadd.f32 %v2356_v29, %v5093_v9  ;;  %v3059_v46 = vld [vmem:[#allocation3 + $0x1c08] sm:$0xff]  ;;  %v3060_v9 = vld [vmem:[#allocation3 + $0x1c10] sm:$0xff]  ;;  %v3145_v47 = vld [vmem:[#allocation3 + $0x1eb8] sm:$0xff] }
 0x20f   : > { %3232 = vmatpush.msra.mxu0 %v3106_v8  ;;  %3252 = vmatpush.msra.mxu1 %v3107_v13  ;;  %v3126_v42 = vld [vmem:[#allocation3 + $0x1e20] sm:$0xff]  ;;  %v3127_v8 = vld [vmem:[#allocation3 + $0x1e28] sm:$0xff]  ;;  %v3128_v13 = vld [vmem:[#allocation3 + $0x1e30] sm:$0xff] }
 0x210   : > { %3272 = vmatpush.msra.mxu2 %v3108_v26  ;;  %3292 = vmatpush.msra.mxu3 %v3109_v27  ;;  %v3111_v26 = vld [vmem:[#allocation3 + $0x1da8] sm:$0xff]  ;;  %v3112_v27 = vld [vmem:[#allocation3 + $0x1db0] sm:$0xff]  ;;  %v3113_v23 = vld [vmem:[#allocation3 + $0x1db8] sm:$0xff] }
 0x211   : > { %3233 = vmatpush.msra.mxu0 %v3090_v11  ;;  %3253 = vmatpush.msra.mxu1 %v3091_v33  ;;  %v3094_v33 = vld [vmem:[#allocation3 + $0x1d20] sm:$0xff] }
 0x212   : > { %3273 = vmatpush.msra.mxu2 %v3092_v7  ;;  %3293 = vmatpush.msra.mxu3 %v3093_v48  ;;  %v3095_v7 = vld [vmem:[#allocation3 + $0x1d28] sm:$0xff] }
 0x213   : > { %3234 = vmatpush.msra.mxu0 %v3074_v1  ;;  %3254 = vmatpush.msra.mxu1 %v3075_v2  ;;  %v3096_v2 = vld [vmem:[#allocation3 + $0x1d30] sm:$0xff] }
 0x214   : > { %3274 = vmatpush.msra.mxu2 %v3076_v3  ;;  %3294 = vmatpush.msra.mxu3 %v3077_v49  ;;  %v3097_v3 = vld [vmem:[#allocation3 + $0x1d38] sm:$0xff]  ;;  %v3078_v49 = vld [vmem:[#allocation3 + $0x1ca0] sm:$0xff] }
 0x215   : > { %3235 = vmatpush.msra.mxu0 %v3058_v50  ;;  %3255 = vmatpush.msra.mxu1 %v3059_v46  ;;  %v3079_v50 = vld [vmem:[#allocation3 + $0x1ca8] sm:$0xff]  ;;  %v3080_v46 = vld [vmem:[#allocation3 + $0x1cb0] sm:$0xff] }
 0x216   : > { %3275 = vmatpush.msra.mxu2 %v3060_v9  ;;  %3295 = vmatpush.msra.mxu3 %v3061_v4  ;;  %v3081_v9 = vld [vmem:[#allocation3 + $0x1cb8] sm:$0xff]  ;;  %v3062_v4 = vld [vmem:[#allocation3 + $0x1c20] sm:$0xff] }
 0x217   : > { %3236 = vmatpush.msra.mxu0 %v3042_v30  ;;  %3256 = vmatpush.msra.mxu1 %v3043_v51  ;;  %v3065_v30 = vld [vmem:[#allocation3 + $0x1c38] sm:$0xff]  ;;  %v3046_v51 = vld [vmem:[#allocation3 + $0x1ba0] sm:$0xff] }
 0x218   : > { %3276 = vmatpush.msra.mxu2 %v3044_v52  ;;  %3296 = vmatpush.msra.mxu3 %v3045_v53  ;;  %v3047_v52 = vld [vmem:[#allocation3 + $0x1ba8] sm:$0xff]  ;;  %v3048_v53 = vld [vmem:[#allocation3 + $0x1bb0] sm:$0xff] }
 0x219   : > { %4392 = vmatmul.msk.f32.vlgmr.msra.gmra.mxu0 %vm462_vm0, %v5187_v56  ;;  %4393 = vmatmul.msk.f32.vlgmr.msra.gmra.mxu1 %vm462_vm0, %v5187_v56 }
 0x21a   : > { %4394 = vmatmul.msk.f32.vlgmr.msra.gmra.mxu2 %vm462_vm0, %v5187_v56  ;;  %4395 = vmatmul.msk.f32.vlgmr.msra.gmra.mxu3 %vm462_vm0, %v5187_v56 }
 0x21b   : > { %3306 = vmatpush.msrb.mxu0 %v3206_v21  ;;  %3326 = vmatpush.msrb.mxu1 %v3207_v22  ;;  %v3049_v21 = vld [vmem:[#allocation3 + $0x1bb8] sm:$0xff]  ;;  %v3210_v22 = vld [vmem:[#allocation3 + $0x20c0] sm:$0xff] }
 0x21c   : > { %3346 = vmatpush.msrb.mxu2 %v3208_v58  ;;  %3366 = vmatpush.msrb.mxu3 %v3209_v59  ;;  %v3211_v58 = vld [vmem:[#allocation3 + $0x20c8] sm:$0xff]  ;;  %v3212_v59 = vld [vmem:[#allocation3 + $0x20d0] sm:$0xff] }
 0x21d   : > { %3307 = vmatpush.msrb.mxu0 %v3190_v57  ;;  %3327 = vmatpush.msrb.mxu1 %v3191_v17  ;;  %v3213_v57 = vld [vmem:[#allocation3 + $0x20d8] sm:$0xff]  ;;  %v3194_v17 = vld [vmem:[#allocation3 + $0x2040] sm:$0xff] }
 0x21e   : > { %3347 = vmatpush.msrb.mxu2 %v3192_v18  ;;  %3367 = vmatpush.msrb.mxu3 %v3193_v61  ;;  %v2376_v31 = vpop.f32.mrf.mxu0  ;;  %v2396_v5 = vpop.f32.mrf.mxu1  ;;  %v3195_v18 = vld [vmem:[#allocation3 + $0x2048] sm:$0xff]  ;;  %v3196_v61 = vld [vmem:[#allocation3 + $0x2050] sm:$0xff] }
 0x21f   : > { %3308 = vmatpush.msrb.mxu0 %v3174_v54  ;;  %3328 = vmatpush.msrb.mxu1 %v3175_v45  ;;  %v5198_v20 = vadd.f32 %v2376_v31, %v5114_v55  ;;  %v5201_v25 = vadd.f32 %v2396_v5, %v5116_v16  ;;  %v3129_v55 = vld [vmem:[#allocation3 + $0x1e38] sm:$0xff]  ;;  %v3110_v16 = vld [vmem:[#allocation3 + $0x1da0] sm:$0xff]  ;;  %v3163_v31 = vld [vmem:[#allocation3 + $0x1f48] sm:$0xff] }
 0x220   : > { %3348 = vmatpush.msrb.mxu2 %v3176_v0  ;;  %3368 = vmatpush.msrb.mxu3 %v3177_v43  ;;  %v3197_v54 = vld [vmem:[#allocation3 + $0x2058] sm:$0xff]  ;;  %v3178_v45 = vld [vmem:[#allocation3 + $0x1fc0] sm:$0xff]  ;;  %v3179_v0 = vld [vmem:[#allocation3 + $0x1fc8] sm:$0xff] }
 0x221   : > { %3309 = vmatpush.msrb.mxu0 %v3158_v60  ;;  %3329 = vmatpush.msrb.mxu1 %v3159_v44  ;;  %v3180_v43 = vld [vmem:[#allocation3 + $0x1fd0] sm:$0xff]  ;;  %v3181_v60 = vld [vmem:[#allocation3 + $0x1fd8] sm:$0xff]  ;;  %v3162_v44 = vld [vmem:[#allocation3 + $0x1f40] sm:$0xff] }
 0x222   : > { %3349 = vmatpush.msrb.mxu2 %v3160_v10  ;;  %3369 = vmatpush.msrb.mxu3 %v3161_v19  ;;  %v3164_v5 = vld [vmem:[#allocation3 + $0x1f50] sm:$0xff]  ;;  %v3165_v10 = vld [vmem:[#allocation3 + $0x1f58] sm:$0xff]  ;;  %v3146_v19 = vld [vmem:[#allocation3 + $0x1ec0] sm:$0xff] }
 0x223   : > { %3310 = vmatpush.msrb.mxu0 %v3142_v24  ;;  %3330 = vmatpush.msrb.mxu1 %v3143_v12  ;;  %v3147_v24 = vld [vmem:[#allocation3 + $0x1ec8] sm:$0xff]  ;;  %v3148_v12 = vld [vmem:[#allocation3 + $0x1ed0] sm:$0xff] }
 0x224   : > { %3350 = vmatpush.msrb.mxu2 %v3144_v6  ;;  %3370 = vmatpush.msrb.mxu3 %v3145_v47  ;;  %v3149_v6 = vld [vmem:[#allocation3 + $0x1ed8] sm:$0xff]  ;;  %v3130_v47 = vld [vmem:[#allocation3 + $0x1e40] sm:$0xff] }
 0x225   : > { %3311 = vmatpush.msrb.mxu0 %v3126_v42  ;;  %3331 = vmatpush.msrb.mxu1 %v3127_v8  ;;  %v2416_v29 = vpop.f32.mrf.mxu2  ;;  %v2436_v11 = vpop.f32.mrf.mxu3  ;;  %v3131_v42 = vld [vmem:[#allocation3 + $0x1e48] sm:$0xff]  ;;  %v3132_v8 = vld [vmem:[#allocation3 + $0x1e50] sm:$0xff] }
 0x226   : > { %3351 = vmatpush.msrb.mxu2 %v3128_v13  ;;  %3371 = vmatpush.msrb.mxu3 %v3129_v55  ;;  %v5204_v48 = vadd.f32 %v2416_v29, %v5122_v28  ;;  %v5207_v1 = vadd.f32 %v2436_v11, %v5124_v34  ;;  %v3063_v28 = vld [vmem:[#allocation3 + $0x1c28] sm:$0xff]  ;;  %v3064_v34 = vld [vmem:[#allocation3 + $0x1c30] sm:$0xff]  ;;  %v3133_v13 = vld [vmem:[#allocation3 + $0x1e58] sm:$0xff] }
 0x227   : > { %3312 = vmatpush.msrb.mxu0 %v3110_v16  ;;  %3332 = vmatpush.msrb.mxu1 %v3111_v26  ;;  %v3114_v55 = vld [vmem:[#allocation3 + $0x1dc0] sm:$0xff]  ;;  %v3115_v16 = vld [vmem:[#allocation3 + $0x1dc8] sm:$0xff]  ;;  %v3116_v26 = vld [vmem:[#allocation3 + $0x1dd0] sm:$0xff] }
 0x228   : > { %3352 = vmatpush.msrb.mxu2 %v3112_v27  ;;  %3372 = vmatpush.msrb.mxu3 %v3113_v23  ;;  %v3117_v27 = vld [vmem:[#allocation3 + $0x1dd8] sm:$0xff]  ;;  %v3098_v23 = vld [vmem:[#allocation3 + $0x1d40] sm:$0xff]  ;;  %v3099_v29 = vld [vmem:[#allocation3 + $0x1d48] sm:$0xff] }
 0x229   : > { %3313 = vmatpush.msrb.mxu0 %v3094_v33  ;;  %3333 = vmatpush.msrb.mxu1 %v3095_v7  ;;  %v3100_v11 = vld [vmem:[#allocation3 + $0x1d50] sm:$0xff]  ;;  %v3101_v33 = vld [vmem:[#allocation3 + $0x1d58] sm:$0xff]  ;;  %v3082_v7 = vld [vmem:[#allocation3 + $0x1cc0] sm:$0xff] }
 0x22a   : > { %3353 = vmatpush.msrb.mxu2 %v3096_v2  ;;  %3373 = vmatpush.msrb.mxu3 %v3097_v3  ;;  %v3083_v2 = vld [vmem:[#allocation3 + $0x1cc8] sm:$0xff]  ;;  %v3084_v3 = vld [vmem:[#allocation3 + $0x1cd0] sm:$0xff] }
 0x22b   : > { %3314 = vmatpush.msrb.mxu0 %v3078_v49  ;;  %3334 = vmatpush.msrb.mxu1 %v3079_v50  ;;  %v3085_v49 = vld [vmem:[#allocation3 + $0x1cd8] sm:$0xff]  ;;  %v3066_v50 = vld [vmem:[#allocation3 + $0x1c40] sm:$0xff] }
 0x22c   : > { %3354 = vmatpush.msrb.mxu2 %v3080_v46  ;;  %3374 = vmatpush.msrb.mxu3 %v3081_v9  ;;  %v3067_v46 = vld [vmem:[#allocation3 + $0x1c48] sm:$0xff]  ;;  %v3068_v9 = vld [vmem:[#allocation3 + $0x1c50] sm:$0xff] }
 0x22d   : > { %3315 = vmatpush.msrb.mxu0 %v3062_v4  ;;  %3335 = vmatpush.msrb.mxu1 %v3063_v28  ;;  %v3069_v4 = vld [vmem:[#allocation3 + $0x1c58] sm:$0xff]  ;;  %v3050_v28 = vld [vmem:[#allocation3 + $0x1bc0] sm:$0xff] }
 0x22e   : > { %3355 = vmatpush.msrb.mxu2 %v3064_v34  ;;  %3375 = vmatpush.msrb.mxu3 %v3065_v30  ;;  %v3051_v34 = vld [vmem:[#allocation3 + $0x1bc8] sm:$0xff]  ;;  %v3052_v30 = vld [vmem:[#allocation3 + $0x1bd0] sm:$0xff] }
 0x22f   : > { %3316 = vmatpush.msrb.mxu0 %v3046_v51  ;;  %3336 = vmatpush.msrb.mxu1 %v3047_v52  ;;  %v3053_v51 = vld [vmem:[#allocation3 + $0x1bd8] sm:$0xff] }
 0x230   : > { %3356 = vmatpush.msrb.mxu2 %v3048_v53  ;;  %3376 = vmatpush.msrb.mxu3 %v3049_v21  ;;  %v3214_v21 = vld [vmem:[#allocation3 + $0x20e0] sm:$0xff] }
 0x231   : > { %4396 = vmatmul.msk.f32.vlgmr.msrb.gmra.mxu0 %vm462_vm0, %v5187_v56  ;;  %4397 = vmatmul.msk.f32.vlgmr.msrb.gmra.mxu1 %vm462_vm0, %v5187_v56 }
 0x232   : > { %4398 = vmatmul.msk.f32.vlgmr.msrb.gmra.mxu2 %vm462_vm0, %v5187_v56  ;;  %4399 = vmatmul.msk.f32.vlgmr.msrb.gmra.mxu3 %vm462_vm0, %v5187_v56 }
 0x233   : > { %3386 = vmatpush.msra.mxu0 %v3210_v22  ;;  %3406 = vmatpush.msra.mxu1 %v3211_v58  ;;  %v3215_v22 = vld [vmem:[#allocation3 + $0x20e8] sm:$0xff]  ;;  %v3216_v58 = vld [vmem:[#allocation3 + $0x20f0] sm:$0xff] }
 0x234   : > { %3426 = vmatpush.msra.mxu2 %v3212_v59  ;;  %3446 = vmatpush.msra.mxu3 %v3213_v57  ;;  %v3217_v59 = vld [vmem:[#allocation3 + $0x20f8] sm:$0xff]  ;;  %v3198_v57 = vld [vmem:[#allocation3 + $0x2060] sm:$0xff] }
 0x235   : > { %3387 = vmatpush.msra.mxu0 %v3194_v17  ;;  %3407 = vmatpush.msra.mxu1 %v3195_v18  ;;  %v3199_v17 = vld [vmem:[#allocation3 + $0x2068] sm:$0xff]  ;;  %v3200_v18 = vld [vmem:[#allocation3 + $0x2070] sm:$0xff] }
 0x236   : > { %3427 = vmatpush.msra.mxu2 %v3196_v61  ;;  %3447 = vmatpush.msra.mxu3 %v3197_v54  ;;  %v5217_v52 = vpop.f32.mrf.mxu0  ;;  %v5219_v53 = vpop.f32.mrf.mxu1  ;;  %v3201_v61 = vld [vmem:[#allocation3 + $0x2078] sm:$0xff]  ;;  %v3182_v54 = vld [vmem:[#allocation3 + $0x1fe0] sm:$0xff] }
 0x237   : > { %3388 = vmatpush.msra.mxu0 %v3178_v45  ;;  %3408 = vmatpush.msra.mxu1 %v3179_v0  ;;  %v3183_v45 = vld [vmem:[#allocation3 + $0x1fe8] sm:$0xff]  ;;  %v3184_v0 = vld [vmem:[#allocation3 + $0x1ff0] sm:$0xff] }
 0x238   : > { %3428 = vmatpush.msra.mxu2 %v3180_v43  ;;  %3448 = vmatpush.msra.mxu3 %v3181_v60  ;;  %v3185_v43 = vld [vmem:[#allocation3 + $0x1ff8] sm:$0xff] }
 0x239   : > { %3389 = vmatpush.msra.mxu0 %v3162_v44  ;;  %3409 = vmatpush.msra.mxu1 %v3163_v31  ;;  %v3166_v31 = vld [vmem:[#allocation3 + $0x1f60] sm:$0xff] }
 0x23a   : > { %3429 = vmatpush.msra.mxu2 %v3164_v5  ;;  %3449 = vmatpush.msra.mxu3 %v3165_v10  ;;  %v3167_v5 = vld [vmem:[#allocation3 + $0x1f68] sm:$0xff] }
 0x23b   : > { %3390 = vmatpush.msra.mxu0 %v3146_v19  ;;  %3410 = vmatpush.msra.mxu1 %v3147_v24  ;;  %v3168_v24 = vld [vmem:[#allocation3 + $0x1f70] sm:$0xff] }
 0x23c   : > { %3430 = vmatpush.msra.mxu2 %v3148_v12  ;;  %3450 = vmatpush.msra.mxu3 %v3149_v6  ;;  %v3169_v12 = vld [vmem:[#allocation3 + $0x1f78] sm:$0xff] }
 0x23d   : > { %3391 = vmatpush.msra.mxu0 %v3130_v47  ;;  %3411 = vmatpush.msra.mxu1 %v3131_v42  ;;  %v5229_v60 = vpop.f32.mrf.mxu2  ;;  %v5231_v44 = vpop.f32.mrf.mxu3  ;;  %v3150_v42 = vld [vmem:[#allocation3 + $0x1ee0] sm:$0xff] }
 0x23e   : > { %3431 = vmatpush.msra.mxu2 %v3132_v8  ;;  %3451 = vmatpush.msra.mxu3 %v3133_v13  ;;  %v3151_v8 = vld [vmem:[#allocation3 + $0x1ee8] sm:$0xff]  ;;  %v3152_v13 = vld [vmem:[#allocation3 + $0x1ef0] sm:$0xff] }
 0x23f   : > { %3392 = vmatpush.msra.mxu0 %v3114_v55  ;;  %3412 = vmatpush.msra.mxu1 %v3115_v16  ;;  %v3153_v55 = vld [vmem:[#allocation3 + $0x1ef8] sm:$0xff]  ;;  %v3134_v16 = vld [vmem:[#allocation3 + $0x1e60] sm:$0xff] }
 0x240   : > { %3432 = vmatpush.msra.mxu2 %v3116_v26  ;;  %3452 = vmatpush.msra.mxu3 %v3117_v27  ;;  %v3135_v26 = vld [vmem:[#allocation3 + $0x1e68] sm:$0xff]  ;;  %v3136_v27 = vld [vmem:[#allocation3 + $0x1e70] sm:$0xff] }
 0x241   : > { %3393 = vmatpush.msra.mxu0 %v3098_v23  ;;  %3413 = vmatpush.msra.mxu1 %v3099_v29  ;;  %v3119_v23 = vld [vmem:[#allocation3 + $0x1de8] sm:$0xff]  ;;  %v3120_v29 = vld [vmem:[#allocation3 + $0x1df0] sm:$0xff] }
 0x242   : > { %3433 = vmatpush.msra.mxu2 %v3100_v11  ;;  %3453 = vmatpush.msra.mxu3 %v3101_v33  ;;  %v3121_v11 = vld [vmem:[#allocation3 + $0x1df8] sm:$0xff] }
 0x243   : > { %3394 = vmatpush.msra.mxu0 %v3082_v7  ;;  %3414 = vmatpush.msra.mxu1 %v3083_v2  ;;  %v3102_v2 = vld [vmem:[#allocation3 + $0x1d60] sm:$0xff] }
 0x244   : > { %3434 = vmatpush.msra.mxu2 %v3084_v3  ;;  %3454 = vmatpush.msra.mxu3 %v3085_v49  ;;  %v3103_v3 = vld [vmem:[#allocation3 + $0x1d68] sm:$0xff] }
 0x245   : > { %3395 = vmatpush.msra.mxu0 %v3066_v50  ;;  %3415 = vmatpush.msra.mxu1 %v3067_v46  ;;  %v3104_v46 = vld [vmem:[#allocation3 + $0x1d70] sm:$0xff] }
 0x246   : > { %3435 = vmatpush.msra.mxu2 %v3068_v9  ;;  %3455 = vmatpush.msra.mxu3 %v3069_v4  ;;  %v3105_v9 = vld [vmem:[#allocation3 + $0x1d78] sm:$0xff]  ;;  %v3086_v4 = vld [vmem:[#allocation3 + $0x1ce0] sm:$0xff] }
 0x247   : > { %3396 = vmatpush.msra.mxu0 %v3050_v28  ;;  %3416 = vmatpush.msra.mxu1 %v3051_v34  ;;  %v3087_v28 = vld [vmem:[#allocation3 + $0x1ce8] sm:$0xff]  ;;  %v3088_v34 = vld [vmem:[#allocation3 + $0x1cf0] sm:$0xff] }
 0x248   : > { %3436 = vmatpush.msra.mxu2 %v3052_v30  ;;  %3456 = vmatpush.msra.mxu3 %v3053_v51  ;;  %v3089_v30 = vld [vmem:[#allocation3 + $0x1cf8] sm:$0xff]  ;;  %v3070_v51 = vld [vmem:[#allocation3 + $0x1c60] sm:$0xff] }
 0x249   : > { %4400 = vmatmul.msk.f32.vlgmr.msra.gmra.mxu0 %vm462_vm0, %v5187_v56  ;;  %4401 = vmatmul.msk.f32.vlgmr.msra.gmra.mxu1 %vm462_vm0, %v5187_v56 }
 0x24a   : > { %4402 = vmatmul.msk.f32.vlgmr.msra.gmra.mxu2 %vm462_vm0, %v5187_v56  ;;  %4403 = vmatmul.msk.f32.vlgmr.msra.gmra.mxu3 %vm462_vm0, %v5187_v56 }
 0x24b   : > { %3466 = vmatpush.msrb.mxu0 %v3214_v21  ;;  %3486 = vmatpush.msrb.mxu1 %v3215_v22  ;;  %v3073_v21 = vld [vmem:[#allocation3 + $0x1c78] sm:$0xff]  ;;  %v3054_v22 = vld [vmem:[#allocation3 + $0x1be0] sm:$0xff] }
 0x24c   : > { %3506 = vmatpush.msrb.mxu2 %v3216_v58  ;;  %3526 = vmatpush.msrb.mxu3 %v3217_v59  ;;  %v3055_v58 = vld [vmem:[#allocation3 + $0x1be8] sm:$0xff]  ;;  %v3056_v59 = vld [vmem:[#allocation3 + $0x1bf0] sm:$0xff] }
 0x24d   : > { %3467 = vmatpush.msrb.mxu0 %v3198_v57  ;;  %3487 = vmatpush.msrb.mxu1 %v3199_v17  ;;  %v3057_v57 = vld [vmem:[#allocation3 + $0x1bf8] sm:$0xff]  ;;  %v3753_v17 = vld [vmem:[#allocation3 + $0x2600] sm:$0xff] }
 0x24e   : > { %3507 = vmatpush.msrb.mxu2 %v3200_v18  ;;  %3527 = vmatpush.msrb.mxu3 %v3201_v61  ;;  %v2767_v10 = vpop.f32.mrf.mxu0  ;;  %v2787_v19 = vpop.f32.mrf.mxu1  ;;  %v3754_v18 = vld [vmem:[#allocation3 + $0x2608] sm:$0xff]  ;;  %v3755_v61 = vld [vmem:[#allocation3 + $0x2610] sm:$0xff] }
 0x24f   : > { %3468 = vmatpush.msrb.mxu0 %v3182_v54  ;;  %3488 = vmatpush.msrb.mxu1 %v3183_v45  ;;  %v5234_v6 = vadd.f32 %v2767_v10, %v5155_v32  ;;  %v5237_v47 = vadd.f32 %v2787_v19, %v5158_v63  ;;  %v3137_v32 = vld [vmem:[#allocation3 + $0x1e78] sm:$0xff]  ;;  %v3118_v63 = vld [vmem:[#allocation3 + $0x1de0] sm:$0xff]  ;;  %v3722_v10 = vld [vmem:[#allocation3 + $0x2508] sm:$0xff] }
 0x250   : > { %3508 = vmatpush.msrb.mxu2 %v3184_v0  ;;  %3528 = vmatpush.msrb.mxu3 %v3185_v43  ;;  %v3756_v54 = vld [vmem:[#allocation3 + $0x2618] sm:$0xff]  ;;  %v3737_v45 = vld [vmem:[#allocation3 + $0x2580] sm:$0xff]  ;;  %v3738_v0 = vld [vmem:[#allocation3 + $0x2588] sm:$0xff] }
 0x251   : > { %3469 = vmatpush.msrb.mxu0 %v3166_v31  ;;  %3489 = vmatpush.msrb.mxu1 %v3167_v5  ;;  %v3739_v43 = vld [vmem:[#allocation3 + $0x2590] sm:$0xff]  ;;  %v3740_v31 = vld [vmem:[#allocation3 + $0x2598] sm:$0xff]  ;;  %v3721_v5 = vld [vmem:[#allocation3 + $0x2500] sm:$0xff] }
 0x252   : > { %3509 = vmatpush.msrb.mxu2 %v3168_v24  ;;  %3529 = vmatpush.msrb.mxu3 %v3169_v12  ;;  %v3723_v19 = vld [vmem:[#allocation3 + $0x2510] sm:$0xff]  ;;  %v3724_v24 = vld [vmem:[#allocation3 + $0x2518] sm:$0xff]  ;;  %v3705_v12 = vld [vmem:[#allocation3 + $0x2480] sm:$0xff] }
 0x253   : > { %3470 = vmatpush.msrb.mxu0 %v3150_v42  ;;  %3490 = vmatpush.msrb.mxu1 %v3151_v8  ;;  %v3706_v42 = vld [vmem:[#allocation3 + $0x2488] sm:$0xff] }
 0x254   : > { %3510 = vmatpush.msrb.mxu2 %v3152_v13  ;;  %3530 = vmatpush.msrb.mxu3 %v3153_v55  ;;  %v3707_v13 = vld [vmem:[#allocation3 + $0x2490] sm:$0xff]  ;;  %v3708_v55 = vld [vmem:[#allocation3 + $0x2498] sm:$0xff] }
 0x255   : > { %3471 = vmatpush.msrb.mxu0 %v3134_v16  ;;  %3491 = vmatpush.msrb.mxu1 %v3135_v26  ;;  %v2807_v33 = vpop.f32.mrf.mxu2  ;;  %v2827_v7 = vpop.f32.mrf.mxu3 }
 0x256   : > { %3511 = vmatpush.msrb.mxu2 %v3136_v27  ;;  %3531 = vmatpush.msrb.mxu3 %v3137_v32  ;;  %v5240_v49 = vadd.f32 %v2807_v33, %v5161_v38  ;;  %v5243_v50 = vadd.f32 %v2827_v7, %v5164_v39  ;;  %v3071_v38 = vld [vmem:[#allocation3 + $0x1c68] sm:$0xff]  ;;  %v3072_v39 = vld [vmem:[#allocation3 + $0x1c70] sm:$0xff]  ;;  %v3689_v27 = vld [vmem:[#allocation3 + $0x2400] sm:$0xff] }
 0x257   : > { %3472 = vmatpush.msrb.mxu0 %v3118_v63  ;;  %3492 = vmatpush.msrb.mxu1 %v3119_v23  ;;  %v3690_v32 = vld [vmem:[#allocation3 + $0x2408] sm:$0xff]  ;;  %v3691_v63 = vld [vmem:[#allocation3 + $0x2410] sm:$0xff]  ;;  %v3692_v23 = vld [vmem:[#allocation3 + $0x2418] sm:$0xff] }
 0x258   : > { %3512 = vmatpush.msrb.mxu2 %v3120_v29  ;;  %3532 = vmatpush.msrb.mxu3 %v3121_v11  ;;  %v3673_v29 = vld [vmem:[#allocation3 + $0x2380] sm:$0xff]  ;;  %v3674_v11 = vld [vmem:[#allocation3 + $0x2388] sm:$0xff]  ;;  %v3675_v33 = vld [vmem:[#allocation3 + $0x2390] sm:$0xff] }
 0x259   : > { %3473 = vmatpush.msrb.mxu0 %v3102_v2  ;;  %3493 = vmatpush.msrb.mxu1 %v3103_v3  ;;  %v3658_v7 = vld [vmem:[#allocation3 + $0x2308] sm:$0xff]  ;;  %v3659_v2 = vld [vmem:[#allocation3 + $0x2310] sm:$0xff]  ;;  %v3660_v3 = vld [vmem:[#allocation3 + $0x2318] sm:$0xff] }
 0x25a   : > { %3513 = vmatpush.msrb.mxu2 %v3104_v46  ;;  %3533 = vmatpush.msrb.mxu3 %v3105_v9 }
 0x25b   : > { %3474 = vmatpush.msrb.mxu0 %v3086_v4  ;;  %3494 = vmatpush.msrb.mxu1 %v3087_v28  ;;  %v3641_v4 = vld [vmem:[#allocation3 + $0x2280] sm:$0xff]  ;;  %v3642_v28 = vld [vmem:[#allocation3 + $0x2288] sm:$0xff] }
 0x25c   : > { %3514 = vmatpush.msrb.mxu2 %v3088_v34  ;;  %3534 = vmatpush.msrb.mxu3 %v3089_v30 }
 0x25d   : > { %3475 = vmatpush.msrb.mxu0 %v3070_v51  ;;  %3495 = vmatpush.msrb.mxu1 %v3071_v38  ;;  %v3643_v51 = vld [vmem:[#allocation3 + $0x2290] sm:$0xff]  ;;  %v3644_v38 = vld [vmem:[#allocation3 + $0x2298] sm:$0xff] }
 0x25e   : > { %3515 = vmatpush.msrb.mxu2 %v3072_v39  ;;  %3535 = vmatpush.msrb.mxu3 %v3073_v21  ;;  %v3625_v39 = vld [vmem:[#allocation3 + $0x2200] sm:$0xff]  ;;  %v3626_v21 = vld [vmem:[#allocation3 + $0x2208] sm:$0xff] }
 0x25f   : > { %3476 = vmatpush.msrb.mxu0 %v3054_v22  ;;  %3496 = vmatpush.msrb.mxu1 %v3055_v58  ;;  %v3627_v22 = vld [vmem:[#allocation3 + $0x2210] sm:$0xff]  ;;  %v3628_v58 = vld [vmem:[#allocation3 + $0x2218] sm:$0xff] }
 0x260   : > { %3516 = vmatpush.msrb.mxu2 %v3056_v59  ;;  %3536 = vmatpush.msrb.mxu3 %v3057_v57  ;;  %v3609_v59 = vld [vmem:[#allocation3 + $0x2180] sm:$0xff]  ;;  %v3612_v57 = vld [vmem:[#allocation3 + $0x2198] sm:$0xff] }
 0x261   : > { %4404 = vmatmul.msk.f32.vlgmr.msrb.gmra.mxu0 %vm462_vm0, %v5187_v56  ;;  %4405 = vmatmul.msk.f32.vlgmr.msrb.gmra.mxu1 %vm462_vm0, %v5187_v56 }
 0x262   : > { %4406 = vmatmul.msk.f32.vlgmr.msrb.gmra.mxu2 %vm462_vm0, %v5187_v56  ;;  %4407 = vmatmul.msk.f32.vlgmr.msrb.gmra.mxu3 %vm462_vm0, %v5187_v56 }
 0x263   : > { %3777 = vmatpush.msra.mxu0 %v3753_v17  ;;  %3797 = vmatpush.msra.mxu1 %v3754_v18  ;;  %v3593_v17 = vld [vmem:[#allocation3 + $0x2100] sm:$0xff]  ;;  %v3594_v18 = vld [vmem:[#allocation3 + $0x2108] sm:$0xff] }
 0x264   : > { %3817 = vmatpush.msra.mxu2 %v3755_v61  ;;  %3837 = vmatpush.msra.mxu3 %v3756_v54  ;;  %v3595_v61 = vld [vmem:[#allocation3 + $0x2110] sm:$0xff]  ;;  %v3596_v54 = vld [vmem:[#allocation3 + $0x2118] sm:$0xff] }
 0x265   : > { %3778 = vmatpush.msra.mxu0 %v3737_v45  ;;  %3798 = vmatpush.msra.mxu1 %v3738_v0  ;;  %v5266_v45 = vld [vmem:[%s4825_s7 + $0x6] sm:$0xff] }
 0x266   : > { %3818 = vmatpush.msra.mxu2 %v3739_v43  ;;  %3838 = vmatpush.msra.mxu3 %v3740_v31  ;;  %v2847_v8 = vpop.f32.mrf.mxu0  ;;  %v2867_v56 = vpop.f32.mrf.mxu1  ;;  %v3757_v0 = vld [vmem:[#allocation3 + $0x2620] sm:$0xff]  ;;  %v3758_v43 = vld [vmem:[#allocation3 + $0x2628] sm:$0xff]  ;;  %v3759_v31 = vld [vmem:[#allocation3 + $0x2630] sm:$0xff] }
 0x267   : > { %3779 = vmatpush.msra.mxu0 %v3721_v5  ;;  %3799 = vmatpush.msra.mxu1 %v3722_v10  ;;  %v5254_v16 = vadd.f32 %v2847_v8, %v5175_v14  ;;  %v5257_v26 = vadd.f32 %v2867_v56, %v5178_v15  ;;  %v3676_v14 = vld [vmem:[#allocation3 + $0x2398] sm:$0xff]  ;;  %v3657_v15 = vld [vmem:[#allocation3 + $0x2300] sm:$0xff]  ;;  %v3726_v8 = vld [vmem:[#allocation3 + $0x2528] sm:$0xff] }
 0x268   : > { %3819 = vmatpush.msra.mxu2 %v3723_v19  ;;  %3839 = vmatpush.msra.mxu3 %v3724_v24  ;;  %v3760_v5 = vld [vmem:[#allocation3 + $0x2638] sm:$0xff]  ;;  %v3741_v10 = vld [vmem:[#allocation3 + $0x25a0] sm:$0xff]  ;;  %v3742_v19 = vld [vmem:[#allocation3 + $0x25a8] sm:$0xff] }
 0x269   : > { %3780 = vmatpush.msra.mxu0 %v3705_v12  ;;  %3800 = vmatpush.msra.mxu1 %v3706_v42  ;;  %v3743_v24 = vld [vmem:[#allocation3 + $0x25b0] sm:$0xff]  ;;  %v3744_v12 = vld [vmem:[#allocation3 + $0x25b8] sm:$0xff]  ;;  %v3725_v42 = vld [vmem:[#allocation3 + $0x2520] sm:$0xff] }
 0x26a   : > { %3820 = vmatpush.msra.mxu2 %v3707_v13  ;;  %3840 = vmatpush.msra.mxu3 %v3708_v55  ;;  %v3727_v56 = vld [vmem:[#allocation3 + $0x2530] sm:$0xff]  ;;  %v3728_v13 = vld [vmem:[#allocation3 + $0x2538] sm:$0xff]  ;;  %v3709_v55 = vld [vmem:[#allocation3 + $0x24a0] sm:$0xff] }
 0x26b   : > { %3781 = vmatpush.msra.mxu0 %v3689_v27  ;;  %3801 = vmatpush.msra.mxu1 %v3690_v32  ;;  %v3710_v27 = vld [vmem:[#allocation3 + $0x24a8] sm:$0xff] }
 0x26c   : > { %3821 = vmatpush.msra.mxu2 %v3691_v63  ;;  %3841 = vmatpush.msra.mxu3 %v3692_v23  ;;  %v3711_v23 = vld [vmem:[#allocation3 + $0x24b0] sm:$0xff] }
 0x26d   : > { %3782 = vmatpush.msra.mxu0 %v3673_v29  ;;  %3802 = vmatpush.msra.mxu1 %v3674_v11  ;;  %v2887_v46 = vpop.f32.mrf.mxu2  ;;  %v2907_v9 = vpop.f32.mrf.mxu3  ;;  %v3712_v29 = vld [vmem:[#allocation3 + $0x24b8] sm:$0xff] }
 0x26e   : > { %3822 = vmatpush.msra.mxu2 %v3675_v33  ;;  %3842 = vmatpush.msra.mxu3 %v3676_v14  ;;  %v5260_v34 = vadd.f32 %v2887_v46, %v5181_v36  ;;  %v5263_v30 = vadd.f32 %v2907_v9, %v5184_v41  ;;  %v3610_v36 = vld [vmem:[#allocation3 + $0x2188] sm:$0xff]  ;;  %v3611_v41 = vld [vmem:[#allocation3 + $0x2190] sm:$0xff]  ;;  %v3693_v14 = vld [vmem:[#allocation3 + $0x2420] sm:$0xff] }
 0x26f   : > { %3783 = vmatpush.msra.mxu0 %v3657_v15  ;;  %3803 = vmatpush.msra.mxu1 %v3658_v7  ;;  %v3694_v15 = vld [vmem:[#allocation3 + $0x2428] sm:$0xff]  ;;  %v3695_v7 = vld [vmem:[#allocation3 + $0x2430] sm:$0xff] }
 0x270   : > { %3823 = vmatpush.msra.mxu2 %v3659_v2  ;;  %3843 = vmatpush.msra.mxu3 %v3660_v3  ;;  %v3696_v2 = vld [vmem:[#allocation3 + $0x2438] sm:$0xff]  ;;  %v3677_v3 = vld [vmem:[#allocation3 + $0x23a0] sm:$0xff]  ;;  %v3678_v46 = vld [vmem:[#allocation3 + $0x23a8] sm:$0xff] }
 0x271   : > { %3784 = vmatpush.msra.mxu0 %v3641_v4  ;;  %3804 = vmatpush.msra.mxu1 %v3642_v28  ;;  %v3679_v9 = vld [vmem:[#allocation3 + $0x23b0] sm:$0xff]  ;;  %v3662_v4 = vld [vmem:[#allocation3 + $0x2328] sm:$0xff] }
 0x272   : > { %3824 = vmatpush.msra.mxu2 %v3643_v51  ;;  %3844 = vmatpush.msra.mxu3 %v3644_v38  ;;  %v3663_v28 = vld [vmem:[#allocation3 + $0x2330] sm:$0xff]  ;;  %v3664_v51 = vld [vmem:[#allocation3 + $0x2338] sm:$0xff] }
 0x273   : > { %3785 = vmatpush.msra.mxu0 %v3625_v39  ;;  %3805 = vmatpush.msra.mxu1 %v3626_v21  ;;  %v3645_v21 = vld [vmem:[#allocation3 + $0x22a0] sm:$0xff] }
 0x274   : > { %3825 = vmatpush.msra.mxu2 %v3627_v22  ;;  %3845 = vmatpush.msra.mxu3 %v3628_v58  ;;  %v3646_v22 = vld [vmem:[#allocation3 + $0x22a8] sm:$0xff] }
 0x275   : > { %3786 = vmatpush.msra.mxu0 %v3609_v59  ;;  %3806 = vmatpush.msra.mxu1 %v3610_v36  ;;  %v3647_v36 = vld [vmem:[#allocation3 + $0x22b0] sm:$0xff] }
 0x276   : > { %3826 = vmatpush.msra.mxu2 %v3611_v41  ;;  %3846 = vmatpush.msra.mxu3 %v3612_v57  ;;  %v3648_v41 = vld [vmem:[#allocation3 + $0x22b8] sm:$0xff]  ;;  %v3629_v57 = vld [vmem:[#allocation3 + $0x2220] sm:$0xff] }
 0x277   : > { %3787 = vmatpush.msra.mxu0 %v3593_v17  ;;  %3807 = vmatpush.msra.mxu1 %v3594_v18  ;;  %v3630_v17 = vld [vmem:[#allocation3 + $0x2228] sm:$0xff]  ;;  %v3631_v18 = vld [vmem:[#allocation3 + $0x2230] sm:$0xff] }
 0x278   : > { %3827 = vmatpush.msra.mxu2 %v3595_v61  ;;  %3847 = vmatpush.msra.mxu3 %v3596_v54  ;;  %v3632_v61 = vld [vmem:[#allocation3 + $0x2238] sm:$0xff]  ;;  %v3613_v54 = vld [vmem:[#allocation3 + $0x21a0] sm:$0xff] }
 0x279   : > { %4410 = vmatmul.msk.f32.vlgmr.msra.gmra.mxu0 %vm462_vm0, %v5266_v45  ;;  %4411 = vmatmul.msk.f32.vlgmr.msra.gmra.mxu1 %vm462_vm0, %v5266_v45 }
 0x27a   : > { %4412 = vmatmul.msk.f32.vlgmr.msra.gmra.mxu2 %vm462_vm0, %v5266_v45  ;;  %4413 = vmatmul.msk.f32.vlgmr.msra.gmra.mxu3 %vm462_vm0, %v5266_v45 }
 0x27b   : > { %3857 = vmatpush.msrb.mxu0 %v3757_v0  ;;  %3877 = vmatpush.msrb.mxu1 %v3758_v43  ;;  %v3616_v0 = vld [vmem:[#allocation3 + $0x21b8] sm:$0xff]  ;;  %v3597_v43 = vld [vmem:[#allocation3 + $0x2120] sm:$0xff] }
 0x27c   : > { %3897 = vmatpush.msrb.mxu2 %v3759_v31  ;;  %3917 = vmatpush.msrb.mxu3 %v3760_v5  ;;  %v3598_v31 = vld [vmem:[#allocation3 + $0x2128] sm:$0xff]  ;;  %v3599_v5 = vld [vmem:[#allocation3 + $0x2130] sm:$0xff] }
 0x27d   : > { %3858 = vmatpush.msrb.mxu0 %v3741_v10  ;;  %3878 = vmatpush.msrb.mxu1 %v3742_v19  ;;  %v3600_v10 = vld [vmem:[#allocation3 + $0x2138] sm:$0xff]  ;;  %v3761_v19 = vld [vmem:[#allocation3 + $0x2640] sm:$0xff] }
 0x27e   : > { %3898 = vmatpush.msrb.mxu2 %v3743_v24  ;;  %3918 = vmatpush.msrb.mxu3 %v3744_v12  ;;  %v2927_v32 = vpop.f32.mrf.mxu0  ;;  %v2947_v63 = vpop.f32.mrf.mxu1  ;;  %v3762_v24 = vld [vmem:[#allocation3 + $0x2648] sm:$0xff]  ;;  %v3763_v12 = vld [vmem:[#allocation3 + $0x2650] sm:$0xff] }
 0x27f   : > { %3859 = vmatpush.msrb.mxu0 %v3725_v42  ;;  %3879 = vmatpush.msrb.mxu1 %v3726_v8  ;;  %v5277_v11 = vadd.f32 %v2927_v32, %v5198_v20  ;;  %v5280_v33 = vadd.f32 %v2947_v63, %v5201_v25  ;;  %v3680_v20 = vld [vmem:[#allocation3 + $0x23b8] sm:$0xff]  ;;  %v3661_v25 = vld [vmem:[#allocation3 + $0x2320] sm:$0xff]  ;;  %v3730_v32 = vld [vmem:[#allocation3 + $0x2548] sm:$0xff] }
 0x280   : > { %3899 = vmatpush.msrb.mxu2 %v3727_v56  ;;  %3919 = vmatpush.msrb.mxu3 %v3728_v13  ;;  %v3764_v42 = vld [vmem:[#allocation3 + $0x2658] sm:$0xff]  ;;  %v3745_v8 = vld [vmem:[#allocation3 + $0x25c0] sm:$0xff]  ;;  %v3746_v56 = vld [vmem:[#allocation3 + $0x25c8] sm:$0xff] }
 0x281   : > { %3860 = vmatpush.msrb.mxu0 %v3709_v55  ;;  %3880 = vmatpush.msrb.mxu1 %v3710_v27  ;;  %v3747_v13 = vld [vmem:[#allocation3 + $0x25d0] sm:$0xff]  ;;  %v3748_v55 = vld [vmem:[#allocation3 + $0x25d8] sm:$0xff]  ;;  %v3729_v27 = vld [vmem:[#allocation3 + $0x2540] sm:$0xff] }
 0x282   : > { %3900 = vmatpush.msrb.mxu2 %v3711_v23  ;;  %3920 = vmatpush.msrb.mxu3 %v3712_v29  ;;  %v3731_v63 = vld [vmem:[#allocation3 + $0x2550] sm:$0xff]  ;;  %v3732_v23 = vld [vmem:[#allocation3 + $0x2558] sm:$0xff]  ;;  %v3713_v29 = vld [vmem:[#allocation3 + $0x24c0] sm:$0xff] }
 0x283   : > { %3861 = vmatpush.msrb.mxu0 %v3693_v14  ;;  %3881 = vmatpush.msrb.mxu1 %v3694_v15  ;;  %v3714_v14 = vld [vmem:[#allocation3 + $0x24c8] sm:$0xff]  ;;  %v3715_v15 = vld [vmem:[#allocation3 + $0x24d0] sm:$0xff] }
 0x284   : > { %3901 = vmatpush.msrb.mxu2 %v3695_v7  ;;  %3921 = vmatpush.msrb.mxu3 %v3696_v2  ;;  %v3716_v7 = vld [vmem:[#allocation3 + $0x24d8] sm:$0xff]  ;;  %v3697_v2 = vld [vmem:[#allocation3 + $0x2440] sm:$0xff] }
 0x285   : > { %3862 = vmatpush.msrb.mxu0 %v3677_v3  ;;  %3882 = vmatpush.msrb.mxu1 %v3678_v46  ;;  %v2967_v38 = vpop.f32.mrf.mxu2  ;;  %v2987_v39 = vpop.f32.mrf.mxu3  ;;  %v3698_v3 = vld [vmem:[#allocation3 + $0x2448] sm:$0xff]  ;;  %v3699_v46 = vld [vmem:[#allocation3 + $0x2450] sm:$0xff] }
 0x286   : > { %3902 = vmatpush.msrb.mxu2 %v3679_v9  ;;  %3922 = vmatpush.msrb.mxu3 %v3680_v20  ;;  %v5283_v58 = vadd.f32 %v2967_v38, %v5204_v48  ;;  %v5286_v59 = vadd.f32 %v2987_v39, %v5207_v1  ;;  %v3614_v48 = vld [vmem:[#allocation3 + $0x21a8] sm:$0xff]  ;;  %v3615_v1 = vld [vmem:[#allocation3 + $0x21b0] sm:$0xff]  ;;  %v3700_v9 = vld [vmem:[#allocation3 + $0x2458] sm:$0xff] }
 0x287   : > { %3863 = vmatpush.msrb.mxu0 %v3661_v25  ;;  %3883 = vmatpush.msrb.mxu1 %v3662_v4  ;;  %v3681_v20 = vld [vmem:[#allocation3 + $0x23c0] sm:$0xff]  ;;  %v3682_v25 = vld [vmem:[#allocation3 + $0x23c8] sm:$0xff]  ;;  %v3683_v4 = vld [vmem:[#allocation3 + $0x23d0] sm:$0xff] }
 0x288   : > { %3903 = vmatpush.msrb.mxu2 %v3663_v28  ;;  %3923 = vmatpush.msrb.mxu3 %v3664_v51  ;;  %v3684_v28 = vld [vmem:[#allocation3 + $0x23d8] sm:$0xff]  ;;  %v3665_v51 = vld [vmem:[#allocation3 + $0x2340] sm:$0xff]  ;;  %v3666_v38 = vld [vmem:[#allocation3 + $0x2348] sm:$0xff] }
 0x289   : > { %3864 = vmatpush.msrb.mxu0 %v3645_v21  ;;  %3884 = vmatpush.msrb.mxu1 %v3646_v22  ;;  %v3667_v39 = vld [vmem:[#allocation3 + $0x2350] sm:$0xff]  ;;  %v3668_v21 = vld [vmem:[#allocation3 + $0x2358] sm:$0xff]  ;;  %v3649_v22 = vld [vmem:[#allocation3 + $0x22c0] sm:$0xff] }
 0x28a   : > { %3904 = vmatpush.msrb.mxu2 %v3647_v36  ;;  %3924 = vmatpush.msrb.mxu3 %v3648_v41  ;;  %v3650_v36 = vld [vmem:[#allocation3 + $0x22c8] sm:$0xff]  ;;  %v3651_v41 = vld [vmem:[#allocation3 + $0x22d0] sm:$0xff] }
 0x28b   : > { %3865 = vmatpush.msrb.mxu0 %v3629_v57  ;;  %3885 = vmatpush.msrb.mxu1 %v3630_v17  ;;  %v3652_v57 = vld [vmem:[#allocation3 + $0x22d8] sm:$0xff]  ;;  %v3633_v17 = vld [vmem:[#allocation3 + $0x2240] sm:$0xff] }
 0x28c   : > { %3905 = vmatpush.msrb.mxu2 %v3631_v18  ;;  %3925 = vmatpush.msrb.mxu3 %v3632_v61  ;;  %v3634_v18 = vld [vmem:[#allocation3 + $0x2248] sm:$0xff]  ;;  %v3635_v61 = vld [vmem:[#allocation3 + $0x2250] sm:$0xff] }
 0x28d   : > { %3866 = vmatpush.msrb.mxu0 %v3613_v54  ;;  %3886 = vmatpush.msrb.mxu1 %v3614_v48  ;;  %v3636_v54 = vld [vmem:[#allocation3 + $0x2258] sm:$0xff]  ;;  %v3617_v48 = vld [vmem:[#allocation3 + $0x21c0] sm:$0xff] }
 0x28e   : > { %3906 = vmatpush.msrb.mxu2 %v3615_v1  ;;  %3926 = vmatpush.msrb.mxu3 %v3616_v0  ;;  %v3618_v1 = vld [vmem:[#allocation3 + $0x21c8] sm:$0xff]  ;;  %v3619_v0 = vld [vmem:[#allocation3 + $0x21d0] sm:$0xff] }
 0x28f   : > { %3867 = vmatpush.msrb.mxu0 %v3597_v43  ;;  %3887 = vmatpush.msrb.mxu1 %v3598_v31  ;;  %v3620_v43 = vld [vmem:[#allocation3 + $0x21d8] sm:$0xff]  ;;  %v3601_v31 = vld [vmem:[#allocation3 + $0x2140] sm:$0xff] }
 0x290   : > { %3907 = vmatpush.msrb.mxu2 %v3599_v5  ;;  %3927 = vmatpush.msrb.mxu3 %v3600_v10  ;;  %v3602_v5 = vld [vmem:[#allocation3 + $0x2148] sm:$0xff]  ;;  %v3603_v10 = vld [vmem:[#allocation3 + $0x2150] sm:$0xff] }
 0x291   : > { %4414 = vmatmul.msk.f32.vlgmr.msrb.gmra.mxu0 %vm462_vm0, %v5266_v45  ;;  %4415 = vmatmul.msk.f32.vlgmr.msrb.gmra.mxu1 %vm462_vm0, %v5266_v45 }
 0x292   : > { %4416 = vmatmul.msk.f32.vlgmr.msrb.gmra.mxu2 %vm462_vm0, %v5266_v45  ;;  %4417 = vmatmul.msk.f32.vlgmr.msrb.gmra.mxu3 %vm462_vm0, %v5266_v45 }
 0x293   : > { %3937 = vmatpush.msra.mxu0 %v3761_v19  ;;  %3957 = vmatpush.msra.mxu1 %v3762_v24  ;;  %v3604_v19 = vld [vmem:[#allocation3 + $0x2158] sm:$0xff]  ;;  %v3765_v24 = vld [vmem:[#allocation3 + $0x2660] sm:$0xff] }
 0x294   : > { %3977 = vmatpush.msra.mxu2 %v3763_v12  ;;  %3997 = vmatpush.msra.mxu3 %v3764_v42  ;;  %v3766_v12 = vld [vmem:[#allocation3 + $0x2668] sm:$0xff]  ;;  %v3767_v42 = vld [vmem:[#allocation3 + $0x2670] sm:$0xff] }
 0x295   : > { %3938 = vmatpush.msra.mxu0 %v3745_v8  ;;  %3958 = vmatpush.msra.mxu1 %v3746_v56  ;;  %v3768_v8 = vld [vmem:[#allocation3 + $0x2678] sm:$0xff]  ;;  %v3749_v56 = vld [vmem:[#allocation3 + $0x25e0] sm:$0xff] }
 0x296   : > { %3978 = vmatpush.msra.mxu2 %v3747_v13  ;;  %3998 = vmatpush.msra.mxu3 %v3748_v55  ;;  %v3750_v13 = vld [vmem:[#allocation3 + $0x25e8] sm:$0xff]  ;;  %v3751_v55 = vld [vmem:[#allocation3 + $0x25f0] sm:$0xff] }
 0x297   : > { %3939 = vmatpush.msra.mxu0 %v3729_v27  ;;  %3959 = vmatpush.msra.mxu1 %v3730_v32  ;;  %v3752_v27 = vld [vmem:[#allocation3 + $0x25f8] sm:$0xff]  ;;  %v3733_v32 = vld [vmem:[#allocation3 + $0x2560] sm:$0xff] }
 0x298   : > { %3979 = vmatpush.msra.mxu2 %v3731_v63  ;;  %3999 = vmatpush.msra.mxu3 %v3732_v23  ;;  %v3734_v63 = vld [vmem:[#allocation3 + $0x2568] sm:$0xff]  ;;  %v3735_v23 = vld [vmem:[#allocation3 + $0x2570] sm:$0xff] }
 0x299   : > { %3940 = vmatpush.msra.mxu0 %v3713_v29  ;;  %3960 = vmatpush.msra.mxu1 %v3714_v14  ;;  %v3736_v29 = vld [vmem:[#allocation3 + $0x2578] sm:$0xff]  ;;  %v3717_v14 = vld [vmem:[#allocation3 + $0x24e0] sm:$0xff] }
 0x29a   : > { %3980 = vmatpush.msra.mxu2 %v3715_v15  ;;  %4000 = vmatpush.msra.mxu3 %v3716_v7  ;;  %v3718_v15 = vld [vmem:[#allocation3 + $0x24e8] sm:$0xff]  ;;  %v3719_v7 = vld [vmem:[#allocation3 + $0x24f0] sm:$0xff] }
 0x29b   : > { %3941 = vmatpush.msra.mxu0 %v3697_v2  ;;  %3961 = vmatpush.msra.mxu1 %v3698_v3  ;;  %v3720_v2 = vld [vmem:[#allocation3 + $0x24f8] sm:$0xff]  ;;  %v3701_v3 = vld [vmem:[#allocation3 + $0x2460] sm:$0xff] }
 0x29c   : > { %3981 = vmatpush.msra.mxu2 %v3699_v46  ;;  %4001 = vmatpush.msra.mxu3 %v3700_v9  ;;  %v3702_v46 = vld [vmem:[#allocation3 + $0x2468] sm:$0xff]  ;;  %v3703_v9 = vld [vmem:[#allocation3 + $0x2470] sm:$0xff] }
 0x29d   : > { %3942 = vmatpush.msra.mxu0 %v3681_v20  ;;  %3962 = vmatpush.msra.mxu1 %v3682_v25  ;;  %v3704_v20 = vld [vmem:[#allocation3 + $0x2478] sm:$0xff]  ;;  %v3685_v25 = vld [vmem:[#allocation3 + $0x23e0] sm:$0xff] }
 0x29e   : > { %3982 = vmatpush.msra.mxu2 %v3683_v4  ;;  %4002 = vmatpush.msra.mxu3 %v3684_v28  ;;  %v3686_v4 = vld [vmem:[#allocation3 + $0x23e8] sm:$0xff]  ;;  %v3687_v28 = vld [vmem:[#allocation3 + $0x23f0] sm:$0xff] }
 0x29f   : > { %3943 = vmatpush.msra.mxu0 %v3665_v51  ;;  %3963 = vmatpush.msra.mxu1 %v3666_v38  ;;  %v3688_v51 = vld [vmem:[#allocation3 + $0x23f8] sm:$0xff]  ;;  %v3669_v38 = vld [vmem:[#allocation3 + $0x2360] sm:$0xff] }
 0x2a0   : > { %3983 = vmatpush.msra.mxu2 %v3667_v39  ;;  %4003 = vmatpush.msra.mxu3 %v3668_v21  ;;  %v3670_v39 = vld [vmem:[#allocation3 + $0x2368] sm:$0xff]  ;;  %v3671_v21 = vld [vmem:[#allocation3 + $0x2370] sm:$0xff] }
 0x2a1   : > { %3944 = vmatpush.msra.mxu0 %v3649_v22  ;;  %3964 = vmatpush.msra.mxu1 %v3650_v36  ;;  %v3672_v22 = vld [vmem:[#allocation3 + $0x2378] sm:$0xff]  ;;  %v3653_v36 = vld [vmem:[#allocation3 + $0x22e0] sm:$0xff] }
 0x2a2   : > { %3984 = vmatpush.msra.mxu2 %v3651_v41  ;;  %4004 = vmatpush.msra.mxu3 %v3652_v57  ;;  %v3654_v41 = vld [vmem:[#allocation3 + $0x22e8] sm:$0xff]  ;;  %v3655_v57 = vld [vmem:[#allocation3 + $0x22f0] sm:$0xff] }
 0x2a3   : > { %3945 = vmatpush.msra.mxu0 %v3633_v17  ;;  %3965 = vmatpush.msra.mxu1 %v3634_v18  ;;  %v3656_v17 = vld [vmem:[#allocation3 + $0x22f8] sm:$0xff]  ;;  %v3637_v18 = vld [vmem:[#allocation3 + $0x2260] sm:$0xff] }
 0x2a4   : > { %3985 = vmatpush.msra.mxu2 %v3635_v61  ;;  %4005 = vmatpush.msra.mxu3 %v3636_v54  ;;  %v3638_v61 = vld [vmem:[#allocation3 + $0x2268] sm:$0xff]  ;;  %v3639_v54 = vld [vmem:[#allocation3 + $0x2270] sm:$0xff] }
 0x2a5   : > { %3946 = vmatpush.msra.mxu0 %v3617_v48  ;;  %3966 = vmatpush.msra.mxu1 %v3618_v1  ;;  %v3640_v48 = vld [vmem:[#allocation3 + $0x2278] sm:$0xff]  ;;  %v3621_v1 = vld [vmem:[#allocation3 + $0x21e0] sm:$0xff] }
 0x2a6   : > { %3986 = vmatpush.msra.mxu2 %v3619_v0  ;;  %4006 = vmatpush.msra.mxu3 %v3620_v43  ;;  %v3622_v0 = vld [vmem:[#allocation3 + $0x21e8] sm:$0xff]  ;;  %v3623_v43 = vld [vmem:[#allocation3 + $0x21f0] sm:$0xff] }
 0x2a7   : > { %3947 = vmatpush.msra.mxu0 %v3601_v31  ;;  %3967 = vmatpush.msra.mxu1 %v3602_v5  ;;  %v3624_v31 = vld [vmem:[#allocation3 + $0x21f8] sm:$0xff]  ;;  %v3605_v5 = vld [vmem:[#allocation3 + $0x2160] sm:$0xff] }
 0x2a8   : > { %3987 = vmatpush.msra.mxu2 %v3603_v10  ;;  %4007 = vmatpush.msra.mxu3 %v3604_v19  ;;  %v3606_v10 = vld [vmem:[#allocation3 + $0x2168] sm:$0xff]  ;;  %v3607_v19 = vld [vmem:[#allocation3 + $0x2170] sm:$0xff] }
 0x2a9   : > { %4418 = vmatmul.msk.f32.vlgmr.msra.gmra.mxu0 %vm462_vm0, %v5266_v45  ;;  %4419 = vmatmul.msk.f32.vlgmr.msra.gmra.mxu1 %vm462_vm0, %v5266_v45 }
 0x2aa   : > { %4420 = vmatmul.msk.f32.vlgmr.msra.gmra.mxu2 %vm462_vm0, %v5266_v45  ;;  %4421 = vmatmul.msk.f32.vlgmr.msra.gmra.mxu3 %vm462_vm0, %v5266_v45 }
 0x2ab   : > { %4017 = vmatpush.msrb.mxu0 %v3765_v24  ;;  %4037 = vmatpush.msrb.mxu1 %v3766_v12  ;;  %v3608_v24 = vld [vmem:[#allocation3 + $0x2178] sm:$0xff]  ;;  %v3238_v12 = vpop.f32.mrf.mxu0 }
 0x2ac   : > { %4057 = vmatpush.msrb.mxu2 %v3767_v42  ;;  %4077 = vmatpush.msrb.mxu3 %v3768_v8  ;;  %v3258_v42 = vpop.f32.mrf.mxu1  ;;  %v3278_v8 = vpop.f32.mrf.mxu2 }
 0x2ad   : > { %4018 = vmatpush.msrb.mxu0 %v3749_v56  ;;  %4038 = vmatpush.msrb.mxu1 %v3750_v13  ;;  %v3298_v56 = vpop.f32.mrf.mxu3 }
 0x2ae   : > { %4058 = vmatpush.msrb.mxu2 %v3751_v55  ;;  %4078 = vmatpush.msrb.mxu3 %v3752_v27 }
 0x2af   : > { %4019 = vmatpush.msrb.mxu0 %v3733_v32  ;;  %4039 = vmatpush.msrb.mxu1 %v3734_v63 }
 0x2b0   : > { %4059 = vmatpush.msrb.mxu2 %v3735_v23  ;;  %4079 = vmatpush.msrb.mxu3 %v3736_v29 }
 0x2b1   : > { %4020 = vmatpush.msrb.mxu0 %v3717_v14  ;;  %4040 = vmatpush.msrb.mxu1 %v3718_v15 }
 0x2b2   : > { %4060 = vmatpush.msrb.mxu2 %v3719_v7  ;;  %4080 = vmatpush.msrb.mxu3 %v3720_v2 }
 0x2b3   : > { %4021 = vmatpush.msrb.mxu0 %v3701_v3  ;;  %4041 = vmatpush.msrb.mxu1 %v3702_v46  ;;  %v3318_v13 = vpop.f32.mrf.mxu0 }
 0x2b4   : > { %4061 = vmatpush.msrb.mxu2 %v3703_v9  ;;  %4081 = vmatpush.msrb.mxu3 %v3704_v20  ;;  %v3338_v55 = vpop.f32.mrf.mxu1 }
 0x2b5   : > { %4022 = vmatpush.msrb.mxu0 %v3685_v25  ;;  %4042 = vmatpush.msrb.mxu1 %v3686_v4  ;;  %v3358_v27 = vpop.f32.mrf.mxu2  ;;  %v3378_v32 = vpop.f32.mrf.mxu3  ;;  %v2990_v25 = vadd.f32 %v5217_v52, %v5135_v37  ;;  %v2991_v4 = vadd.f32 %v5219_v53, %v5138_v40  ;;  %v2992_v37 = vadd.f32 %v5229_v60, %v5141_v62 }
 0x2b6   : > { %4062 = vmatpush.msrb.mxu2 %v3687_v28  ;;  %4082 = vmatpush.msrb.mxu3 %v3688_v51  ;;  %v2993_v40 = vadd.f32 %v5231_v44, %v5144_v35  ;;  %v3546_v62 = vadd.f32 %v3338_v55, %v5237_v47 }
 0x2b7   : > { %4023 = vmatpush.msrb.mxu0 %v3669_v38  ;;  %4043 = vmatpush.msrb.mxu1 %v3670_v39  ;;  %v3543_v52 = vadd.f32 %v3278_v8, %v2992_v37 }
 0x2b8   : > { %4063 = vmatpush.msrb.mxu2 %v3671_v21  ;;  %4083 = vmatpush.msrb.mxu3 %v3672_v22  ;;  %v3544_v53 = vadd.f32 %v3298_v56, %v2993_v40 }
 0x2b9   : > { %4024 = vmatpush.msrb.mxu0 %v3653_v36  ;;  %4044 = vmatpush.msrb.mxu1 %v3654_v41  ;;  %v3545_v36 = vadd.f32 %v3318_v13, %v5234_v6 }
 0x2ba   : > { %4064 = vmatpush.msrb.mxu2 %v3655_v57  ;;  %4084 = vmatpush.msrb.mxu3 %v3656_v17  ;;  %v3547_v57 = vadd.f32 %v3358_v27, %v5240_v49  ;;  %v3548_v17 = vadd.f32 %v3378_v32, %v5243_v50 }
 0x2bb   : > { %4025 = vmatpush.msrb.mxu0 %v3637_v18  ;;  %4045 = vmatpush.msrb.mxu1 %v3638_v61 }
 0x2bc   : > { %4065 = vmatpush.msrb.mxu2 %v3639_v54  ;;  %4085 = vmatpush.msrb.mxu3 %v3640_v48 }
 0x2bd   : > { %4026 = vmatpush.msrb.mxu0 %v3621_v1  ;;  %4046 = vmatpush.msrb.mxu1 %v3622_v0 }
 0x2be   : > { %4066 = vmatpush.msrb.mxu2 %v3623_v43  ;;  %4086 = vmatpush.msrb.mxu3 %v3624_v31 }
 0x2bf   : > { %4027 = vmatpush.msrb.mxu0 %v3605_v5  ;;  %4047 = vmatpush.msrb.mxu1 %v3606_v10 }
 0x2c0   : > { %4067 = vmatpush.msrb.mxu2 %v3607_v19  ;;  %4087 = vmatpush.msrb.mxu3 %v3608_v24 }
 0x2c1   : > { %4422 = vmatmul.msk.f32.vlgmr.msrb.gmra.mxu0 %vm462_vm0, %v5266_v45  ;;  %4423 = vmatmul.msk.f32.vlgmr.msrb.gmra.mxu1 %vm462_vm0, %v5266_v45 }
 0x2c2   : > { %4424 = vmatmul.msk.f32.vlgmr.msrb.gmra.mxu2 %vm462_vm0, %v5266_v45  ;;  %4425 = vmatmul.msk.f32.vlgmr.msrb.gmra.mxu3 %vm462_vm0, %v5266_v45 }
 0x2c6   : > { %v3398_v63 = vpop.f32.mrf.mxu0  ;;  %v3418_v23 = vpop.f32.mrf.mxu1 }
 0x2c7   : > { %v3549_v6 = vadd.f32 %v3398_v63, %v5254_v16  ;;  %v3550_v47 = vadd.f32 %v3418_v23, %v5257_v26 }
 0x2cd   : > { %v3438_v29 = vpop.f32.mrf.mxu2  ;;  %v3458_v14 = vpop.f32.mrf.mxu3 }
 0x2ce   : > { %v3551_v50 = vadd.f32 %v3438_v29, %v5260_v34  ;;  %v3552_v31 = vadd.f32 %v3458_v14, %v5263_v30 }
 0x2de   : > { %v3478_v15 = vpop.f32.mrf.mxu0  ;;  %v3498_v7 = vpop.f32.mrf.mxu1 }
 0x2df   : > { %v5313_v2 = vadd.f32 %v3478_v15, %v5277_v11  ;;  %v5316_v45 = vadd.f32 %v3498_v7, %v5280_v33  ;;  %v3541_v11 = vadd.f32 %v3238_v12, %v2990_v25  ;;  %v3542_v33 = vadd.f32 %v3258_v42, %v2991_v4 }
 0x2e5   : > { %v3518_v3 = vpop.f32.mrf.mxu2  ;;  %v3538_v46 = vpop.f32.mrf.mxu3 }
 0x2e6   : > { %v5319_v9 = vadd.f32 %v3518_v3, %v5283_v58  ;;  %v5322_v20 = vadd.f32 %v3538_v46, %v5286_v59 }
 0x2f6   : > { %v3789_v28 = vpop.f32.mrf.mxu0  ;;  %v3809_v51 = vpop.f32.mrf.mxu1 }
 0x2f7   : > { %v4092_v38 = vadd.f32 %v3789_v28, %v3541_v11  ;;  %v4093_v39 = vadd.f32 %v3809_v51, %v3542_v33 }
 0x2f9   : > { %4140 = vst [vmem:[%s5331_s11] sm:$0xff] %v4092_v38 }
 0x2fa   : > { %4141 = vst [vmem:[%s5331_s11 + $0x8] sm:$0xff] %v4093_v39 }
 0x2fd   : > { %v3829_v58 = vpop.f32.mrf.mxu2  ;;  %v3849_v59 = vpop.f32.mrf.mxu3 }
 0x2fe   : > { %v4094_v21 = vadd.f32 %v3829_v58, %v3543_v52  ;;  %v4095_v22 = vadd.f32 %v3849_v59, %v3544_v53 }
 0x300   : > { %4142 = vst [vmem:[%s5331_s11 + $0x10] sm:$0xff] %v4094_v21 }
 0x301   : > { %4143 = vst [vmem:[%s5331_s11 + $0x18] sm:$0xff] %v4095_v22 }
 0x30e   : > { %v3869_v60 = vpop.f32.mrf.mxu0  ;;  %v3889_v41 = vpop.f32.mrf.mxu1 }
 0x30f   : > { %v4096_v35 = vadd.f32 %v3869_v60, %v3545_v36  ;;  %v4097_v44 = vadd.f32 %v3889_v41, %v3546_v62 }
 0x311   : > { %4144 = vst [vmem:[%s5331_s11 + $0x20] sm:$0xff] %v4096_v35 }
 0x312   : > { %4145 = vst [vmem:[%s5331_s11 + $0x28] sm:$0xff] %v4097_v44 }
 0x315   : > { %v3909_v18 = vpop.f32.mrf.mxu2  ;;  %v3929_v61 = vpop.f32.mrf.mxu3 }
 0x316   : > { %v4098_v54 = vadd.f32 %v3909_v18, %v3547_v57  ;;  %v4099_v48 = vadd.f32 %v3929_v61, %v3548_v17 }
 0x318   : > { %4146 = vst [vmem:[%s5331_s11 + $0x30] sm:$0xff] %v4098_v54 }
 0x319   : > { %4147 = vst [vmem:[%s5331_s11 + $0x38] sm:$0xff] %v4099_v48 }
 0x326   : > { %v3949_v1 = vpop.f32.mrf.mxu0  ;;  %v3969_v0 = vpop.f32.mrf.mxu1 }
 0x327   : > { %v4100_v43 = vadd.f32 %v3949_v1, %v3549_v6  ;;  %v4101_v49 = vadd.f32 %v3969_v0, %v3550_v47 }
 0x329   : > { %4148 = vst [vmem:[%s5331_s11 + $0x40] sm:$0xff] %v4100_v43 }
 0x32a   : > { %4149 = vst [vmem:[%s5331_s11 + $0x48] sm:$0xff] %v4101_v49 }
 0x32d   : > { %v3989_v5 = vpop.f32.mrf.mxu2  ;;  %v4009_v10 = vpop.f32.mrf.mxu3 }
 0x32e   : > { %v4102_v16 = vadd.f32 %v3989_v5, %v3551_v50  ;;  %v4103_v19 = vadd.f32 %v4009_v10, %v3552_v31 }
 0x330   : > { %4150 = vst [vmem:[%s5331_s11 + $0x50] sm:$0xff] %v4102_v16 }
 0x331   : > { %4151 = vst [vmem:[%s5331_s11 + $0x58] sm:$0xff] %v4103_v19 }
 0x33e   : > { %v4029_v26 = vpop.f32.mrf.mxu0  ;;  %v4049_v24 = vpop.f32.mrf.mxu1 }
 0x33f   : > { %v4104_v34 = vadd.f32 %v4029_v26, %v5313_v2  ;;  %v4105_v30 = vadd.f32 %v4049_v24, %v5316_v45 }
 0x341   : > { %4152 = vst [vmem:[%s5331_s11 + $0x60] sm:$0xff] %v4104_v34 }
 0x342   : > { %4153 = vst [vmem:[%s5331_s11 + $0x68] sm:$0xff] %v4105_v30 }
 0x345   : > { %v4069_v12 = vpop.f32.mrf.mxu2  ;;  %v4089_v42 = vpop.f32.mrf.mxu3 }
 0x346   : > { %v4106_v8 = vadd.f32 %v4069_v12, %v5319_v9  ;;  %v4107_v56 = vadd.f32 %v4089_v42, %v5322_v20 }
 0x348   : > { %4154 = vst [vmem:[%s5331_s11 + $0x70] sm:$0xff] %v4106_v8 }
 0x349   : > { %4155 = vst [vmem:[%s5331_s11 + $0x78] sm:$0xff] %v4107_v56 }
 0x34a   : > { %4614 = shalt.err (!%p4611_p10)
}
 0x34b   : > { %4441 = dma.vmem_to_hbm [thread:$0]  (%p4767_p3), %s4173_s15, 2048, %s4175_s16, %s4157_s30  }
 0x34c PF: > { %p4458_p11 = scmp.ge.s32.totalorder %s4689_s19, 2  ;;  %s4186_s9 = sand.u32 1, %s4661_s12  }
 0x34d   : > { %s4187_s11 = scalar_lea.sflag [#allocation5], %s4186_s9 }
 0x34e   : > { %p4451_p12 = pnand %p4458_p11, %p4776_p8 }
 0x350   : > { %p4452_p13 = pneg %p4451_p12 }
 0x352   : > { %4656 = dma.done.wait (%p4452_p13), %s4187_s11, 2048  }
 0x353   : > { %4658 = vsyncadd (%p4452_p13), %s4187_s11, 4294965248  ;;  %s18_s19 = sadd.s32 1, %s4689_s19   ;;  %s5421_s26 = sld [smem:[#allocation12_spill]] }
 0x354   : > { %p15_p0 = scmp.ge.s32.totalorder %s18_s19, 6   ;;  %s5422_s12 = smov %s4665_s13 }
 0x355   : > { %s5423_s13 = smov %s4669_s14  ;;  %s5424_s14 = smov %s4797_s8 }
 0x356   : > { %s5425_s15 = smov %s4681_s17  ;;  %s5426_s16 = smov %s4685_s18 }
 0x357   : > { %s5427_s17 = smov %s5430_s22  ;;  %17 = sbr.rel (!%p15_p0) target bundleno = 7 (0x7), region = 89 }
 0x359   : > { %s5428_s18 = smov %s5421_s26 }
 0x35c   :  { %4193 = vsyncpa [#allocation4], 1 }
 0x35d   :  { %4195 = vsyncpa [#allocation4 + $0x1], 1 }
 0x35e   :  { %4196 = vsyncpa [#allocation7], 1 }
 0x35f   :  { %4197 = vsyncpa [#allocation5], 1 }
 0x360   :  { %4199 = vsyncpa [#allocation5 + $0x1], 1 }

</bundles_post_ra>
